<compile_context>
chip_gen: v6e
topology: v6e:2x2x1
jax: 0.10.0
libtpu: 0.0.40
codegen_flags: <defaults>
</compile_context>

<pallas_src>
import functools

import jax
import jax.numpy as jnp
from jax.experimental import pallas as pl
from jax.experimental.pallas import tpu as pltpu


# --------------------------- Pallas kernels --------------------------------

def _conv_row_kernel(*refs, plan, n_x, has_res, relu, wo):
    """Implicit-GEMM convolution over a block of output rows.

    refs = [x_ref_0 .. x_ref_{n_x-1}, w_ref, bias_ref, (res_ref), out_ref]
      x_ref_i : (rows, Wp, Cin)  bf16 padded-input row block
      w_ref   : (KH*KW, Cin, TN) bf16 weights (tap-major)
      bias_ref: (1, TN)          f32
      res_ref : (R, Wo, TN)      f32 (optional fused residual)
      out_ref : (R, Wo, TN)      f32
    plan[r] = list of (x_ref_index, row_in_block, col_start), one per tap,
    in kh*KW+kw order (matches w_ref's leading axis).
    """
    x_refs = refs[:n_x]
    w_ref = refs[n_x]
    b_ref = refs[n_x + 1]
    res_ref = refs[n_x + 2] if has_res else None
    o_ref = refs[-1]

    bias = b_ref[...]                                   # (1, TN) f32
    for r, taps in enumerate(plan):
        acc = None
        for t, (xi, hrow, wstart) in enumerate(taps):
            a = x_refs[xi][hrow, pl.ds(wstart, wo), :]  # (Wo, Cin) bf16
            d = jnp.dot(a, w_ref[t], preferred_element_type=jnp.float32)
            acc = d if acc is None else acc + d
        row = acc + bias
        if has_res:
            row = row + res_ref[r]
        if relu:
            row = jnp.maximum(row, 0.0)
        o_ref[r] = row.astype(o_ref.dtype)


def _maxpool_kernel(*refs, taps, wo):
    """3x3/stride-2 max pool over one output row; taps index the parity refs."""
    x_refs = refs[:-1]
    o_ref = refs[-1]
    m = None
    for xi, wstart in taps:
        v = x_refs[xi][0, pl.ds(wstart, wo), :]         # (Wo, C)
        m = v if m is None else jnp.maximum(m, v)
    o_ref[0] = m


def _mean_scale_kernel(x_ref, o_ref):
    # x_ref: (N, H*W, 6) -> 0.01 * spatial mean (== out.mean(3).mean(2) * 0.01)
    o_ref[...] = 0.01 * jnp.mean(x_ref[...], axis=1)


# --------------------------- Pallas wrappers --------------------------------

def conv2d(x, w, b, stride, pad, relu, residual=None):
    """x: NHWC f32, w: (Cout, Cin, KH, KW) [PyTorch layout], b: (Cout,).

    Implicit-GEMM convolution: the padded NHWC input is read row-block-wise by
    the BlockSpec index_map, taps are accumulated inside the kernel (bf16 MXU,
    f32 accumulate) and bias / ReLU / residual-add are fused in the epilogue.
    Returns NHWC f32.
    """
    N, H, W, Cin = x.shape
    Cout, _, KH, KW = w.shape
    Ho = (H + 2 * pad - KH) // stride + 1
    Wo = (W + 2 * pad - KW) // stride + 1

    wo_c = max(Wo, 8)            # M of every MXU dot (>= one sublane tile)
    cin_p = max(Cin, 64)         # K  (conv1's 6 channels zero-padded to 64)
    cout_p = max(Cout, 64)       # N  (pose head's 6 channels padded to 64)
    tn = min(cout_p, 256) if cout_p % 128 == 0 else cout_p
    n_ct = cout_p // tn

    # Weights -> (KH*KW, Cin_p, Cout_p) bf16 (tap-major), bias -> (1, Cout_p).
    wt = jnp.transpose(w, (2, 3, 1, 0)).reshape(KH * KW, Cin, Cout)
    wt = jnp.pad(wt, ((0, 0), (0, cin_p - Cin), (0, cout_p - Cout)))
    wt = wt.astype(jnp.bfloat16)
    bias = jnp.pad(b.reshape(1, Cout), ((0, 0), (0, cout_p - Cout)))
    bias = bias.astype(jnp.float32)

    # Padded (spatial + channel) bf16 input.
    if stride == 1:
        req_wp = wo_c + KW - 1
    else:
        req_wp = 2 * ((KW - 1) // 2 + wo_c)
    extra_w = max(0, req_wp - (W + 2 * pad))
    if stride == 2 and (W + 2 * pad + extra_w) % 2:
        extra_w += 1
    xp = jnp.pad(x, ((0, 0), (pad, pad), (pad, pad + extra_w),
                     (0, cin_p - Cin))).astype(jnp.bfloat16)

    x_arrays, x_specs, plan = [], [], []
    if stride == 1:
        r_rows = max(1, min(8, Ho))
        if KH > 1:
            r_rows = max(r_rows, KH - 1)
        n_i = -(-Ho // r_rows)
        n_href = 1 if KH == 1 else 2
        hp_need = (n_i + n_href - 1) * r_rows
        if hp_need > xp.shape[1]:
            xp = jnp.pad(xp, ((0, 0), (0, hp_need - xp.shape[1]),
                              (0, 0), (0, 0)))
        wp = xp.shape[2]
        for jref in range(n_href):
            x_arrays.append(xp)
            x_specs.append(pl.BlockSpec(
                (None, r_rows, wp, cin_p),
                lambda n, j, i, jr=jref: (n, i + jr, 0, 0)))
        for r in range(r_rows):
            taps = []
            for kh in range(KH):
                q = r + kh
                xi, hrow = (0, q) if q < r_rows else (1, q - r_rows)
                for kw in range(KW):
                    taps.append((xi, hrow, kw))
            plan.append(taps)
        ho_pad = n_i * r_rows
    else:
        assert stride == 2
        r_rows, n_i, ho_pad = 1, Ho, Ho
        pars = [0, 1] if KW > 1 else [0]
        splits = {p: xp[:, :, p::2, :] for p in pars}
        we = xp.shape[2] // 2
        for kh in range(KH):
            for p in pars:
                x_arrays.append(splits[p])
                x_specs.append(pl.BlockSpec(
                    (None, 1, we, cin_p),
                    lambda n, j, i, kh=kh: (n, 2 * i + kh, 0, 0)))
        taps = []
        for kh in range(KH):
            for kw in range(KW):
                xi = kh * len(pars) + pars.index(kw % 2)
                taps.append((xi, 0, kw // 2))
        plan = [taps]

    has_res = residual is not None
    inputs = list(x_arrays) + [wt, bias]
    in_specs = list(x_specs) + [
        pl.BlockSpec((KH * KW, cin_p, tn), lambda n, j, i: (0, 0, j)),
        pl.BlockSpec((1, tn), lambda n, j, i: (0, j)),
    ]
    if has_res:
        res = residual.astype(jnp.float32)
        res = jnp.pad(res, ((0, 0), (0, ho_pad - Ho), (0, wo_c - Wo),
                            (0, cout_p - Cout)))
        inputs.append(res)
        in_specs.append(pl.BlockSpec((None, r_rows, wo_c, tn),
                                     lambda n, j, i: (n, i, 0, j)))

    kernel = functools.partial(_conv_row_kernel, plan=plan,
                               n_x=len(x_arrays), has_res=has_res,
                               relu=relu, wo=wo_c)
    out = pl.pallas_call(
        kernel,
        out_shape=jax.ShapeDtypeStruct((N, ho_pad, wo_c, cout_p), jnp.float32),
        grid_spec=pltpu.PrefetchScalarGridSpec(
            num_scalar_prefetch=0,
            grid=(N, n_ct, n_i),
            in_specs=in_specs,
            out_specs=pl.BlockSpec((None, r_rows, wo_c, tn),
                                   lambda n, j, i: (n, i, 0, j)),
        ),
        compiler_params=pltpu.CompilerParams(
            dimension_semantics=("parallel", "parallel", "parallel")),
    )(*inputs)

    if ho_pad > Ho or wo_c > Wo or cout_p > Cout:
        out = out[:, :Ho, :Wo, :Cout]
    return out


def maxpool_3x3_s2(x):
    """MaxPool2d(kernel_size=3, stride=2, padding=1), NHWC, tiled kernel."""
    N, H, W, C = x.shape
    Ho = (H + 2 - 3) // 2 + 1
    Wo = (W + 2 - 3) // 2 + 1
    xp = jnp.pad(x, ((0, 0), (1, 1), (1, 1), (0, 0)),
                 constant_values=-jnp.inf)
    if xp.shape[2] % 2:
        xp = jnp.pad(xp, ((0, 0), (0, 0), (0, 1), (0, 0)),
                     constant_values=-jnp.inf)
    we = xp.shape[2] // 2
    splits = [xp[:, :, 0::2, :], xp[:, :, 1::2, :]]     # even / odd W taps

    arrays, specs = [], []
    for kh in range(3):
        for p in range(2):
            arrays.append(splits[p])
            specs.append(pl.BlockSpec(
                (None, 1, we, C),
                lambda n, i, kh=kh: (n, 2 * i + kh, 0, 0)))
    taps = [(kh * 2 + (kw % 2), kw // 2) for kh in range(3) for kw in range(3)]

    return pl.pallas_call(
        functools.partial(_maxpool_kernel, taps=taps, wo=Wo),
        out_shape=jax.ShapeDtypeStruct((N, Ho, Wo, C), jnp.float32),
        grid_spec=pltpu.PrefetchScalarGridSpec(
            num_scalar_prefetch=0,
            grid=(N, Ho),
            in_specs=specs,
            out_specs=pl.BlockSpec((None, 1, Wo, C), lambda n, i: (n, i, 0, 0)),
        ),
        compiler_params=pltpu.CompilerParams(
            dimension_semantics=("parallel", "parallel")),
    )(*arrays)


def global_mean_scale(x):
    """x: (N, H, W, 6) -> 0.01 * mean over H, W -> (N, 6).  (Tiny tensor.)"""
    N, H, W, C = x.shape
    x3 = x.reshape(N, H * W, C)
    return pl.pallas_call(
        _mean_scale_kernel,
        out_shape=jax.ShapeDtypeStruct((N, C), jnp.float32),
    )(x3)


# --------------------------- parameters -------------------------------------

def _init_conv_bn(key, cin, cout, ksz):
    """Conv (bias=False) + BatchNorm folded (eval mode) -> (w, b)."""
    k1, k2, k3, k4, k5 = jax.random.split(key, 5)
    w = jax.random.normal(k1, (cout, cin, ksz, ksz), jnp.float32)
    w = w / jnp.sqrt(float(cin * ksz * ksz))
    gamma = 1.0 + 0.1 * jax.random.normal(k2, (cout,), jnp.float32)
    beta = 0.1 * jax.random.normal(k3, (cout,), jnp.float32)
    run_mean = 0.1 * jax.random.normal(k4, (cout,), jnp.float32)
    run_var = jnp.abs(1.0 + 0.1 * jax.random.normal(k5, (cout,), jnp.float32))
    scale = gamma / jnp.sqrt(run_var + 1e-5)
    return {'w': w * scale[:, None, None, None], 'b': beta - run_mean * scale}


def _init_conv(key, cin, cout, ksz):
    """Plain Conv2d with bias (decoder convs)."""
    k1, k2 = jax.random.split(key)
    w = jax.random.normal(k1, (cout, cin, ksz, ksz), jnp.float32)
    w = w / jnp.sqrt(float(cin * ksz * ksz))
    b = 0.1 * jax.random.normal(k2, (cout,), jnp.float32)
    return {'w': w, 'b': b}


def init_params(key):
    keys = iter(jax.random.split(key, 64))
    p = {}
    # ResNet-18 encoder, first conv takes 2 concatenated RGB images (6 ch).
    p['conv1'] = _init_conv_bn(next(keys), 6, 64, 7)
    in_ch = 64
    for li, out_ch in enumerate([64, 128, 256, 512]):
        blocks = []
        for bi in range(2):
            stride = 2 if (li > 0 and bi == 0) else 1
            blk = {
                'stride': stride,
                'conv1': _init_conv_bn(next(keys), in_ch, out_ch, 3),
                'conv2': _init_conv_bn(next(keys), out_ch, out_ch, 3),
            }
            if stride != 1 or in_ch != out_ch:
                blk['down'] = _init_conv_bn(next(keys), in_ch, out_ch, 1)
            blocks.append(blk)
            in_ch = out_ch
        p['layer%d' % (li + 1)] = blocks
    # PoseDecoder (num_input_features=1, num_frames_to_predict_for=1)
    p['squeeze'] = _init_conv(next(keys), 512, 256, 1)
    p['pose0'] = _init_conv(next(keys), 256, 256, 3)
    p['pose1'] = _init_conv(next(keys), 256, 256, 3)
    p['pose2'] = _init_conv(next(keys), 256, 6, 1)
    return p


# --------------------------- model forward ----------------------------------

def _basic_block(x, blk):
    out = conv2d(x, blk['conv1']['w'], blk['conv1']['b'],
                 blk['stride'], 1, relu=True)
    if 'down' in blk:
        identity = conv2d(x, blk['down']['w'], blk['down']['b'],
                          blk['stride'], 0, relu=False)
    else:
        identity = x
    # conv2 with BN folded + residual add + ReLU fused in the GEMM epilogue.
    return conv2d(out, blk['conv2']['w'], blk['conv2']['b'], 1, 1,
                  relu=True, residual=identity)


def encoder_forward(x, p):
    # monodepth2 ResnetEncoder normalization
    x = (x - 0.45) / 0.225
    f0 = conv2d(x, p['conv1']['w'], p['conv1']['b'], 2, 3, relu=True)
    y = maxpool_3x3_s2(f0)
    feats = [f0]
    for name in ('layer1', 'layer2', 'layer3', 'layer4'):
        for blk in p[name]:
            y = _basic_block(y, blk)
        feats.append(y)
    return feats


def pose_decoder_forward(features, p):
    f = features[-1]                                     # last encoder feature
    cat = conv2d(f, p['squeeze']['w'], p['squeeze']['b'], 1, 0, relu=True)
    out = conv2d(cat, p['pose0']['w'], p['pose0']['b'], 1, 1, relu=True)
    out = conv2d(out, p['pose1']['w'], p['pose1']['b'], 1, 1, relu=True)
    out = conv2d(out, p['pose2']['w'], p['pose2']['b'], 1, 0, relu=False)
    pose = global_mean_scale(out)                        # (N, 6), already *0.01
    return pose.reshape(-1, 6)


def pose_resnet_forward(img1, img2, params):
    # img1, img2: NCHW float32
    x = jnp.concatenate([img1, img2], axis=1)            # NCHW channel concat
    x = jnp.transpose(x, (0, 2, 3, 1))                   # -> NHWC
    features = encoder_forward(x, params)
    return pose_decoder_forward(features, params)


# --------------------------- main --------------------------------------------

if __name__ == "__main__":
    key = jax.random.PRNGKey(0)
    k_params, k1, k2 = jax.random.split(key, 3)

    B, C, H, W = 2, 3, 32, 32
    img1 = jax.random.normal(k1, (B, C, H, W), jnp.float32)
    img2 = jax.random.normal(k2, (B, C, H, W), jnp.float32)

    params = init_params(k_params)
    pose = pose_resnet_forward(img1, img2, params)
    pose = jax.block_until_ready(pose)

    assert pose.shape == (B, 6), pose.shape
    assert bool(jnp.all(jnp.isfinite(pose)))
    print("KERNEL_OK")
</pallas_src>

<mosaic_0001>
module attributes {stable_mosaic.version = 11 : i64} {
  func.func @_conv_row_kernel(%arg0: i32, %arg1: i32, %arg2: i32, %arg3: memref<1x1x19x64xbf16, #tpu.memory_space<vmem>>, %arg4: memref<1x1x19x64xbf16, #tpu.memory_space<vmem>>, %arg5: memref<1x1x19x64xbf16, #tpu.memory_space<vmem>>, %arg6: memref<1x1x19x64xbf16, #tpu.memory_space<vmem>>, %arg7: memref<1x1x19x64xbf16, #tpu.memory_space<vmem>>, %arg8: memref<1x1x19x64xbf16, #tpu.memory_space<vmem>>, %arg9: memref<1x1x19x64xbf16, #tpu.memory_space<vmem>>, %arg10: memref<1x1x19x64xbf16, #tpu.memory_space<vmem>>, %arg11: memref<1x1x19x64xbf16, #tpu.memory_space<vmem>>, %arg12: memref<1x1x19x64xbf16, #tpu.memory_space<vmem>>, %arg13: memref<1x1x19x64xbf16, #tpu.memory_space<vmem>>, %arg14: memref<1x1x19x64xbf16, #tpu.memory_space<vmem>>, %arg15: memref<1x1x19x64xbf16, #tpu.memory_space<vmem>>, %arg16: memref<1x1x19x64xbf16, #tpu.memory_space<vmem>>, %arg17: memref<49x64x64xbf16, #tpu.memory_space<vmem>>, %arg18: memref<1x64xf32, #tpu.memory_space<vmem>>, %arg19: memref<1x1x16x64xf32, #tpu.memory_space<vmem>>) attributes {dimension_semantics = [#tpu.dimension_semantics<parallel>, #tpu.dimension_semantics<parallel>, #tpu.dimension_semantics<parallel>], iteration_bounds = array<i64: 2, 1, 16>, scalar_prefetch = 0 : i64, scratch_operands = 0 : i64, tpu.core_type = #tpu.core_type<tc>, window_params = [{transform_indices = @transform_0, window_bounds = array<i64: 1, 1, 19, 64>}, {transform_indices = @transform_1, window_bounds = array<i64: 1, 1, 19, 64>}, {transform_indices = @transform_2, window_bounds = array<i64: 1, 1, 19, 64>}, {transform_indices = @transform_3, window_bounds = array<i64: 1, 1, 19, 64>}, {transform_indices = @transform_4, window_bounds = array<i64: 1, 1, 19, 64>}, {transform_indices = @transform_5, window_bounds = array<i64: 1, 1, 19, 64>}, {transform_indices = @transform_6, window_bounds = array<i64: 1, 1, 19, 64>}, {transform_indices = @transform_7, window_bounds = array<i64: 1, 1, 19, 64>}, {transform_indices = @transform_8, window_bounds = array<i64: 1, 1, 19, 64>}, {transform_indices = @transform_9, window_bounds = array<i64: 1, 1, 19, 64>}, {transform_indices = @transform_10, window_bounds = array<i64: 1, 1, 19, 64>}, {transform_indices = @transform_11, window_bounds = array<i64: 1, 1, 19, 64>}, {transform_indices = @transform_12, window_bounds = array<i64: 1, 1, 19, 64>}, {transform_indices = @transform_13, window_bounds = array<i64: 1, 1, 19, 64>}, {transform_indices = @transform_14, window_bounds = array<i64: 49, 64, 64>}, {transform_indices = @transform_15, window_bounds = array<i64: 1, 64>}, {transform_indices = @transform_16, window_bounds = array<i64: 1, 1, 16, 64>}]} {
    %c0 = arith.constant 0 : index
    %c0_0 = arith.constant 0 : index
    %0 = vector.load %arg18[%c0, %c0_0] : memref<1x64xf32, #tpu.memory_space<vmem>>, vector<1x64xf32>
    %c0_1 = arith.constant 0 : index
    %c0_2 = arith.constant 0 : index
    %c0_3 = arith.constant 0 : index
    %c0_4 = arith.constant 0 : index
    %1 = vector.load %arg3[%c0_1, %c0_2, %c0_3, %c0_4] : memref<1x1x19x64xbf16, #tpu.memory_space<vmem>>, vector<1x1x16x64xbf16>
    %2 = vector.shape_cast %1 : vector<1x1x16x64xbf16> to vector<16x64xbf16>
    %c0_5 = arith.constant 0 : index
    %c0_6 = arith.constant 0 : index
    %c0_7 = arith.constant 0 : index
    %3 = vector.load %arg17[%c0_5, %c0_6, %c0_7] : memref<49x64x64xbf16, #tpu.memory_space<vmem>>, vector<1x64x64xbf16>
    %4 = vector.shape_cast %3 : vector<1x64x64xbf16> to vector<64x64xbf16>
    %cst = arith.constant dense<0.000000e+00> : vector<16x64xf32>
    %5 = tpu.matmul %2, %4, %cst {dimension_numbers = #tpu.dot_dimension_numbers<[1], [0], [0], [1], [0, 0, 1, 1], [], []>} : vector<16x64xbf16>, vector<64x64xbf16>, vector<16x64xf32> -> vector<16x64xf32>
    %c0_8 = arith.constant 0 : index
    %c0_9 = arith.constant 0 : index
    %c0_10 = arith.constant 0 : index
    %c0_11 = arith.constant 0 : index
    %6 = vector.load %arg4[%c0_8, %c0_9, %c0_10, %c0_11] : memref<1x1x19x64xbf16, #tpu.memory_space<vmem>>, vector<1x1x16x64xbf16>
    %7 = vector.shape_cast %6 : vector<1x1x16x64xbf16> to vector<16x64xbf16>
    %c1 = arith.constant 1 : index
    %c0_12 = arith.constant 0 : index
    %c0_13 = arith.constant 0 : index
    %8 = vector.load %arg17[%c1, %c0_12, %c0_13] : memref<49x64x64xbf16, #tpu.memory_space<vmem>>, vector<1x64x64xbf16>
    %9 = vector.shape_cast %8 : vector<1x64x64xbf16> to vector<64x64xbf16>
    %cst_14 = arith.constant dense<0.000000e+00> : vector<16x64xf32>
    %10 = tpu.matmul %7, %9, %cst_14 {dimension_numbers = #tpu.dot_dimension_numbers<[1], [0], [0], [1], [0, 0, 1, 1], [], []>} : vector<16x64xbf16>, vector<64x64xbf16>, vector<16x64xf32> -> vector<16x64xf32>
    %11 = arith.addf %5, %10 : vector<16x64xf32>
    %c0_15 = arith.constant 0 : index
    %c0_16 = arith.constant 0 : index
    %c1_17 = arith.constant 1 : index
    %c0_18 = arith.constant 0 : index
    %12 = vector.load %arg3[%c0_15, %c0_16, %c1_17, %c0_18] : memref<1x1x19x64xbf16, #tpu.memory_space<vmem>>, vector<1x1x16x64xbf16>
    %13 = vector.shape_cast %12 : vector<1x1x16x64xbf16> to vector<16x64xbf16>
    %c2 = arith.constant 2 : index
    %c0_19 = arith.constant 0 : index
    %c0_20 = arith.constant 0 : index
    %14 = vector.load %arg17[%c2, %c0_19, %c0_20] : memref<49x64x64xbf16, #tpu.memory_space<vmem>>, vector<1x64x64xbf16>
    %15 = vector.shape_cast %14 : vector<1x64x64xbf16> to vector<64x64xbf16>
    %cst_21 = arith.constant dense<0.000000e+00> : vector<16x64xf32>
    %16 = tpu.matmul %13, %15, %cst_21 {dimension_numbers = #tpu.dot_dimension_numbers<[1], [0], [0], [1], [0, 0, 1, 1], [], []>} : vector<16x64xbf16>, vector<64x64xbf16>, vector<16x64xf32> -> vector<16x64xf32>
    %17 = arith.addf %11, %16 : vector<16x64xf32>
    %c0_22 = arith.constant 0 : index
    %c0_23 = arith.constant 0 : index
    %c1_24 = arith.constant 1 : index
    %c0_25 = arith.constant 0 : index
    %18 = vector.load %arg4[%c0_22, %c0_23, %c1_24, %c0_25] : memref<1x1x19x64xbf16, #tpu.memory_space<vmem>>, vector<1x1x16x64xbf16>
    %19 = vector.shape_cast %18 : vector<1x1x16x64xbf16> to vector<16x64xbf16>
    %c3 = arith.constant 3 : index
    %c0_26 = arith.constant 0 : index
    %c0_27 = arith.constant 0 : index
    %20 = vector.load %arg17[%c3, %c0_26, %c0_27] : memref<49x64x64xbf16, #tpu.memory_space<vmem>>, vector<1x64x64xbf16>
    %21 = vector.shape_cast %20 : vector<1x64x64xbf16> to vector<64x64xbf16>
    %cst_28 = arith.constant dense<0.000000e+00> : vector<16x64xf32>
    %22 = tpu.matmul %19, %21, %cst_28 {dimension_numbers = #tpu.dot_dimension_numbers<[1], [0], [0], [1], [0, 0, 1, 1], [], []>} : vector<16x64xbf16>, vector<64x64xbf16>, vector<16x64xf32> -> vector<16x64xf32>
    %23 = arith.addf %17, %22 : vector<16x64xf32>
    %c0_29 = arith.constant 0 : index
    %c0_30 = arith.constant 0 : index
    %c2_31 = arith.constant 2 : index
    %c0_32 = arith.constant 0 : index
    %24 = vector.load %arg3[%c0_29, %c0_30, %c2_31, %c0_32] : memref<1x1x19x64xbf16, #tpu.memory_space<vmem>>, vector<1x1x16x64xbf16>
    %25 = vector.shape_cast %24 : vector<1x1x16x64xbf16> to vector<16x64xbf16>
    %c4 = arith.constant 4 : index
    %c0_33 = arith.constant 0 : index
    %c0_34 = arith.constant 0 : index
    %26 = vector.load %arg17[%c4, %c0_33, %c0_34] : memref<49x64x64xbf16, #tpu.memory_space<vmem>>, vector<1x64x64xbf16>
    %27 = vector.shape_cast %26 : vector<1x64x64xbf16> to vector<64x64xbf16>
    %cst_35 = arith.constant dense<0.000000e+00> : vector<16x64xf32>
    %28 = tpu.matmul %25, %27, %cst_35 {dimension_numbers = #tpu.dot_dimension_numbers<[1], [0], [0], [1], [0, 0, 1, 1], [], []>} : vector<16x64xbf16>, vector<64x64xbf16>, vector<16x64xf32> -> vector<16x64xf32>
    %29 = arith.addf %23, %28 : vector<16x64xf32>
    %c0_36 = arith.constant 0 : index
    %c0_37 = arith.constant 0 : index
    %c2_38 = arith.constant 2 : index
    %c0_39 = arith.constant 0 : index
    %30 = vector.load %arg4[%c0_36, %c0_37, %c2_38, %c0_39] : memref<1x1x19x64xbf16, #tpu.memory_space<vmem>>, vector<1x1x16x64xbf16>
    %31 = vector.shape_cast %30 : vector<1x1x16x64xbf16> to vector<16x64xbf16>
    %c5 = arith.constant 5 : index
    %c0_40 = arith.constant 0 : index
    %c0_41 = arith.constant 0 : index
    %32 = vector.load %arg17[%c5, %c0_40, %c0_41] : memref<49x64x64xbf16, #tpu.memory_space<vmem>>, vector<1x64x64xbf16>
    %33 = vector.shape_cast %32 : vector<1x64x64xbf16> to vector<64x64xbf16>
    %cst_42 = arith.constant dense<0.000000e+00> : vector<16x64xf32>
    %34 = tpu.matmul %31, %33, %cst_42 {dimension_numbers = #tpu.dot_dimension_numbers<[1], [0], [0], [1], [0, 0, 1, 1], [], []>} : vector<16x64xbf16>, vector<64x64xbf16>, vector<16x64xf32> -> vector<16x64xf32>
    %35 = arith.addf %29, %34 : vector<16x64xf32>
    %c0_43 = arith.constant 0 : index
    %c0_44 = arith.constant 0 : index
    %c3_45 = arith.constant 3 : index
    %c0_46 = arith.constant 0 : index
    %36 = vector.load %arg3[%c0_43, %c0_44, %c3_45, %c0_46] : memref<1x1x19x64xbf16, #tpu.memory_space<vmem>>, vector<1x1x16x64xbf16>
    %37 = vector.shape_cast %36 : vector<1x1x16x64xbf16> to vector<16x64xbf16>
    %c6 = arith.constant 6 : index
    %c0_47 = arith.constant 0 : index
    %c0_48 = arith.constant 0 : index
    %38 = vector.load %arg17[%c6, %c0_47, %c0_48] : memref<49x64x64xbf16, #tpu.memory_space<vmem>>, vector<1x64x64xbf16>
    %39 = vector.shape_cast %38 : vector<1x64x64xbf16> to vector<64x64xbf16>
    %cst_49 = arith.constant dense<0.000000e+00> : vector<16x64xf32>
    %40 = tpu.matmul %37, %39, %cst_49 {dimension_numbers = #tpu.dot_dimension_numbers<[1], [0], [0], [1], [0, 0, 1, 1], [], []>} : vector<16x64xbf16>, vector<64x64xbf16>, vector<16x64xf32> -> vector<16x64xf32>
    %41 = arith.addf %35, %40 : vector<16x64xf32>
    %c0_50 = arith.constant 0 : index
    %c0_51 = arith.constant 0 : index
    %c0_52 = arith.constant 0 : index
    %c0_53 = arith.constant 0 : index
    %42 = vector.load %arg5[%c0_50, %c0_51, %c0_52, %c0_53] : memref<1x1x19x64xbf16, #tpu.memory_space<vmem>>, vector<1x1x16x64xbf16>
    %43 = vector.shape_cast %42 : vector<1x1x16x64xbf16> to vector<16x64xbf16>
    %c7 = arith.constant 7 : index
    %c0_54 = arith.constant 0 : index
    %c0_55 = arith.constant 0 : index
    %44 = vector.load %arg17[%c7, %c0_54, %c0_55] : memref<49x64x64xbf16, #tpu.memory_space<vmem>>, vector<1x64x64xbf16>
    %45 = vector.shape_cast %44 : vector<1x64x64xbf16> to vector<64x64xbf16>
    %cst_56 = arith.constant dense<0.000000e+00> : vector<16x64xf32>
    %46 = tpu.matmul %43, %45, %cst_56 {dimension_numbers = #tpu.dot_dimension_numbers<[1], [0], [0], [1], [0, 0, 1, 1], [], []>} : vector<16x64xbf16>, vector<64x64xbf16>, vector<16x64xf32> -> vector<16x64xf32>
    %47 = arith.addf %41, %46 : vector<16x64xf32>
    %c0_57 = arith.constant 0 : index
    %c0_58 = arith.constant 0 : index
    %c0_59 = arith.constant 0 : index
    %c0_60 = arith.constant 0 : index
    %48 = vector.load %arg6[%c0_57, %c0_58, %c0_59, %c0_60] : memref<1x1x19x64xbf16, #tpu.memory_space<vmem>>, vector<1x1x16x64xbf16>
    %49 = vector.shape_cast %48 : vector<1x1x16x64xbf16> to vector<16x64xbf16>
    %c8 = arith.constant 8 : index
    %c0_61 = arith.constant 0 : index
    %c0_62 = arith.constant 0 : index
    %50 = vector.load %arg17[%c8, %c0_61, %c0_62] : memref<49x64x64xbf16, #tpu.memory_space<vmem>>, vector<1x64x64xbf16>
    %51 = vector.shape_cast %50 : vector<1x64x64xbf16> to vector<64x64xbf16>
    %cst_63 = arith.constant dense<0.000000e+00> : vector<16x64xf32>
    %52 = tpu.matmul %49, %51, %cst_63 {dimension_numbers = #tpu.dot_dimension_numbers<[1], [0], [0], [1], [0, 0, 1, 1], [], []>} : vector<16x64xbf16>, vector<64x64xbf16>, vector<16x64xf32> -> vector<16x64xf32>
    %53 = arith.addf %47, %52 : vector<16x64xf32>
    %c0_64 = arith.constant 0 : index
    %c0_65 = arith.constant 0 : index
    %c1_66 = arith.constant 1 : index
    %c0_67 = arith.constant 0 : index
    %54 = vector.load %arg5[%c0_64, %c0_65, %c1_66, %c0_67] : memref<1x1x19x64xbf16, #tpu.memory_space<vmem>>, vector<1x1x16x64xbf16>
    %55 = vector.shape_cast %54 : vector<1x1x16x64xbf16> to vector<16x64xbf16>
    %c9 = arith.constant 9 : index
    %c0_68 = arith.constant 0 : index
    %c0_69 = arith.constant 0 : index
    %56 = vector.load %arg17[%c9, %c0_68, %c0_69] : memref<49x64x64xbf16, #tpu.memory_space<vmem>>, vector<1x64x64xbf16>
    %57 = vector.shape_cast %56 : vector<1x64x64xbf16> to vector<64x64xbf16>
    %cst_70 = arith.constant dense<0.000000e+00> : vector<16x64xf32>
    %58 = tpu.matmul %55, %57, %cst_70 {dimension_numbers = #tpu.dot_dimension_numbers<[1], [0], [0], [1], [0, 0, 1, 1], [], []>} : vector<16x64xbf16>, vector<64x64xbf16>, vector<16x64xf32> -> vector<16x64xf32>
    %59 = arith.addf %53, %58 : vector<16x64xf32>
    %c0_71 = arith.constant 0 : index
    %c0_72 = arith.constant 0 : index
    %c1_73 = arith.constant 1 : index
    %c0_74 = arith.constant 0 : index
    %60 = vector.load %arg6[%c0_71, %c0_72, %c1_73, %c0_74] : memref<1x1x19x64xbf16, #tpu.memory_space<vmem>>, vector<1x1x16x64xbf16>
    %61 = vector.shape_cast %60 : vector<1x1x16x64xbf16> to vector<16x64xbf16>
    %c10 = arith.constant 10 : index
    %c0_75 = arith.constant 0 : index
    %c0_76 = arith.constant 0 : index
    %62 = vector.load %arg17[%c10, %c0_75, %c0_76] : memref<49x64x64xbf16, #tpu.memory_space<vmem>>, vector<1x64x64xbf16>
    %63 = vector.shape_cast %62 : vector<1x64x64xbf16> to vector<64x64xbf16>
    %cst_77 = arith.constant dense<0.000000e+00> : vector<16x64xf32>
    %64 = tpu.matmul %61, %63, %cst_77 {dimension_numbers = #tpu.dot_dimension_numbers<[1], [0], [0], [1], [0, 0, 1, 1], [], []>} : vector<16x64xbf16>, vector<64x64xbf16>, vector<16x64xf32> -> vector<16x64xf32>
    %65 = arith.addf %59, %64 : vector<16x64xf32>
    %c0_78 = arith.constant 0 : index
    %c0_79 = arith.constant 0 : index
    %c2_80 = arith.constant 2 : index
    %c0_81 = arith.constant 0 : index
    %66 = vector.load %arg5[%c0_78, %c0_79, %c2_80, %c0_81] : memref<1x1x19x64xbf16, #tpu.memory_space<vmem>>, vector<1x1x16x64xbf16>
    %67 = vector.shape_cast %66 : vector<1x1x16x64xbf16> to vector<16x64xbf16>
    %c11 = arith.constant 11 : index
    %c0_82 = arith.constant 0 : index
    %c0_83 = arith.constant 0 : index
    %68 = vector.load %arg17[%c11, %c0_82, %c0_83] : memref<49x64x64xbf16, #tpu.memory_space<vmem>>, vector<1x64x64xbf16>
    %69 = vector.shape_cast %68 : vector<1x64x64xbf16> to vector<64x64xbf16>
    %cst_84 = arith.constant dense<0.000000e+00> : vector<16x64xf32>
    %70 = tpu.matmul %67, %69, %cst_84 {dimension_numbers = #tpu.dot_dimension_numbers<[1], [0], [0], [1], [0, 0, 1, 1], [], []>} : vector<16x64xbf16>, vector<64x64xbf16>, vector<16x64xf32> -> vector<16x64xf32>
    %71 = arith.addf %65, %70 : vector<16x64xf32>
    %c0_85 = arith.constant 0 : index
    %c0_86 = arith.constant 0 : index
    %c2_87 = arith.constant 2 : index
    %c0_88 = arith.constant 0 : index
    %72 = vector.load %arg6[%c0_85, %c0_86, %c2_87, %c0_88] : memref<1x1x19x64xbf16, #tpu.memory_space<vmem>>, vector<1x1x16x64xbf16>
    %73 = vector.shape_cast %72 : vector<1x1x16x64xbf16> to vector<16x64xbf16>
    %c12 = arith.constant 12 : index
    %c0_89 = arith.constant 0 : index
    %c0_90 = arith.constant 0 : index
    %74 = vector.load %arg17[%c12, %c0_89, %c0_90] : memref<49x64x64xbf16, #tpu.memory_space<vmem>>, vector<1x64x64xbf16>
    %75 = vector.shape_cast %74 : vector<1x64x64xbf16> to vector<64x64xbf16>
    %cst_91 = arith.constant dense<0.000000e+00> : vector<16x64xf32>
    %76 = tpu.matmul %73, %75, %cst_91 {dimension_numbers = #tpu.dot_dimension_numbers<[1], [0], [0], [1], [0, 0, 1, 1], [], []>} : vector<16x64xbf16>, vector<64x64xbf16>, vector<16x64xf32> -> vector<16x64xf32>
    %77 = arith.addf %71, %76 : vector<16x64xf32>
    %c0_92 = arith.constant 0 : index
    %c0_93 = arith.constant 0 : index
    %c3_94 = arith.constant 3 : index
    %c0_95 = arith.constant 0 : index
    %78 = vector.load %arg5[%c0_92, %c0_93, %c3_94, %c0_95] : memref<1x1x19x64xbf16, #tpu.memory_space<vmem>>, vector<1x1x16x64xbf16>
    %79 = vector.shape_cast %78 : vector<1x1x16x64xbf16> to vector<16x64xbf16>
    %c13 = arith.constant 13 : index
    %c0_96 = arith.constant 0 : index
    %c0_97 = arith.constant 0 : index
    %80 = vector.load %arg17[%c13, %c0_96, %c0_97] : memref<49x64x64xbf16, #tpu.memory_space<vmem>>, vector<1x64x64xbf16>
    %81 = vector.shape_cast %80 : vector<1x64x64xbf16> to vector<64x64xbf16>
    %cst_98 = arith.constant dense<0.000000e+00> : vector<16x64xf32>
    %82 = tpu.matmul %79, %81, %cst_98 {dimension_numbers = #tpu.dot_dimension_numbers<[1], [0], [0], [1], [0, 0, 1, 1], [], []>} : vector<16x64xbf16>, vector<64x64xbf16>, vector<16x64xf32> -> vector<16x64xf32>
    %83 = arith.addf %77, %82 : vector<16x64xf32>
    %c0_99 = arith.constant 0 : index
    %c0_100 = arith.constant 0 : index
    %c0_101 = arith.constant 0 : index
    %c0_102 = arith.constant 0 : index
    %84 = vector.load %arg7[%c0_99, %c0_100, %c0_101, %c0_102] : memref<1x1x19x64xbf16, #tpu.memory_space<vmem>>, vector<1x1x16x64xbf16>
    %85 = vector.shape_cast %84 : vector<1x1x16x64xbf16> to vector<16x64xbf16>
    %c14 = arith.constant 14 : index
    %c0_103 = arith.constant 0 : index
    %c0_104 = arith.constant 0 : index
    %86 = vector.load %arg17[%c14, %c0_103, %c0_104] : memref<49x64x64xbf16, #tpu.memory_space<vmem>>, vector<1x64x64xbf16>
    %87 = vector.shape_cast %86 : vector<1x64x64xbf16> to vector<64x64xbf16>
    %cst_105 = arith.constant dense<0.000000e+00> : vector<16x64xf32>
    %88 = tpu.matmul %85, %87, %cst_105 {dimension_numbers = #tpu.dot_dimension_numbers<[1], [0], [0], [1], [0, 0, 1, 1], [], []>} : vector<16x64xbf16>, vector<64x64xbf16>, vector<16x64xf32> -> vector<16x64xf32>
    %89 = arith.addf %83, %88 : vector<16x64xf32>
    %c0_106 = arith.constant 0 : index
    %c0_107 = arith.constant 0 : index
    %c0_108 = arith.constant 0 : index
    %c0_109 = arith.constant 0 : index
    %90 = vector.load %arg8[%c0_106, %c0_107, %c0_108, %c0_109] : memref<1x1x19x64xbf16, #tpu.memory_space<vmem>>, vector<1x1x16x64xbf16>
    %91 = vector.shape_cast %90 : vector<1x1x16x64xbf16> to vector<16x64xbf16>
    %c15 = arith.constant 15 : index
    %c0_110 = arith.constant 0 : index
    %c0_111 = arith.constant 0 : index
    %92 = vector.load %arg17[%c15, %c0_110, %c0_111] : memref<49x64x64xbf16, #tpu.memory_space<vmem>>, vector<1x64x64xbf16>
    %93 = vector.shape_cast %92 : vector<1x64x64xbf16> to vector<64x64xbf16>
    %cst_112 = arith.constant dense<0.000000e+00> : vector<16x64xf32>
    %94 = tpu.matmul %91, %93, %cst_112 {dimension_numbers = #tpu.dot_dimension_numbers<[1], [0], [0], [1], [0, 0, 1, 1], [], []>} : vector<16x64xbf16>, vector<64x64xbf16>, vector<16x64xf32> -> vector<16x64xf32>
    %95 = arith.addf %89, %94 : vector<16x64xf32>
    %c0_113 = arith.constant 0 : index
    %c0_114 = arith.constant 0 : index
    %c1_115 = arith.constant 1 : index
    %c0_116 = arith.constant 0 : index
    %96 = vector.load %arg7[%c0_113, %c0_114, %c1_115, %c0_116] : memref<1x1x19x64xbf16, #tpu.memory_space<vmem>>, vector<1x1x16x64xbf16>
    %97 = vector.shape_cast %96 : vector<1x1x16x64xbf16> to vector<16x64xbf16>
    %c16 = arith.constant 16 : index
    %c0_117 = arith.constant 0 : index
    %c0_118 = arith.constant 0 : index
    %98 = vector.load %arg17[%c16, %c0_117, %c0_118] : memref<49x64x64xbf16, #tpu.memory_space<vmem>>, vector<1x64x64xbf16>
    %99 = vector.shape_cast %98 : vector<1x64x64xbf16> to vector<64x64xbf16>
    %cst_119 = arith.constant dense<0.000000e+00> : vector<16x64xf32>
    %100 = tpu.matmul %97, %99, %cst_119 {dimension_numbers = #tpu.dot_dimension_numbers<[1], [0], [0], [1], [0, 0, 1, 1], [], []>} : vector<16x64xbf16>, vector<64x64xbf16>, vector<16x64xf32> -> vector<16x64xf32>
    %101 = arith.addf %95, %100 : vector<16x64xf32>
    %c0_120 = arith.constant 0 : index
    %c0_121 = arith.constant 0 : index
    %c1_122 = arith.constant 1 : index
    %c0_123 = arith.constant 0 : index
    %102 = vector.load %arg8[%c0_120, %c0_121, %c1_122, %c0_123] : memref<1x1x19x64xbf16, #tpu.memory_space<vmem>>, vector<1x1x16x64xbf16>
    %103 = vector.shape_cast %102 : vector<1x1x16x64xbf16> to vector<16x64xbf16>
    %c17 = arith.constant 17 : index
    %c0_124 = arith.constant 0 : index
    %c0_125 = arith.constant 0 : index
    %104 = vector.load %arg17[%c17, %c0_124, %c0_125] : memref<49x64x64xbf16, #tpu.memory_space<vmem>>, vector<1x64x64xbf16>
    %105 = vector.shape_cast %104 : vector<1x64x64xbf16> to vector<64x64xbf16>
    %cst_126 = arith.constant dense<0.000000e+00> : vector<16x64xf32>
    %106 = tpu.matmul %103, %105, %cst_126 {dimension_numbers = #tpu.dot_dimension_numbers<[1], [0], [0], [1], [0, 0, 1, 1], [], []>} : vector<16x64xbf16>, vector<64x64xbf16>, vector<16x64xf32> -> vector<16x64xf32>
    %107 = arith.addf %101, %106 : vector<16x64xf32>
    %c0_127 = arith.constant 0 : index
    %c0_128 = arith.constant 0 : index
    %c2_129 = arith.constant 2 : index
    %c0_130 = arith.constant 0 : index
    %108 = vector.load %arg7[%c0_127, %c0_128, %c2_129, %c0_130] : memref<1x1x19x64xbf16, #tpu.memory_space<vmem>>, vector<1x1x16x64xbf16>
    %109 = vector.shape_cast %108 : vector<1x1x16x64xbf16> to vector<16x64xbf16>
    %c18 = arith.constant 18 : index
    %c0_131 = arith.constant 0 : index
    %c0_132 = arith.constant 0 : index
    %110 = vector.load %arg17[%c18, %c0_131, %c0_132] : memref<49x64x64xbf16, #tpu.memory_space<vmem>>, vector<1x64x64xbf16>
    %111 = vector.shape_cast %110 : vector<1x64x64xbf16> to vector<64x64xbf16>
    %cst_133 = arith.constant dense<0.000000e+00> : vector<16x64xf32>
    %112 = tpu.matmul %109, %111, %cst_133 {dimension_numbers = #tpu.dot_dimension_numbers<[1], [0], [0], [1], [0, 0, 1, 1], [], []>} : vector<16x64xbf16>, vector<64x64xbf16>, vector<16x64xf32> -> vector<16x64xf32>
    %113 = arith.addf %107, %112 : vector<16x64xf32>
    %c0_134 = arith.constant 0 : index
    %c0_135 = arith.constant 0 : index
    %c2_136 = arith.constant 2 : index
    %c0_137 = arith.constant 0 : index
    %114 = vector.load %arg8[%c0_134, %c0_135, %c2_136, %c0_137] : memref<1x1x19x64xbf16, #tpu.memory_space<vmem>>, vector<1x1x16x64xbf16>
    %115 = vector.shape_cast %114 : vector<1x1x16x64xbf16> to vector<16x64xbf16>
    %c19 = arith.constant 19 : index
    %c0_138 = arith.constant 0 : index
    %c0_139 = arith.constant 0 : index
    %116 = vector.load %arg17[%c19, %c0_138, %c0_139] : memref<49x64x64xbf16, #tpu.memory_space<vmem>>, vector<1x64x64xbf16>
    %117 = vector.shape_cast %116 : vector<1x64x64xbf16> to vector<64x64xbf16>
    %cst_140 = arith.constant dense<0.000000e+00> : vector<16x64xf32>
    %118 = tpu.matmul %115, %117, %cst_140 {dimension_numbers = #tpu.dot_dimension_numbers<[1], [0], [0], [1], [0, 0, 1, 1], [], []>} : vector<16x64xbf16>, vector<64x64xbf16>, vector<16x64xf32> -> vector<16x64xf32>
    %119 = arith.addf %113, %118 : vector<16x64xf32>
    %c0_141 = arith.constant 0 : index
    %c0_142 = arith.constant 0 : index
    %c3_143 = arith.constant 3 : index
    %c0_144 = arith.constant 0 : index
    %120 = vector.load %arg7[%c0_141, %c0_142, %c3_143, %c0_144] : memref<1x1x19x64xbf16, #tpu.memory_space<vmem>>, vector<1x1x16x64xbf16>
    %121 = vector.shape_cast %120 : vector<1x1x16x64xbf16> to vector<16x64xbf16>
    %c20 = arith.constant 20 : index
    %c0_145 = arith.constant 0 : index
    %c0_146 = arith.constant 0 : index
    %122 = vector.load %arg17[%c20, %c0_145, %c0_146] : memref<49x64x64xbf16, #tpu.memory_space<vmem>>, vector<1x64x64xbf16>
    %123 = vector.shape_cast %122 : vector<1x64x64xbf16> to vector<64x64xbf16>
    %cst_147 = arith.constant dense<0.000000e+00> : vector<16x64xf32>
    %124 = tpu.matmul %121, %123, %cst_147 {dimension_numbers = #tpu.dot_dimension_numbers<[1], [0], [0], [1], [0, 0, 1, 1], [], []>} : vector<16x64xbf16>, vector<64x64xbf16>, vector<16x64xf32> -> vector<16x64xf32>
    %125 = arith.addf %119, %124 : vector<16x64xf32>
    %c0_148 = arith.constant 0 : index
    %c0_149 = arith.constant 0 : index
    %c0_150 = arith.constant 0 : index
    %c0_151 = arith.constant 0 : index
    %126 = vector.load %arg9[%c0_148, %c0_149, %c0_150, %c0_151] : memref<1x1x19x64xbf16, #tpu.memory_space<vmem>>, vector<1x1x16x64xbf16>
    %127 = vector.shape_cast %126 : vector<1x1x16x64xbf16> to vector<16x64xbf16>
    %c21 = arith.constant 21 : index
    %c0_152 = arith.constant 0 : index
    %c0_153 = arith.constant 0 : index
    %128 = vector.load %arg17[%c21, %c0_152, %c0_153] : memref<49x64x64xbf16, #tpu.memory_space<vmem>>, vector<1x64x64xbf16>
    %129 = vector.shape_cast %128 : vector<1x64x64xbf16> to vector<64x64xbf16>
    %cst_154 = arith.constant dense<0.000000e+00> : vector<16x64xf32>
    %130 = tpu.matmul %127, %129, %cst_154 {dimension_numbers = #tpu.dot_dimension_numbers<[1], [0], [0], [1], [0, 0, 1, 1], [], []>} : vector<16x64xbf16>, vector<64x64xbf16>, vector<16x64xf32> -> vector<16x64xf32>
    %131 = arith.addf %125, %130 : vector<16x64xf32>
    %c0_155 = arith.constant 0 : index
    %c0_156 = arith.constant 0 : index
    %c0_157 = arith.constant 0 : index
    %c0_158 = arith.constant 0 : index
    %132 = vector.load %arg10[%c0_155, %c0_156, %c0_157, %c0_158] : memref<1x1x19x64xbf16, #tpu.memory_space<vmem>>, vector<1x1x16x64xbf16>
    %133 = vector.shape_cast %132 : vector<1x1x16x64xbf16> to vector<16x64xbf16>
    %c22 = arith.constant 22 : index
    %c0_159 = arith.constant 0 : index
    %c0_160 = arith.constant 0 : index
    %134 = vector.load %arg17[%c22, %c0_159, %c0_160] : memref<49x64x64xbf16, #tpu.memory_space<vmem>>, vector<1x64x64xbf16>
    %135 = vector.shape_cast %134 : vector<1x64x64xbf16> to vector<64x64xbf16>
    %cst_161 = arith.constant dense<0.000000e+00> : vector<16x64xf32>
    %136 = tpu.matmul %133, %135, %cst_161 {dimension_numbers = #tpu.dot_dimension_numbers<[1], [0], [0], [1], [0, 0, 1, 1], [], []>} : vector<16x64xbf16>, vector<64x64xbf16>, vector<16x64xf32> -> vector<16x64xf32>
    %137 = arith.addf %131, %136 : vector<16x64xf32>
    %c0_162 = arith.constant 0 : index
    %c0_163 = arith.constant 0 : index
    %c1_164 = arith.constant 1 : index
    %c0_165 = arith.constant 0 : index
    %138 = vector.load %arg9[%c0_162, %c0_163, %c1_164, %c0_165] : memref<1x1x19x64xbf16, #tpu.memory_space<vmem>>, vector<1x1x16x64xbf16>
    %139 = vector.shape_cast %138 : vector<1x1x16x64xbf16> to vector<16x64xbf16>
    %c23 = arith.constant 23 : index
    %c0_166 = arith.constant 0 : index
    %c0_167 = arith.constant 0 : index
    %140 = vector.load %arg17[%c23, %c0_166, %c0_167] : memref<49x64x64xbf16, #tpu.memory_space<vmem>>, vector<1x64x64xbf16>
    %141 = vector.shape_cast %140 : vector<1x64x64xbf16> to vector<64x64xbf16>
    %cst_168 = arith.constant dense<0.000000e+00> : vector<16x64xf32>
    %142 = tpu.matmul %139, %141, %cst_168 {dimension_numbers = #tpu.dot_dimension_numbers<[1], [0], [0], [1], [0, 0, 1, 1], [], []>} : vector<16x64xbf16>, vector<64x64xbf16>, vector<16x64xf32> -> vector<16x64xf32>
    %143 = arith.addf %137, %142 : vector<16x64xf32>
    %c0_169 = arith.constant 0 : index
    %c0_170 = arith.constant 0 : index
    %c1_171 = arith.constant 1 : index
    %c0_172 = arith.constant 0 : index
    %144 = vector.load %arg10[%c0_169, %c0_170, %c1_171, %c0_172] : memref<1x1x19x64xbf16, #tpu.memory_space<vmem>>, vector<1x1x16x64xbf16>
    %145 = vector.shape_cast %144 : vector<1x1x16x64xbf16> to vector<16x64xbf16>
    %c24 = arith.constant 24 : index
    %c0_173 = arith.constant 0 : index
    %c0_174 = arith.constant 0 : index
    %146 = vector.load %arg17[%c24, %c0_173, %c0_174] : memref<49x64x64xbf16, #tpu.memory_space<vmem>>, vector<1x64x64xbf16>
    %147 = vector.shape_cast %146 : vector<1x64x64xbf16> to vector<64x64xbf16>
    %cst_175 = arith.constant dense<0.000000e+00> : vector<16x64xf32>
    %148 = tpu.matmul %145, %147, %cst_175 {dimension_numbers = #tpu.dot_dimension_numbers<[1], [0], [0], [1], [0, 0, 1, 1], [], []>} : vector<16x64xbf16>, vector<64x64xbf16>, vector<16x64xf32> -> vector<16x64xf32>
    %149 = arith.addf %143, %148 : vector<16x64xf32>
    %c0_176 = arith.constant 0 : index
    %c0_177 = arith.constant 0 : index
    %c2_178 = arith.constant 2 : index
    %c0_179 = arith.constant 0 : index
    %150 = vector.load %arg9[%c0_176, %c0_177, %c2_178, %c0_179] : memref<1x1x19x64xbf16, #tpu.memory_space<vmem>>, vector<1x1x16x64xbf16>
    %151 = vector.shape_cast %150 : vector<1x1x16x64xbf16> to vector<16x64xbf16>
    %c25 = arith.constant 25 : index
    %c0_180 = arith.constant 0 : index
    %c0_181 = arith.constant 0 : index
    %152 = vector.load %arg17[%c25, %c0_180, %c0_181] : memref<49x64x64xbf16, #tpu.memory_space<vmem>>, vector<1x64x64xbf16>
    %153 = vector.shape_cast %152 : vector<1x64x64xbf16> to vector<64x64xbf16>
    %cst_182 = arith.constant dense<0.000000e+00> : vector<16x64xf32>
    %154 = tpu.matmul %151, %153, %cst_182 {dimension_numbers = #tpu.dot_dimension_numbers<[1], [0], [0], [1], [0, 0, 1, 1], [], []>} : vector<16x64xbf16>, vector<64x64xbf16>, vector<16x64xf32> -> vector<16x64xf32>
    %155 = arith.addf %149, %154 : vector<16x64xf32>
    %c0_183 = arith.constant 0 : index
    %c0_184 = arith.constant 0 : index
    %c2_185 = arith.constant 2 : index
    %c0_186 = arith.constant 0 : index
    %156 = vector.load %arg10[%c0_183, %c0_184, %c2_185, %c0_186] : memref<1x1x19x64xbf16, #tpu.memory_space<vmem>>, vector<1x1x16x64xbf16>
    %157 = vector.shape_cast %156 : vector<1x1x16x64xbf16> to vector<16x64xbf16>
    %c26 = arith.constant 26 : index
    %c0_187 = arith.constant 0 : index
    %c0_188 = arith.constant 0 : index
    %158 = vector.load %arg17[%c26, %c0_187, %c0_188] : memref<49x64x64xbf16, #tpu.memory_space<vmem>>, vector<1x64x64xbf16>
    %159 = vector.shape_cast %158 : vector<1x64x64xbf16> to vector<64x64xbf16>
    %cst_189 = arith.constant dense<0.000000e+00> : vector<16x64xf32>
    %160 = tpu.matmul %157, %159, %cst_189 {dimension_numbers = #tpu.dot_dimension_numbers<[1], [0], [0], [1], [0, 0, 1, 1], [], []>} : vector<16x64xbf16>, vector<64x64xbf16>, vector<16x64xf32> -> vector<16x64xf32>
    %161 = arith.addf %155, %160 : vector<16x64xf32>
    %c0_190 = arith.constant 0 : index
    %c0_191 = arith.constant 0 : index
    %c3_192 = arith.constant 3 : index
    %c0_193 = arith.constant 0 : index
    %162 = vector.load %arg9[%c0_190, %c0_191, %c3_192, %c0_193] : memref<1x1x19x64xbf16, #tpu.memory_space<vmem>>, vector<1x1x16x64xbf16>
    %163 = vector.shape_cast %162 : vector<1x1x16x64xbf16> to vector<16x64xbf16>
    %c27 = arith.constant 27 : index
    %c0_194 = arith.constant 0 : index
    %c0_195 = arith.constant 0 : index
    %164 = vector.load %arg17[%c27, %c0_194, %c0_195] : memref<49x64x64xbf16, #tpu.memory_space<vmem>>, vector<1x64x64xbf16>
    %165 = vector.shape_cast %164 : vector<1x64x64xbf16> to vector<64x64xbf16>
    %cst_196 = arith.constant dense<0.000000e+00> : vector<16x64xf32>
    %166 = tpu.matmul %163, %165, %cst_196 {dimension_numbers = #tpu.dot_dimension_numbers<[1], [0], [0], [1], [0, 0, 1, 1], [], []>} : vector<16x64xbf16>, vector<64x64xbf16>, vector<16x64xf32> -> vector<16x64xf32>
    %167 = arith.addf %161, %166 : vector<16x64xf32>
    %c0_197 = arith.constant 0 : index
    %c0_198 = arith.constant 0 : index
    %c0_199 = arith.constant 0 : index
    %c0_200 = arith.constant 0 : index
    %168 = vector.load %arg11[%c0_197, %c0_198, %c0_199, %c0_200] : memref<1x1x19x64xbf16, #tpu.memory_space<vmem>>, vector<1x1x16x64xbf16>
    %169 = vector.shape_cast %168 : vector<1x1x16x64xbf16> to vector<16x64xbf16>
    %c28 = arith.constant 28 : index
    %c0_201 = arith.constant 0 : index
    %c0_202 = arith.constant 0 : index
    %170 = vector.load %arg17[%c28, %c0_201, %c0_202] : memref<49x64x64xbf16, #tpu.memory_space<vmem>>, vector<1x64x64xbf16>
    %171 = vector.shape_cast %170 : vector<1x64x64xbf16> to vector<64x64xbf16>
    %cst_203 = arith.constant dense<0.000000e+00> : vector<16x64xf32>
    %172 = tpu.matmul %169, %171, %cst_203 {dimension_numbers = #tpu.dot_dimension_numbers<[1], [0], [0], [1], [0, 0, 1, 1], [], []>} : vector<16x64xbf16>, vector<64x64xbf16>, vector<16x64xf32> -> vector<16x64xf32>
    %173 = arith.addf %167, %172 : vector<16x64xf32>
    %c0_204 = arith.constant 0 : index
    %c0_205 = arith.constant 0 : index
    %c0_206 = arith.constant 0 : index
    %c0_207 = arith.constant 0 : index
    %174 = vector.load %arg12[%c0_204, %c0_205, %c0_206, %c0_207] : memref<1x1x19x64xbf16, #tpu.memory_space<vmem>>, vector<1x1x16x64xbf16>
    %175 = vector.shape_cast %174 : vector<1x1x16x64xbf16> to vector<16x64xbf16>
    %c29 = arith.constant 29 : index
    %c0_208 = arith.constant 0 : index
    %c0_209 = arith.constant 0 : index
    %176 = vector.load %arg17[%c29, %c0_208, %c0_209] : memref<49x64x64xbf16, #tpu.memory_space<vmem>>, vector<1x64x64xbf16>
    %177 = vector.shape_cast %176 : vector<1x64x64xbf16> to vector<64x64xbf16>
    %cst_210 = arith.constant dense<0.000000e+00> : vector<16x64xf32>
    %178 = tpu.matmul %175, %177, %cst_210 {dimension_numbers = #tpu.dot_dimension_numbers<[1], [0], [0], [1], [0, 0, 1, 1], [], []>} : vector<16x64xbf16>, vector<64x64xbf16>, vector<16x64xf32> -> vector<16x64xf32>
    %179 = arith.addf %173, %178 : vector<16x64xf32>
    %c0_211 = arith.constant 0 : index
    %c0_212 = arith.constant 0 : index
    %c1_213 = arith.constant 1 : index
    %c0_214 = arith.constant 0 : index
    %180 = vector.load %arg11[%c0_211, %c0_212, %c1_213, %c0_214] : memref<1x1x19x64xbf16, #tpu.memory_space<vmem>>, vector<1x1x16x64xbf16>
    %181 = vector.shape_cast %180 : vector<1x1x16x64xbf16> to vector<16x64xbf16>
    %c30 = arith.constant 30 : index
    %c0_215 = arith.constant 0 : index
    %c0_216 = arith.constant 0 : index
    %182 = vector.load %arg17[%c30, %c0_215, %c0_216] : memref<49x64x64xbf16, #tpu.memory_space<vmem>>, vector<1x64x64xbf16>
    %183 = vector.shape_cast %182 : vector<1x64x64xbf16> to vector<64x64xbf16>
    %cst_217 = arith.constant dense<0.000000e+00> : vector<16x64xf32>
    %184 = tpu.matmul %181, %183, %cst_217 {dimension_numbers = #tpu.dot_dimension_numbers<[1], [0], [0], [1], [0, 0, 1, 1], [], []>} : vector<16x64xbf16>, vector<64x64xbf16>, vector<16x64xf32> -> vector<16x64xf32>
    %185 = arith.addf %179, %184 : vector<16x64xf32>
    %c0_218 = arith.constant 0 : index
    %c0_219 = arith.constant 0 : index
    %c1_220 = arith.constant 1 : index
    %c0_221 = arith.constant 0 : index
    %186 = vector.load %arg12[%c0_218, %c0_219, %c1_220, %c0_221] : memref<1x1x19x64xbf16, #tpu.memory_space<vmem>>, vector<1x1x16x64xbf16>
    %187 = vector.shape_cast %186 : vector<1x1x16x64xbf16> to vector<16x64xbf16>
    %c31 = arith.constant 31 : index
    %c0_222 = arith.constant 0 : index
    %c0_223 = arith.constant 0 : index
    %188 = vector.load %arg17[%c31, %c0_222, %c0_223] : memref<49x64x64xbf16, #tpu.memory_space<vmem>>, vector<1x64x64xbf16>
    %189 = vector.shape_cast %188 : vector<1x64x64xbf16> to vector<64x64xbf16>
    %cst_224 = arith.constant dense<0.000000e+00> : vector<16x64xf32>
    %190 = tpu.matmul %187, %189, %cst_224 {dimension_numbers = #tpu.dot_dimension_numbers<[1], [0], [0], [1], [0, 0, 1, 1], [], []>} : vector<16x64xbf16>, vector<64x64xbf16>, vector<16x64xf32> -> vector<16x64xf32>
    %191 = arith.addf %185, %190 : vector<16x64xf32>
    %c0_225 = arith.constant 0 : index
    %c0_226 = arith.constant 0 : index
    %c2_227 = arith.constant 2 : index
    %c0_228 = arith.constant 0 : index
    %192 = vector.load %arg11[%c0_225, %c0_226, %c2_227, %c0_228] : memref<1x1x19x64xbf16, #tpu.memory_space<vmem>>, vector<1x1x16x64xbf16>
    %193 = vector.shape_cast %192 : vector<1x1x16x64xbf16> to vector<16x64xbf16>
    %c32 = arith.constant 32 : index
    %c0_229 = arith.constant 0 : index
    %c0_230 = arith.constant 0 : index
    %194 = vector.load %arg17[%c32, %c0_229, %c0_230] : memref<49x64x64xbf16, #tpu.memory_space<vmem>>, vector<1x64x64xbf16>
    %195 = vector.shape_cast %194 : vector<1x64x64xbf16> to vector<64x64xbf16>
    %cst_231 = arith.constant dense<0.000000e+00> : vector<16x64xf32>
    %196 = tpu.matmul %193, %195, %cst_231 {dimension_numbers = #tpu.dot_dimension_numbers<[1], [0], [0], [1], [0, 0, 1, 1], [], []>} : vector<16x64xbf16>, vector<64x64xbf16>, vector<16x64xf32> -> vector<16x64xf32>
    %197 = arith.addf %191, %196 : vector<16x64xf32>
    %c0_232 = arith.constant 0 : index
    %c0_233 = arith.constant 0 : index
    %c2_234 = arith.constant 2 : index
    %c0_235 = arith.constant 0 : index
    %198 = vector.load %arg12[%c0_232, %c0_233, %c2_234, %c0_235] : memref<1x1x19x64xbf16, #tpu.memory_space<vmem>>, vector<1x1x16x64xbf16>
    %199 = vector.shape_cast %198 : vector<1x1x16x64xbf16> to vector<16x64xbf16>
    %c33 = arith.constant 33 : index
    %c0_236 = arith.constant 0 : index
    %c0_237 = arith.constant 0 : index
    %200 = vector.load %arg17[%c33, %c0_236, %c0_237] : memref<49x64x64xbf16, #tpu.memory_space<vmem>>, vector<1x64x64xbf16>
    %201 = vector.shape_cast %200 : vector<1x64x64xbf16> to vector<64x64xbf16>
    %cst_238 = arith.constant dense<0.000000e+00> : vector<16x64xf32>
    %202 = tpu.matmul %199, %201, %cst_238 {dimension_numbers = #tpu.dot_dimension_numbers<[1], [0], [0], [1], [0, 0, 1, 1], [], []>} : vector<16x64xbf16>, vector<64x64xbf16>, vector<16x64xf32> -> vector<16x64xf32>
    %203 = arith.addf %197, %202 : vector<16x64xf32>
    %c0_239 = arith.constant 0 : index
    %c0_240 = arith.constant 0 : index
    %c3_241 = arith.constant 3 : index
    %c0_242 = arith.constant 0 : index
    %204 = vector.load %arg11[%c0_239, %c0_240, %c3_241, %c0_242] : memref<1x1x19x64xbf16, #tpu.memory_space<vmem>>, vector<1x1x16x64xbf16>
    %205 = vector.shape_cast %204 : vector<1x1x16x64xbf16> to vector<16x64xbf16>
    %c34 = arith.constant 34 : index
    %c0_243 = arith.constant 0 : index
    %c0_244 = arith.constant 0 : index
    %206 = vector.load %arg17[%c34, %c0_243, %c0_244] : memref<49x64x64xbf16, #tpu.memory_space<vmem>>, vector<1x64x64xbf16>
    %207 = vector.shape_cast %206 : vector<1x64x64xbf16> to vector<64x64xbf16>
    %cst_245 = arith.constant dense<0.000000e+00> : vector<16x64xf32>
    %208 = tpu.matmul %205, %207, %cst_245 {dimension_numbers = #tpu.dot_dimension_numbers<[1], [0], [0], [1], [0, 0, 1, 1], [], []>} : vector<16x64xbf16>, vector<64x64xbf16>, vector<16x64xf32> -> vector<16x64xf32>
    %209 = arith.addf %203, %208 : vector<16x64xf32>
    %c0_246 = arith.constant 0 : index
    %c0_247 = arith.constant 0 : index
    %c0_248 = arith.constant 0 : index
    %c0_249 = arith.constant 0 : index
    %210 = vector.load %arg13[%c0_246, %c0_247, %c0_248, %c0_249] : memref<1x1x19x64xbf16, #tpu.memory_space<vmem>>, vector<1x1x16x64xbf16>
    %211 = vector.shape_cast %210 : vector<1x1x16x64xbf16> to vector<16x64xbf16>
    %c35 = arith.constant 35 : index
    %c0_250 = arith.constant 0 : index
    %c0_251 = arith.constant 0 : index
    %212 = vector.load %arg17[%c35, %c0_250, %c0_251] : memref<49x64x64xbf16, #tpu.memory_space<vmem>>, vector<1x64x64xbf16>
    %213 = vector.shape_cast %212 : vector<1x64x64xbf16> to vector<64x64xbf16>
    %cst_252 = arith.constant dense<0.000000e+00> : vector<16x64xf32>
    %214 = tpu.matmul %211, %213, %cst_252 {dimension_numbers = #tpu.dot_dimension_numbers<[1], [0], [0], [1], [0, 0, 1, 1], [], []>} : vector<16x64xbf16>, vector<64x64xbf16>, vector<16x64xf32> -> vector<16x64xf32>
    %215 = arith.addf %209, %214 : vector<16x64xf32>
    %c0_253 = arith.constant 0 : index
    %c0_254 = arith.constant 0 : index
    %c0_255 = arith.constant 0 : index
    %c0_256 = arith.constant 0 : index
    %216 = vector.load %arg14[%c0_253, %c0_254, %c0_255, %c0_256] : memref<1x1x19x64xbf16, #tpu.memory_space<vmem>>, vector<1x1x16x64xbf16>
    %217 = vector.shape_cast %216 : vector<1x1x16x64xbf16> to vector<16x64xbf16>
    %c36 = arith.constant 36 : index
    %c0_257 = arith.constant 0 : index
    %c0_258 = arith.constant 0 : index
    %218 = vector.load %arg17[%c36, %c0_257, %c0_258] : memref<49x64x64xbf16, #tpu.memory_space<vmem>>, vector<1x64x64xbf16>
    %219 = vector.shape_cast %218 : vector<1x64x64xbf16> to vector<64x64xbf16>
    %cst_259 = arith.constant dense<0.000000e+00> : vector<16x64xf32>
    %220 = tpu.matmul %217, %219, %cst_259 {dimension_numbers = #tpu.dot_dimension_numbers<[1], [0], [0], [1], [0, 0, 1, 1], [], []>} : vector<16x64xbf16>, vector<64x64xbf16>, vector<16x64xf32> -> vector<16x64xf32>
    %221 = arith.addf %215, %220 : vector<16x64xf32>
    %c0_260 = arith.constant 0 : index
    %c0_261 = arith.constant 0 : index
    %c1_262 = arith.constant 1 : index
    %c0_263 = arith.constant 0 : index
    %222 = vector.load %arg13[%c0_260, %c0_261, %c1_262, %c0_263] : memref<1x1x19x64xbf16, #tpu.memory_space<vmem>>, vector<1x1x16x64xbf16>
    %223 = vector.shape_cast %222 : vector<1x1x16x64xbf16> to vector<16x64xbf16>
    %c37 = arith.constant 37 : index
    %c0_264 = arith.constant 0 : index
    %c0_265 = arith.constant 0 : index
    %224 = vector.load %arg17[%c37, %c0_264, %c0_265] : memref<49x64x64xbf16, #tpu.memory_space<vmem>>, vector<1x64x64xbf16>
    %225 = vector.shape_cast %224 : vector<1x64x64xbf16> to vector<64x64xbf16>
    %cst_266 = arith.constant dense<0.000000e+00> : vector<16x64xf32>
    %226 = tpu.matmul %223, %225, %cst_266 {dimension_numbers = #tpu.dot_dimension_numbers<[1], [0], [0], [1], [0, 0, 1, 1], [], []>} : vector<16x64xbf16>, vector<64x64xbf16>, vector<16x64xf32> -> vector<16x64xf32>
    %227 = arith.addf %221, %226 : vector<16x64xf32>
    %c0_267 = arith.constant 0 : index
    %c0_268 = arith.constant 0 : index
    %c1_269 = arith.constant 1 : index
    %c0_270 = arith.constant 0 : index
    %228 = vector.load %arg14[%c0_267, %c0_268, %c1_269, %c0_270] : memref<1x1x19x64xbf16, #tpu.memory_space<vmem>>, vector<1x1x16x64xbf16>
    %229 = vector.shape_cast %228 : vector<1x1x16x64xbf16> to vector<16x64xbf16>
    %c38 = arith.constant 38 : index
    %c0_271 = arith.constant 0 : index
    %c0_272 = arith.constant 0 : index
    %230 = vector.load %arg17[%c38, %c0_271, %c0_272] : memref<49x64x64xbf16, #tpu.memory_space<vmem>>, vector<1x64x64xbf16>
    %231 = vector.shape_cast %230 : vector<1x64x64xbf16> to vector<64x64xbf16>
    %cst_273 = arith.constant dense<0.000000e+00> : vector<16x64xf32>
    %232 = tpu.matmul %229, %231, %cst_273 {dimension_numbers = #tpu.dot_dimension_numbers<[1], [0], [0], [1], [0, 0, 1, 1], [], []>} : vector<16x64xbf16>, vector<64x64xbf16>, vector<16x64xf32> -> vector<16x64xf32>
    %233 = arith.addf %227, %232 : vector<16x64xf32>
    %c0_274 = arith.constant 0 : index
    %c0_275 = arith.constant 0 : index
    %c2_276 = arith.constant 2 : index
    %c0_277 = arith.constant 0 : index
    %234 = vector.load %arg13[%c0_274, %c0_275, %c2_276, %c0_277] : memref<1x1x19x64xbf16, #tpu.memory_space<vmem>>, vector<1x1x16x64xbf16>
    %235 = vector.shape_cast %234 : vector<1x1x16x64xbf16> to vector<16x64xbf16>
    %c39 = arith.constant 39 : index
    %c0_278 = arith.constant 0 : index
    %c0_279 = arith.constant 0 : index
    %236 = vector.load %arg17[%c39, %c0_278, %c0_279] : memref<49x64x64xbf16, #tpu.memory_space<vmem>>, vector<1x64x64xbf16>
    %237 = vector.shape_cast %236 : vector<1x64x64xbf16> to vector<64x64xbf16>
    %cst_280 = arith.constant dense<0.000000e+00> : vector<16x64xf32>
    %238 = tpu.matmul %235, %237, %cst_280 {dimension_numbers = #tpu.dot_dimension_numbers<[1], [0], [0], [1], [0, 0, 1, 1], [], []>} : vector<16x64xbf16>, vector<64x64xbf16>, vector<16x64xf32> -> vector<16x64xf32>
    %239 = arith.addf %233, %238 : vector<16x64xf32>
    %c0_281 = arith.constant 0 : index
    %c0_282 = arith.constant 0 : index
    %c2_283 = arith.constant 2 : index
    %c0_284 = arith.constant 0 : index
    %240 = vector.load %arg14[%c0_281, %c0_282, %c2_283, %c0_284] : memref<1x1x19x64xbf16, #tpu.memory_space<vmem>>, vector<1x1x16x64xbf16>
    %241 = vector.shape_cast %240 : vector<1x1x16x64xbf16> to vector<16x64xbf16>
    %c40 = arith.constant 40 : index
    %c0_285 = arith.constant 0 : index
    %c0_286 = arith.constant 0 : index
    %242 = vector.load %arg17[%c40, %c0_285, %c0_286] : memref<49x64x64xbf16, #tpu.memory_space<vmem>>, vector<1x64x64xbf16>
    %243 = vector.shape_cast %242 : vector<1x64x64xbf16> to vector<64x64xbf16>
    %cst_287 = arith.constant dense<0.000000e+00> : vector<16x64xf32>
    %244 = tpu.matmul %241, %243, %cst_287 {dimension_numbers = #tpu.dot_dimension_numbers<[1], [0], [0], [1], [0, 0, 1, 1], [], []>} : vector<16x64xbf16>, vector<64x64xbf16>, vector<16x64xf32> -> vector<16x64xf32>
    %245 = arith.addf %239, %244 : vector<16x64xf32>
    %c0_288 = arith.constant 0 : index
    %c0_289 = arith.constant 0 : index
    %c3_290 = arith.constant 3 : index
    %c0_291 = arith.constant 0 : index
    %246 = vector.load %arg13[%c0_288, %c0_289, %c3_290, %c0_291] : memref<1x1x19x64xbf16, #tpu.memory_space<vmem>>, vector<1x1x16x64xbf16>
    %247 = vector.shape_cast %246 : vector<1x1x16x64xbf16> to vector<16x64xbf16>
    %c41 = arith.constant 41 : index
    %c0_292 = arith.constant 0 : index
    %c0_293 = arith.constant 0 : index
    %248 = vector.load %arg17[%c41, %c0_292, %c0_293] : memref<49x64x64xbf16, #tpu.memory_space<vmem>>, vector<1x64x64xbf16>
    %249 = vector.shape_cast %248 : vector<1x64x64xbf16> to vector<64x64xbf16>
    %cst_294 = arith.constant dense<0.000000e+00> : vector<16x64xf32>
    %250 = tpu.matmul %247, %249, %cst_294 {dimension_numbers = #tpu.dot_dimension_numbers<[1], [0], [0], [1], [0, 0, 1, 1], [], []>} : vector<16x64xbf16>, vector<64x64xbf16>, vector<16x64xf32> -> vector<16x64xf32>
    %251 = arith.addf %245, %250 : vector<16x64xf32>
    %c0_295 = arith.constant 0 : index
    %c0_296 = arith.constant 0 : index
    %c0_297 = arith.constant 0 : index
    %c0_298 = arith.constant 0 : index
    %252 = vector.load %arg15[%c0_295, %c0_296, %c0_297, %c0_298] : memref<1x1x19x64xbf16, #tpu.memory_space<vmem>>, vector<1x1x16x64xbf16>
    %253 = vector.shape_cast %252 : vector<1x1x16x64xbf16> to vector<16x64xbf16>
    %c42 = arith.constant 42 : index
    %c0_299 = arith.constant 0 : index
    %c0_300 = arith.constant 0 : index
    %254 = vector.load %arg17[%c42, %c0_299, %c0_300] : memref<49x64x64xbf16, #tpu.memory_space<vmem>>, vector<1x64x64xbf16>
    %255 = vector.shape_cast %254 : vector<1x64x64xbf16> to vector<64x64xbf16>
    %cst_301 = arith.constant dense<0.000000e+00> : vector<16x64xf32>
    %256 = tpu.matmul %253, %255, %cst_301 {dimension_numbers = #tpu.dot_dimension_numbers<[1], [0], [0], [1], [0, 0, 1, 1], [], []>} : vector<16x64xbf16>, vector<64x64xbf16>, vector<16x64xf32> -> vector<16x64xf32>
    %257 = arith.addf %251, %256 : vector<16x64xf32>
    %c0_302 = arith.constant 0 : index
    %c0_303 = arith.constant 0 : index
    %c0_304 = arith.constant 0 : index
    %c0_305 = arith.constant 0 : index
    %258 = vector.load %arg16[%c0_302, %c0_303, %c0_304, %c0_305] : memref<1x1x19x64xbf16, #tpu.memory_space<vmem>>, vector<1x1x16x64xbf16>
    %259 = vector.shape_cast %258 : vector<1x1x16x64xbf16> to vector<16x64xbf16>
    %c43 = arith.constant 43 : index
    %c0_306 = arith.constant 0 : index
    %c0_307 = arith.constant 0 : index
    %260 = vector.load %arg17[%c43, %c0_306, %c0_307] : memref<49x64x64xbf16, #tpu.memory_space<vmem>>, vector<1x64x64xbf16>
    %261 = vector.shape_cast %260 : vector<1x64x64xbf16> to vector<64x64xbf16>
    %cst_308 = arith.constant dense<0.000000e+00> : vector<16x64xf32>
    %262 = tpu.matmul %259, %261, %cst_308 {dimension_numbers = #tpu.dot_dimension_numbers<[1], [0], [0], [1], [0, 0, 1, 1], [], []>} : vector<16x64xbf16>, vector<64x64xbf16>, vector<16x64xf32> -> vector<16x64xf32>
    %263 = arith.addf %257, %262 : vector<16x64xf32>
    %c0_309 = arith.constant 0 : index
    %c0_310 = arith.constant 0 : index
    %c1_311 = arith.constant 1 : index
    %c0_312 = arith.constant 0 : index
    %264 = vector.load %arg15[%c0_309, %c0_310, %c1_311, %c0_312] : memref<1x1x19x64xbf16, #tpu.memory_space<vmem>>, vector<1x1x16x64xbf16>
    %265 = vector.shape_cast %264 : vector<1x1x16x64xbf16> to vector<16x64xbf16>
    %c44 = arith.constant 44 : index
    %c0_313 = arith.constant 0 : index
    %c0_314 = arith.constant 0 : index
    %266 = vector.load %arg17[%c44, %c0_313, %c0_314] : memref<49x64x64xbf16, #tpu.memory_space<vmem>>, vector<1x64x64xbf16>
    %267 = vector.shape_cast %266 : vector<1x64x64xbf16> to vector<64x64xbf16>
    %cst_315 = arith.constant dense<0.000000e+00> : vector<16x64xf32>
    %268 = tpu.matmul %265, %267, %cst_315 {dimension_numbers = #tpu.dot_dimension_numbers<[1], [0], [0], [1], [0, 0, 1, 1], [], []>} : vector<16x64xbf16>, vector<64x64xbf16>, vector<16x64xf32> -> vector<16x64xf32>
    %269 = arith.addf %263, %268 : vector<16x64xf32>
    %c0_316 = arith.constant 0 : index
    %c0_317 = arith.constant 0 : index
    %c1_318 = arith.constant 1 : index
    %c0_319 = arith.constant 0 : index
    %270 = vector.load %arg16[%c0_316, %c0_317, %c1_318, %c0_319] : memref<1x1x19x64xbf16, #tpu.memory_space<vmem>>, vector<1x1x16x64xbf16>
    %271 = vector.shape_cast %270 : vector<1x1x16x64xbf16> to vector<16x64xbf16>
    %c45 = arith.constant 45 : index
    %c0_320 = arith.constant 0 : index
    %c0_321 = arith.constant 0 : index
    %272 = vector.load %arg17[%c45, %c0_320, %c0_321] : memref<49x64x64xbf16, #tpu.memory_space<vmem>>, vector<1x64x64xbf16>
    %273 = vector.shape_cast %272 : vector<1x64x64xbf16> to vector<64x64xbf16>
    %cst_322 = arith.constant dense<0.000000e+00> : vector<16x64xf32>
    %274 = tpu.matmul %271, %273, %cst_322 {dimension_numbers = #tpu.dot_dimension_numbers<[1], [0], [0], [1], [0, 0, 1, 1], [], []>} : vector<16x64xbf16>, vector<64x64xbf16>, vector<16x64xf32> -> vector<16x64xf32>
    %275 = arith.addf %269, %274 : vector<16x64xf32>
    %c0_323 = arith.constant 0 : index
    %c0_324 = arith.constant 0 : index
    %c2_325 = arith.constant 2 : index
    %c0_326 = arith.constant 0 : index
    %276 = vector.load %arg15[%c0_323, %c0_324, %c2_325, %c0_326] : memref<1x1x19x64xbf16, #tpu.memory_space<vmem>>, vector<1x1x16x64xbf16>
    %277 = vector.shape_cast %276 : vector<1x1x16x64xbf16> to vector<16x64xbf16>
    %c46 = arith.constant 46 : index
    %c0_327 = arith.constant 0 : index
    %c0_328 = arith.constant 0 : index
    %278 = vector.load %arg17[%c46, %c0_327, %c0_328] : memref<49x64x64xbf16, #tpu.memory_space<vmem>>, vector<1x64x64xbf16>
    %279 = vector.shape_cast %278 : vector<1x64x64xbf16> to vector<64x64xbf16>
    %cst_329 = arith.constant dense<0.000000e+00> : vector<16x64xf32>
    %280 = tpu.matmul %277, %279, %cst_329 {dimension_numbers = #tpu.dot_dimension_numbers<[1], [0], [0], [1], [0, 0, 1, 1], [], []>} : vector<16x64xbf16>, vector<64x64xbf16>, vector<16x64xf32> -> vector<16x64xf32>
    %281 = arith.addf %275, %280 : vector<16x64xf32>
    %c0_330 = arith.constant 0 : index
    %c0_331 = arith.constant 0 : index
    %c2_332 = arith.constant 2 : index
    %c0_333 = arith.constant 0 : index
    %282 = vector.load %arg16[%c0_330, %c0_331, %c2_332, %c0_333] : memref<1x1x19x64xbf16, #tpu.memory_space<vmem>>, vector<1x1x16x64xbf16>
    %283 = vector.shape_cast %282 : vector<1x1x16x64xbf16> to vector<16x64xbf16>
    %c47 = arith.constant 47 : index
    %c0_334 = arith.constant 0 : index
    %c0_335 = arith.constant 0 : index
    %284 = vector.load %arg17[%c47, %c0_334, %c0_335] : memref<49x64x64xbf16, #tpu.memory_space<vmem>>, vector<1x64x64xbf16>
    %285 = vector.shape_cast %284 : vector<1x64x64xbf16> to vector<64x64xbf16>
    %cst_336 = arith.constant dense<0.000000e+00> : vector<16x64xf32>
    %286 = tpu.matmul %283, %285, %cst_336 {dimension_numbers = #tpu.dot_dimension_numbers<[1], [0], [0], [1], [0, 0, 1, 1], [], []>} : vector<16x64xbf16>, vector<64x64xbf16>, vector<16x64xf32> -> vector<16x64xf32>
    %287 = arith.addf %281, %286 : vector<16x64xf32>
    %c0_337 = arith.constant 0 : index
    %c0_338 = arith.constant 0 : index
    %c3_339 = arith.constant 3 : index
    %c0_340 = arith.constant 0 : index
    %288 = vector.load %arg15[%c0_337, %c0_338, %c3_339, %c0_340] : memref<1x1x19x64xbf16, #tpu.memory_space<vmem>>, vector<1x1x16x64xbf16>
    %289 = vector.shape_cast %288 : vector<1x1x16x64xbf16> to vector<16x64xbf16>
    %c48 = arith.constant 48 : index
    %c0_341 = arith.constant 0 : index
    %c0_342 = arith.constant 0 : index
    %290 = vector.load %arg17[%c48, %c0_341, %c0_342] : memref<49x64x64xbf16, #tpu.memory_space<vmem>>, vector<1x64x64xbf16>
    %291 = vector.shape_cast %290 : vector<1x64x64xbf16> to vector<64x64xbf16>
    %cst_343 = arith.constant dense<0.000000e+00> : vector<16x64xf32>
    %292 = tpu.matmul %289, %291, %cst_343 {dimension_numbers = #tpu.dot_dimension_numbers<[1], [0], [0], [1], [0, 0, 1, 1], [], []>} : vector<16x64xbf16>, vector<64x64xbf16>, vector<16x64xf32> -> vector<16x64xf32>
    %293 = arith.addf %287, %292 : vector<16x64xf32>
    %294 = vector.broadcast %0 : vector<1x64xf32> to vector<16x64xf32>
    %295 = arith.addf %293, %294 : vector<16x64xf32>
    %cst_344 = arith.constant 0.000000e+00 : f32
    %296 = vector.broadcast %cst_344 : f32 to vector<16x64xf32>
    %297 = arith.maximumf %295, %296 : vector<16x64xf32>
    %c0_345 = arith.constant 0 : index
    %c0_346 = arith.constant 0 : index
    %c0_347 = arith.constant 0 : index
    %c0_348 = arith.constant 0 : index
    %298 = vector.load %arg19[%c0_345, %c0_346, %c0_347, %c0_348] : memref<1x1x16x64xf32, #tpu.memory_space<vmem>>, vector<1x1x16x64xf32>
    %299 = vector.shape_cast %298 : vector<1x1x16x64xf32> to vector<16x64xf32>
    %300 = vector.shape_cast %297 : vector<16x64xf32> to vector<1x1x16x64xf32>
    tpu.vector_store %arg19[%c0_345, %c0_346, %c0_347, %c0_348], %300 {strides = array<i32>} : memref<1x1x16x64xf32, #tpu.memory_space<vmem>>, vector<1x1x16x64xf32>,
    return
  }
  func.func @transform_0(%arg0: i32, %arg1: i32, %arg2: i32) -> (i32, i32, i32, i32) {
    %c2_i32 = arith.constant 2 : i32
    %0 = arith.muli %c2_i32, %arg2 : i32
    %c0_i32 = arith.constant 0 : i32
    %1 = arith.addi %0, %c0_i32 : i32
    %c0_i32_0 = arith.constant 0 : i32
    %c0_i32_1 = arith.constant 0 : i32
    %c0_i32_2 = arith.constant 0 : i32
    return %arg0, %1, %c0_i32_0, %c0_i32_1 : i32, i32, i32, i32
  }
  func.func @transform_1(%arg0: i32, %arg1: i32, %arg2: i32) -> (i32, i32, i32, i32) {
    %c2_i32 = arith.constant 2 : i32
    %0 = arith.muli %c2_i32, %arg2 : i32
    %c0_i32 = arith.constant 0 : i32
    %1 = arith.addi %0, %c0_i32 : i32
    %c0_i32_0 = arith.constant 0 : i32
    %c0_i32_1 = arith.constant 0 : i32
    %c0_i32_2 = arith.constant 0 : i32
    return %arg0, %1, %c0_i32_0, %c0_i32_1 : i32, i32, i32, i32
  }
  func.func @transform_2(%arg0: i32, %arg1: i32, %arg2: i32) -> (i32, i32, i32, i32) {
    %c2_i32 = arith.constant 2 : i32
    %0 = arith.muli %c2_i32, %arg2 : i32
    %c1_i32 = arith.constant 1 : i32
    %1 = arith.addi %0, %c1_i32 : i32
    %c0_i32 = arith.constant 0 : i32
    %c0_i32_0 = arith.constant 0 : i32
    %c0_i32_1 = arith.constant 0 : i32
    return %arg0, %1, %c0_i32, %c0_i32_0 : i32, i32, i32, i32
  }
  func.func @transform_3(%arg0: i32, %arg1: i32, %arg2: i32) -> (i32, i32, i32, i32) {
    %c2_i32 = arith.constant 2 : i32
    %0 = arith.muli %c2_i32, %arg2 : i32
    %c1_i32 = arith.constant 1 : i32
    %1 = arith.addi %0, %c1_i32 : i32
    %c0_i32 = arith.constant 0 : i32
    %c0_i32_0 = arith.constant 0 : i32
    %c0_i32_1 = arith.constant 0 : i32
    return %arg0, %1, %c0_i32, %c0_i32_0 : i32, i32, i32, i32
  }
  func.func @transform_4(%arg0: i32, %arg1: i32, %arg2: i32) -> (i32, i32, i32, i32) {
    %c2_i32 = arith.constant 2 : i32
    %0 = arith.muli %c2_i32, %arg2 : i32
    %c2_i32_0 = arith.constant 2 : i32
    %1 = arith.addi %0, %c2_i32_0 : i32
    %c0_i32 = arith.constant 0 : i32
    %c0_i32_1 = arith.constant 0 : i32
    %c0_i32_2 = arith.constant 0 : i32
    return %arg0, %1, %c0_i32, %c0_i32_1 : i32, i32, i32, i32
  }
  func.func @transform_5(%arg0: i32, %arg1: i32, %arg2: i32) -> (i32, i32, i32, i32) {
    %c2_i32 = arith.constant 2 : i32
    %0 = arith.muli %c2_i32, %arg2 : i32
    %c2_i32_0 = arith.constant 2 : i32
    %1 = arith.addi %0, %c2_i32_0 : i32
    %c0_i32 = arith.constant 0 : i32
    %c0_i32_1 = arith.constant 0 : i32
    %c0_i32_2 = arith.constant 0 : i32
    return %arg0, %1, %c0_i32, %c0_i32_1 : i32, i32, i32, i32
  }
  func.func @transform_6(%arg0: i32, %arg1: i32, %arg2: i32) -> (i32, i32, i32, i32) {
    %c2_i32 = arith.constant 2 : i32
    %0 = arith.muli %c2_i32, %arg2 : i32
    %c3_i32 = arith.constant 3 : i32
    %1 = arith.addi %0, %c3_i32 : i32
    %c0_i32 = arith.constant 0 : i32
    %c0_i32_0 = arith.constant 0 : i32
    %c0_i32_1 = arith.constant 0 : i32
    return %arg0, %1, %c0_i32, %c0_i32_0 : i32, i32, i32, i32
  }
  func.func @transform_7(%arg0: i32, %arg1: i32, %arg2: i32) -> (i32, i32, i32, i32) {
    %c2_i32 = arith.constant 2 : i32
    %0 = arith.muli %c2_i32, %arg2 : i32
    %c3_i32 = arith.constant 3 : i32
    %1 = arith.addi %0, %c3_i32 : i32
    %c0_i32 = arith.constant 0 : i32
    %c0_i32_0 = arith.constant 0 : i32
    %c0_i32_1 = arith.constant 0 : i32
    return %arg0, %1, %c0_i32, %c0_i32_0 : i32, i32, i32, i32
  }
  func.func @transform_8(%arg0: i32, %arg1: i32, %arg2: i32) -> (i32, i32, i32, i32) {
    %c2_i32 = arith.constant 2 : i32
    %0 = arith.muli %c2_i32, %arg2 : i32
    %c4_i32 = arith.constant 4 : i32
    %1 = arith.addi %0, %c4_i32 : i32
    %c0_i32 = arith.constant 0 : i32
    %c0_i32_0 = arith.constant 0 : i32
    %c0_i32_1 = arith.constant 0 : i32
    return %arg0, %1, %c0_i32, %c0_i32_0 : i32, i32, i32, i32
  }
  func.func @transform_9(%arg0: i32, %arg1: i32, %arg2: i32) -> (i32, i32, i32, i32) {
    %c2_i32 = arith.constant 2 : i32
    %0 = arith.muli %c2_i32, %arg2 : i32
    %c4_i32 = arith.constant 4 : i32
    %1 = arith.addi %0, %c4_i32 : i32
    %c0_i32 = arith.constant 0 : i32
    %c0_i32_0 = arith.constant 0 : i32
    %c0_i32_1 = arith.constant 0 : i32
    return %arg0, %1, %c0_i32, %c0_i32_0 : i32, i32, i32, i32
  }
  func.func @transform_10(%arg0: i32, %arg1: i32, %arg2: i32) -> (i32, i32, i32, i32) {
    %c2_i32 = arith.constant 2 : i32
    %0 = arith.muli %c2_i32, %arg2 : i32
    %c5_i32 = arith.constant 5 : i32
    %1 = arith.addi %0, %c5_i32 : i32
    %c0_i32 = arith.constant 0 : i32
    %c0_i32_0 = arith.constant 0 : i32
    %c0_i32_1 = arith.constant 0 : i32
    return %arg0, %1, %c0_i32, %c0_i32_0 : i32, i32, i32, i32
  }
  func.func @transform_11(%arg0: i32, %arg1: i32, %arg2: i32) -> (i32, i32, i32, i32) {
    %c2_i32 = arith.constant 2 : i32
    %0 = arith.muli %c2_i32, %arg2 : i32
    %c5_i32 = arith.constant 5 : i32
    %1 = arith.addi %0, %c5_i32 : i32
    %c0_i32 = arith.constant 0 : i32
    %c0_i32_0 = arith.constant 0 : i32
    %c0_i32_1 = arith.constant 0 : i32
    return %arg0, %1, %c0_i32, %c0_i32_0 : i32, i32, i32, i32
  }
  func.func @transform_12(%arg0: i32, %arg1: i32, %arg2: i32) -> (i32, i32, i32, i32) {
    %c2_i32 = arith.constant 2 : i32
    %0 = arith.muli %c2_i32, %arg2 : i32
    %c6_i32 = arith.constant 6 : i32
    %1 = arith.addi %0, %c6_i32 : i32
    %c0_i32 = arith.constant 0 : i32
    %c0_i32_0 = arith.constant 0 : i32
    %c0_i32_1 = arith.constant 0 : i32
    return %arg0, %1, %c0_i32, %c0_i32_0 : i32, i32, i32, i32
  }
  func.func @transform_13(%arg0: i32, %arg1: i32, %arg2: i32) -> (i32, i32, i32, i32) {
    %c2_i32 = arith.constant 2 : i32
    %0 = arith.muli %c2_i32, %arg2 : i32
    %c6_i32 = arith.constant 6 : i32
    %1 = arith.addi %0, %c6_i32 : i32
    %c0_i32 = arith.constant 0 : i32
    %c0_i32_0 = arith.constant 0 : i32
    %c0_i32_1 = arith.constant 0 : i32
    return %arg0, %1, %c0_i32, %c0_i32_0 : i32, i32, i32, i32
  }
  func.func @transform_14(%arg0: i32, %arg1: i32, %arg2: i32) -> (i32, i32, i32) {
    %c0_i32 = arith.constant 0 : i32
    %c0_i32_0 = arith.constant 0 : i32
    %c0_i32_1 = arith.constant 0 : i32
    return %c0_i32, %c0_i32_0, %arg1 : i32, i32, i32
  }
  func.func @transform_15(%arg0: i32, %arg1: i32, %arg2: i32) -> (i32, i32) {
    %c0_i32 = arith.constant 0 : i32
    %c0_i32_0 = arith.constant 0 : i32
    return %c0_i32, %arg1 : i32, i32
  }
  func.func @transform_16(%arg0: i32, %arg1: i32, %arg2: i32) -> (i32, i32, i32, i32) {
    %c0_i32 = arith.constant 0 : i32
    %c0_i32_0 = arith.constant 0 : i32
    return %arg0, %arg2, %c0_i32, %arg1 : i32, i32, i32, i32
  }
}

</mosaic_0001>

<bundles_post_ra>
// kernel: tpu_custom_call.1
= control target key start
LH: loop header
LB: loop body
LE: loop exit
PB: predicated region body
PF: predicated region fallthrough
CT: control target
= control target key end

     0   :  { %s9695_s0 = inlined_call_operand.vmem [shape: bf16[2,38,19,64], index: 0, kind: input, shape index: {}]   ;;  %s9696_s1 = inlined_call_operand.vmem [shape: bf16[2,38,19,64], index: 1, kind: input, shape index: {}]   ;;  %s9697_s2 = inlined_call_operand.vmem [shape: bf16[2,38,19,64], index: 2, kind: input, shape index: {}]   ;;  %s9698_s3 = inlined_call_operand.vmem [shape: bf16[2,38,19,64], index: 3, kind: input, shape index: {}]   ;;  %s9699_s4 = inlined_call_operand.vmem [shape: bf16[2,38,19,64], index: 4, kind: input, shape index: {}]   ;;  %s9700_s5 = inlined_call_operand.vmem [shape: bf16[2,38,19,64], index: 5, kind: input, shape index: {}]   ;;  %s9701_s6 = inlined_call_operand.vmem [shape: bf16[2,38,19,64], index: 6, kind: input, shape index: {}]   ;;  %s9702_s7 = inlined_call_operand.vmem [shape: bf16[2,38,19,64], index: 7, kind: input, shape index: {}]   ;;  %s9703_s8 = inlined_call_operand.vmem [shape: bf16[2,38,19,64], index: 8, kind: input, shape index: {}]   ;;  %s9704_s9 = inlined_call_operand.vmem [shape: bf16[2,38,19,64], index: 9, kind: input, shape index: {}]   ;;  %s9705_s10 = inlined_call_operand.vmem [shape: bf16[2,38,19,64], index: 10, kind: input, shape index: {}]   ;;  %s9706_s11 = inlined_call_operand.vmem [shape: bf16[2,38,19,64], index: 11, kind: input, shape index: {}]   ;;  %s9707_s12 = inlined_call_operand.vmem [shape: bf16[2,38,19,64], index: 12, kind: input, shape index: {}]   ;;  %s9708_s13 = inlined_call_operand.vmem [shape: bf16[2,38,19,64], index: 13, kind: input, shape index: {}]   ;;  %s9709_s14 = inlined_call_operand.vmem [shape: bf16[49,64,64], index: 14, kind: input, shape index: {}]   ;;  %s9710_s15 = inlined_call_operand.vmem [shape: f32[1,64], index: 15, kind: input, shape index: {}]   ;;  %s9711_s16 = inlined_call_operand.hbm [shape: f32[2,16,16,64], index: 16, kind: output, shape index: {}]  }
   0x1   :  { %9724 = sst [smem:[#allocation15_spill]] %s9695_s0 }
   0x2   :  { %9725 = sst [smem:[#allocation16_spill]] %s9710_s15 }
   0x3   :  { %9726 = sst [smem:[#allocation17_spill]] %s9711_s16 }
   0x4   :  { %21 = vsyncpa [#allocation3], 0 }
   0x5   :  { %23 = vsyncpa [#allocation3 + $0x1], 0  ;;  %s8289_s21 = smov 0   ;;  %s8291_s22 = smov 0  }
   0x6   :  { %s8293_s23 = smov 0   ;;  %s8295_s24 = smov 0  }
   0x7   :  { %s8297_s25 = smov 0   ;;  %s8299_s26 = smov 0  }
   0x8   :  { %s8301_s27 = smov 0   ;;  %s8303_s28 = smov 0  }
   0x9 LB: > { %9727 = sst [smem:[#allocation5_spill]] %s8169_s21  ;;  %s6167_s29 = sadd.s32 4294967295, %s8197_s28   ;;  %s8197_s28 = sphi %s8303_s28, %s29_s28   ;;  %s8193_s27 = sphi %s8301_s27, %s9752_s27   ;;  %s8189_s26 = sphi %s8299_s26, %s9751_s26   ;;  %s8185_s25 = sphi %s8297_s25, %s9750_s25   ;;  %s8181_s24 = sphi %s8295_s24, %s9749_s24   ;;  %s8177_s23 = sphi %s8293_s23, %s9748_s23   ;;  %s8173_s22 = sphi %s8291_s22, %s9754_s22   ;;  %s8169_s21 = sphi %s8289_s21, %s9753_s21  }
   0xa   : > { %9728 = sst [smem:[#allocation6_spill]] %s8177_s23  ;;  %s6168_s30 = sadd.s32 4294967294, %s8197_s28  }
   0xb   : > { %9729 = sst [smem:[#allocation7_spill]] %s8189_s26  ;;  %s41_s0 = sadd.s32 1, %s8189_s26 }
   0xc   : > { %9730 = sst [smem:[#allocation8_spill]] %s8193_s27  ;;  %p42_p0 = scmp.ge.s32.totalorder %s41_s0, 16 }
   0xd   : > { %9731 = sst [smem:[#allocation9_spill]] %s8197_s28  ;;  %s48_s17 = sadd.s32 1, %s8193_s27 }
   0xe   : > { %p565_p1 = scmp.ne.s32.totalorder %s8177_s23, %s8173_s22  ;;  %p566_p2 = scmp.eq.s32.totalorder %s6167_s29, 31 }
   0xf   : > { %s9756_s0 = smov (%p42_p0, %s41_s0), 0  ;;  %s9758_s17 = smov (!%p42_p0, %s48_s17), %s8193_s27 }
  0x10   : > { %9732 = sst [smem:[#allocation10_spill]] %s9756_s0  ;;  %s549_s18 = ssub.s32 %s8189_s26, %s9756_s0 }
  0x11   : > { %p8340_p3 = por %p566_p2, %p565_p1  ;;  %p50_p4 = scmp.ge.s32.totalorder %s9758_s17, 2 }
  0x12   : > { %p571_p5 = scmp.ne.s32.totalorder %s8173_s22, %s8169_s21  ;;  %p572_p6 = scmp.eq.s32.totalorder %s6168_s30, 31 }
  0x13   : > { %s9733_s19 = scalar_select %p8340_p3, 1, 0 }
  0x14   : > { %p6201_p7 = scmp.ge.s32.totalorder %s8197_s28, 1  ;;  %s9760_s17 = smov (%p50_p4, %s9758_s17), 0 }
  0x15   : > { %9734 = sst [smem:[#allocation11_spill]] %s9733_s19  ;;  %p8349_p8 = por %p572_p6, %p571_p5 }
  0x16   : > { %9735 = sst [smem:[#allocation12_spill]] %s9760_s17  ;;  %p823_p9 = scmp.lt.s32.totalorder %s8197_s28, 33 }
  0x17   : > { %s9736_s20 = scalar_select %p8349_p8, 1, 0 }
  0x18   : > { %s548_s29 = ssub.s32 %s8193_s27, %s9760_s17  ;;  %s555_s16 = sadd.s32 1, %s8177_s23 }
  0x19   : > { %9737 = sst [smem:[#allocation13_spill]] %s9736_s20  ;;  %s550_s15 = sor.u32 %s549_s18, %s548_s29 }
  0x1a   : > { %p824_p10 = pnand %p6201_p7, %p823_p9  ;;  %p553_p11 = scmp.eq.s32.totalorder %s550_s15, 0 }
  0x1b   : > { %s8374_s21 = sshll.u32 (!%p824_p10), %s8181_s24, 1  ;;  %p1028_p12 = scmp.lt.s32.totalorder (!%p824_p10), %s8185_s25, 1 }
  0x1c   : > { %s8358_s0 = scalar_select %p553_p11, %s8177_s23, %s555_s16  }
  0x1d   : > { %827 = sbr.rel (%p824_p10) target bundleno = 652 (0x28c), region = 84  ;;  %p1030_p13 = scmp.lt.s32.totalorder (!%p824_p10), %s8374_s21, 37 }
  0x1e   : > { %9738 = sst [smem:[#allocation14_spill]] %s8358_s0  ;;  %s1102_s27 = sadd.s32 (!%p824_p10), 3, %s8374_s21 }
  0x1f   : > { %p1105_p2 = scmp.lt.s32.totalorder (!%p824_p10), %s1102_s27, 37  ;;  %s1180_s28 = sadd.s32 (!%p824_p10), 6, %s8374_s21 }
  0x20   : > { %p1183_p6 = scmp.lt.s32.totalorder (!%p824_p10), %s1180_s28, 37 }
  0x22   : > { %v7846_v0 = vld [vmem:[%s9709_s14 + $0x38] sm:$0xff]   ;;  %v8199_v1 = vmov 0.0   ;;  %v7848_v3 = vld [vmem:[%s9709_s14 + $0x30] sm:$0xff]   ;;  %vm8200_vm0 = vmmov 0   ;;  %s1029_s17 = scalar_select %p1028_p12, %s8185_s25, 1  ;;  %v7850_v5 = vld [vmem:[%s9709_s14 + $0x28] sm:$0xff]  }
  0x23   : > { %7175 = vmatprep.subr.bf16.mxu0 %v8199_v1  ;;  %7187 = vmatprep.subr.bf16.mxu1 %v8199_v1  ;;  %v7847_v2 = vld [vmem:[%s9709_s14 + $0x18] sm:$0xff]   ;;  %v7849_v4 = vld [vmem:[%s9709_s14 + $0x10] sm:$0xff]   ;;  %s1031_s30 = scalar_select %p1030_p13, %s8374_s21, 37  ;;  %v7851_v6 = vld [vmem:[%s9709_s14 + $0x8] sm:$0xff]   ;;  %vm1264_vm1 = vcmask 523264   ;;  %vm1600_vm3 = vcmask 1046528  }
  0x24   : > { %7176 = vmatpush3.bf16.msra.mxu0 %v7846_v0  ;;  %7183 = vmatprep.mubr.msk.bf16.mxu0 %vm8200_vm0, %v8199_v1  ;;  %s8394_s26 = smul.u32 114, %s1029_s17  ;;  %v7852_v7 = vld [vmem:[%s9709_s14 + $0x20] sm:$0xff]   ;;  %v7856_v9 = vld [vmem:[%s9709_s14 + $0x58] sm:$0xff]   ;;  %v7858_v13 = vld [vmem:[%s9709_s14 + $0x50] sm:$0xff]   ;;  %vm1402_vm2 = vsmask.f32 7424 }
  0x25   : > { %7188 = vmatpush3.bf16.msra.mxu1 %v7847_v2  ;;  %7177 = vmatprep.subr.bf16.mxu0 %v8199_v1  ;;  %s7763_s18 = smul.u32 3, %s1031_s30  ;;  %v7853_v8 = vld [vmem:[%s9709_s14] sm:$0xff]   ;;  %s9739_s30 = sld [smem:[#allocation15_spill]]  ;;  %v7857_v12 = vld [vmem:[%s9709_s14 + $0x78] sm:$0xff]   ;;  %v7859_v14 = vld [vmem:[%s9709_s14 + $0x70] sm:$0xff]  }
  0x26   : > { %7189 = vmatprep.subr.bf16.mxu1 %v8199_v1  ;;  %7195 = vmatprep.mubr.msk.bf16.mxu1 %vm8200_vm0, %v8199_v1  ;;  %v7860_v19 = vld [vmem:[%s9709_s14 + $0x48] sm:$0xff]   ;;  %v7862_v29 = vld [vmem:[%s9709_s14 + $0x40] sm:$0xff]   ;;  %v7866_v40 = vld [vmem:[%s9709_s14 + $0x98] sm:$0xff]   ;;  %vm1773_vm4 = vsmask.f32 6400  ;;  %s9766_s27 = smov (!%p1105_p2, %s1102_s27), 37 }
  0x27   : > { %s1034_s24 = sadd.s32 %s8394_s26, %s7763_s18  ;;  %v7861_v25 = vld [vmem:[%s9709_s14 + $0x68] sm:$0xff]   ;;  %v7863_v30 = vld [vmem:[%s9709_s14 + $0x60] sm:$0xff]   ;;  %v7869_v42 = vld [vmem:[%s9709_s14 + $0xb8] sm:$0xff]   ;;  %s7767_s16 = smul.u32 3, %s9766_s27 }
  0x28   : > { %7178 = vmatpush3.bf16.msra.mxu0 %v7848_v3  ;;  %s6204_s17 = sshll.u32 %s1034_s24, 2  ;;  %s1050_s24 = sadd.s32 1, %s8374_s21  ;;  %v7870_v43 = vld [vmem:[%s9709_s14 + $0x90] sm:$0xff]   ;;  %v7872_v47 = vld [vmem:[%s9709_s14 + $0x88] sm:$0xff]   ;;  %v7874_v51 = vld [vmem:[%s9709_s14 + $0x80] sm:$0xff]  }
  0x29   : > { %7190 = vmatpush3.bf16.msra.mxu1 %v7849_v4  ;;  %7179 = vmatprep.subr.bf16.mxu0 %v8199_v1  ;;  %s8414_s0 = scalar_lea.vmem %s9696_s1, %s6204_s17  ;;  %p8444_p0 = scmp.lt.s32.totalorder %s1050_s24, 37  ;;  %v7871_v44 = vld [vmem:[%s9709_s14 + $0xb0] sm:$0xff]   ;;  %v7873_v49 = vld [vmem:[%s9709_s14 + $0xa8] sm:$0xff]   ;;  %v7875_v54 = vld [vmem:[%s9709_s14 + $0xa0] sm:$0xff]  }
  0x2a   : > { %7191 = vmatprep.subr.bf16.mxu1 %v8199_v1  ;;  %v7854_v10 = vld [vmem:[%s8414_s0] sm:$0xff]   ;;  %v8467_v28 = vld [vmem:[%s8414_s0 + $0x8] ss:$0 sps:$4 sm:$0x11]   ;;  %v7877_v59 = vld [vmem:[%s9709_s14 + $0xd8] sm:$0xff]   ;;  %s8740_s27 = sadd.s32 %s7767_s16, %s8394_s26  ;;  %s1128_s16 = sadd.s32 4, %s8374_s21 }
  0x2b   : > { %s8409_s20 = scalar_lea.vmem %s9739_s30, %s6204_s17  ;;  %v1485_v23 = vld [vmem:[%s8414_s0] sm:$0xf]  ;;  %v8459_v24 = vld [vmem:[%s8414_s0 + $0x4] sm:$0xf]  ;;  %s9762_s24 = smov (!%p8444_p0, %s1050_s24), 37  ;;  %v1513_v34 = vshll.u32 %v8467_v28, 16 }
  0x2c   : > { %7180 = vmatpush3.bf16.msra.mxu0 %v7850_v5  ;;  %v7855_v11 = vld [vmem:[%s8409_s20] sm:$0xff]   ;;  %v8442_v18 = vld [vmem:[%s8409_s20 + $0x8] ss:$0 sps:$4 sm:$0x11]   ;;  %v6274_v27 = vcombine.low %v1485_v23, %v8459_v24  ;;  %s7765_s30 = smul.u32 3, %s9762_s24  ;;  %v1688_v56 = vrot.slane %v8467_v28, 1 }
  0x2d   : > { %7192 = vmatpush3.bf16.msra.mxu1 %v7851_v6  ;;  %7181 = vmatprep.subr.bf16.mxu0 %v8199_v1  ;;  %v1382_v15 = vld [vmem:[%s8409_s20] sm:$0xf]  ;;  %v8437_v16 = vld [vmem:[%s8409_s20 + $0x4] sm:$0xf]  ;;  %v1411_v22 = vshll.u32 %v8442_v18, 16  ;;  %v1515_v37 = vrot.slane %v1513_v34, 1 }
  0x2e   : > { %7193 = vmatprep.subr.bf16.mxu1 %v8199_v1  ;;  %v6259_v17 = vcombine.low %v1382_v15, %v8437_v16  ;;  %v1506_v32 = vshrl.u32 %v6274_v27, 16  ;;  %v1508_v33 = vshll.u32 %v6274_v27, 16  ;;  %s8503_s29 = sadd.s32 %s7765_s30, %s8394_s26  ;;  %v1587_v45 = vld [vmem:[%s8409_s20] sm:$0xe]  ;;  %v1602_v53 = vrot.slane %v8442_v18, 1  ;;  %v7879_v61 = vld [vmem:[%s9709_s14 + $0xf8] sm:$0xff]  }
  0x2f   : > { %v1413_v31 = vrot.slane %v1411_v22, 1  ;;  %v1674_v46 = vld [vmem:[%s8414_s0] sm:$0xe]  ;;  %s6208_s17 = sshll.u32 %s8503_s29, 2  ;;  %v6289_v48 = vcombine.low %v1587_v45, %v8437_v16  ;;  %v7880_v62 = vld [vmem:[%s9709_s14 + $0xd0] sm:$0xff]   ;;  %v7882_v5 = vld [vmem:[%s9709_s14 + $0xc8] sm:$0xff]  }
  0x30   : > { %7182 = vmatpush3.bf16.msra.mxu0 %v7852_v7  ;;  %v1404_v20 = vshrl.u32 %v6259_v17, 16  ;;  %v1406_v21 = vshll.u32 %v6259_v17, 16  ;;  %v1510_v36 = vrot.slane %v1508_v33, 1  ;;  %v6303_v50 = vcombine.low %v1674_v46, %v8459_v24  ;;  %s8529_s23 = scalar_lea.vmem %s9697_s2, %s6208_s17  ;;  %v7886_v57 = vld [vmem:[%s8409_s20 + $0x8] ss:$0 sps:$4 sm:$0x33]   ;;  %s8560_s19 = scalar_lea.vmem %s9698_s3, %s6208_s17 }
  0x31   : > { %7194 = vmatpush3.bf16.msra.mxu1 %v7853_v8  ;;  %7199 = vmatprep.subr.bf16.mxu0 %v8199_v1  ;;  %v1601_v52 = vrot.slane %v6289_v48, 1  ;;  %v1775_v63 = vshrl.u32 %v6289_v48, 16  ;;  %v1778_v0 = vshll.u32 %v6289_v48, 16  ;;  %v1783_v2 = vshrl.u32 %v7886_v57, 16  ;;  %v7881_v4 = vld [vmem:[%s9709_s14 + $0xf0] sm:$0xff]   ;;  %s1076_s24 = sadd.s32 2, %s8374_s21 }
  0x32   : > { %7211 = vmatprep.subr.bf16.mxu1 %v8199_v1  ;;  %v1408_v26 = vrot.slane %v1406_v21, 1  ;;  %v1511_v38 = vor.u32 %v1510_v36, %v1506_v32  ;;  %v1687_v55 = vrot.slane %v6303_v50, 1  ;;  %v1786_v3 = vshll.u32 %v7886_v57, 16  ;;  %v2033_v15 = vld [vmem:[%s8529_s23] sm:$0xf]  ;;  %v7887_v17 = vld [vmem:[%s9709_s14 + $0x118] sm:$0xff]  }
  0x33   : > { %7184 = vmatmul.mubr.msk.bf16.vlgmr.msra.gmra.mxu0 %vm1264_vm1, %v7854_v10  ;;  %v1603_v58 = vsel %vm1600_vm3, %v1601_v52, %v1602_v53  ;;  %v1777_v6 = vrot.slane %v1775_v63, 1  ;;  %v1780_v7 = vrot.slane %v1778_v0, 2  ;;  %v1785_v8 = vrot.slane %v1783_v2, 1  ;;  %v7883_v10 = vld [vmem:[%s9709_s14 + $0xe8] sm:$0xff]   ;;  %v8592_v16 = vld [vmem:[%s8529_s23 + $0x4] sm:$0xf] }
  0x34   : > { %7196 = vmatmul.mubr.msk.bf16.vlgmr.msra.gmra.mxu1 %vm1264_vm1, %v7855_v11  ;;  %7200 = vmatpush3.bf16.msra.mxu0 %v7856_v9  ;;  %v1409_v35 = vor.u32 %v1408_v26, %v1404_v20  ;;  %v1516_v41 = vsel %vm1402_vm2, %v1511_v38, %v1515_v37  ;;  %v1689_v60 = vsel %vm1600_vm3, %v1687_v55, %v1688_v56  ;;  %v1788_v9 = vrot.slane %v1786_v3, 2  ;;  %v7884_v11 = vld [vmem:[%s9709_s14 + $0xc0] sm:$0xff]   ;;  %p1079_p1 = scmp.lt.s32.totalorder %s1076_s24, 37  ;;  %v7889_v20 = vld [vmem:[%s9709_s14 + $0x138] sm:$0xff]   ;;  %v7890_v23 = vld [vmem:[%s9709_s14 + $0x110] sm:$0xff]   ;;  %p1131_p4 = scmp.lt.s32.totalorder %s1128_s16, 37 }
  0x35   : > { %7212 = vmatpush3.bf16.msra.mxu1 %v7857_v12  ;;  %7201 = vmatprep.subr.bf16.mxu0 %v8199_v1  ;;  %v7885_v12 = vld [vmem:[%s9709_s14 + $0xe0] sm:$0xff]   ;;  %v6359_v21 = vcombine.low %v2033_v15, %v8592_v16  ;;  %v8607_v22 = vld [vmem:[%s8529_s23 + $0x8] ss:$0 sps:$4 sm:$0x11]   ;;  %v7891_v24 = vld [vmem:[%s9709_s14 + $0x130] sm:$0xff]   ;;  %s1154_s30 = sadd.s32 5, %s8374_s21 }
  0x36   : > { %7213 = vmatprep.subr.bf16.mxu1 %v8199_v1  ;;  %7207 = vmatprep.mubr.msk.bf16.mxu0 %vm8200_vm0, %v8199_v1  ;;  %v1414_v39 = vsel %vm1402_vm2, %v1409_v35, %v1413_v31  ;;  %s9764_s24 = smov (!%p1079_p1, %s1076_s24), 37  ;;  %v2061_v26 = vshll.u32 %v8607_v22, 16  ;;  %v7892_v27 = vld [vmem:[%s9709_s14 + $0x108] sm:$0xff]   ;;  %v7894_v31 = vld [vmem:[%s9709_s14 + $0x100] sm:$0xff]   ;;  %v7897_v38 = vld [vmem:[%s9709_s14 + $0x158] sm:$0xff]   ;;  %s9768_s16 = smov (!%p1131_p4, %s1128_s16), 37 }
  0x37   : > { %7219 = vmatprep.mubr.msk.bf16.mxu1 %vm8200_vm0, %v8199_v1  ;;  %s7766_s20 = smul.u32 3, %s9764_s24  ;;  %v7893_v28 = vld [vmem:[%s9709_s14 + $0x128] sm:$0xff]   ;;  %v7895_v32 = vld [vmem:[%s9709_s14 + $0x120] sm:$0xff]   ;;  %v7902_v45 = vld [vmem:[%s9709_s14 + $0x170] sm:$0xff]   ;;  %p1157_p5 = scmp.lt.s32.totalorder %s1154_s30, 37 }
  0x38   : > { %7202 = vmatpush3.bf16.msra.mxu0 %v7858_v13  ;;  %v1781_v13 = vor.u32 %v1780_v7, %v1777_v6  ;;  %v2063_v33 = vrot.slane %v2061_v26, 1  ;;  %v2135_v34 = vld [vmem:[%s8560_s19] sm:$0xf]  ;;  %v8641_v36 = vld [vmem:[%s8560_s19 + $0x4] sm:$0xf]  ;;  %v7911_v63 = vld [vmem:[%s9709_s14 + $0x1b8] sm:$0xff]  }
  0x39   : > { %7214 = vmatpush3.bf16.msra.mxu1 %v7859_v14  ;;  %7203 = vmatprep.subr.bf16.mxu0 %v8199_v1  ;;  %v1789_v14 = vor.u32 %v1788_v9, %v1785_v8  ;;  %s1083_s0 = sadd.s32 %s7766_s20, %s8394_s26  ;;  %v7896_v37 = vld [vmem:[%s8560_s19] sm:$0xff]   ;;  %v7912_v0 = vld [vmem:[%s9709_s14 + $0x190] sm:$0xff]   ;;  %v7914_v8 = vld [vmem:[%s9709_s14 + $0x188] sm:$0xff]   ;;  %s6216_s20 = sshll.u32 %s8740_s27, 2 }
  0x3a   : > { %7215 = vmatprep.subr.bf16.mxu1 %v8199_v1  ;;  %s6212_s18 = sshll.u32 %s1083_s0, 2  ;;  %v2237_v46 = vld [vmem:[%s8529_s23] sm:$0xe]  ;;  %v7915_v9 = vld [vmem:[%s9709_s14 + $0x1a8] sm:$0xff]   ;;  %s8763_s27 = scalar_lea.vmem %s9701_s6, %s6216_s20  ;;  %v7923_v26 = vld [vmem:[%s9709_s14 + $0x1f0] sm:$0xff]  }
  0x3b   : > { %v1790_v18 = vsel %vm1773_vm4, %v1781_v13, %v1789_v14  ;;  %s8657_s24 = scalar_lea.vmem %s9699_s4, %s6212_s18  ;;  %s8667_s0 = scalar_lea.vmem %s9700_s5, %s6212_s18  ;;  %v6389_v52 = vcombine.low %v2237_v46, %v8592_v16  ;;  %v7905_v53 = vld [vmem:[%s9709_s14 + $0x140] sm:$0xff]   ;;  %v7933_v46 = vld [vmem:[%s9709_s14 + $0x230] sm:$0xff]  }
  0x3c   : > { %7204 = vmatpush3.bf16.msra.mxu0 %v7860_v19  ;;  %v7888_v19 = vld [vmem:[%s8529_s23] sm:$0xff]   ;;  %s8790_s15 = scalar_lea.vmem %s9702_s7, %s6216_s20  ;;  %s7768_s20 = smul.u32 3, %s9768_s16 }
  0x3d   : > { %7216 = vmatpush3.bf16.msra.mxu1 %v7861_v25  ;;  %7205 = vmatprep.subr.bf16.mxu0 %v8199_v1  ;;  %v2056_v25 = vshll.u32 %v6359_v21, 16  ;;  %v7906_v56 = vld [vmem:[%s9709_s14 + $0x160] sm:$0xff]   ;;  %v2250_v57 = vrot.slane %v6389_v52, 1  ;;  %v2423_v2 = vshrl.u32 %v6389_v52, 16  ;;  %v2426_v3 = vshll.u32 %v6389_v52, 16  ;;  %s9770_s30 = smov (!%p1157_p5, %s1154_s30), 37 }
  0x3e   : > { %7217 = vmatprep.subr.bf16.mxu1 %v8199_v1  ;;  %v7916_v16 = vld [vmem:[%s9709_s14 + $0x180] sm:$0xff]   ;;  %s1135_s16 = sadd.s32 %s7768_s20, %s8394_s26  ;;  %s9772_s28 = smov (!%p1183_p6, %s1180_s28), 37 }
  0x3f   : > { %s6220_s17 = sshll.u32 %s1135_s16, 2 }
  0x40   : > { %7206 = vmatpush3.bf16.msra.mxu0 %v7862_v29  ;;  %v2054_v29 = vshrl.u32 %v6359_v21, 16  ;;  %s8894_s16 = scalar_lea.vmem %s9703_s8, %s6220_s17  ;;  %s8905_s20 = scalar_lea.vmem %s9704_s9, %s6220_s17 }
  0x41   : > { %7218 = vmatpush3.bf16.msra.mxu1 %v7863_v30  ;;  %7223 = vmatprep.subr.bf16.mxu0 %v8199_v1  ;;  %v2058_v30 = vrot.slane %v2056_v25, 1  ;;  %v7922_v25 = vld [vmem:[%s9709_s14 + $0x1d0] sm:$0xff]   ;;  %s7769_s17 = smul.u32 3, %s9770_s30 }
  0x42   : > { %7235 = vmatprep.subr.bf16.mxu1 %v8199_v1 }
  0x43   : > { %7208 = vmatmul.mubr.msk.bf16.vlgmr.msra.gmra.mxu0 %vm1264_vm1, %v1414_v39  ;;  %v2059_v35 = vor.u32 %v2058_v30, %v2054_v29  ;;  %v6374_v39 = vcombine.low %v2135_v34, %v8641_v36  ;;  %v7926_v29 = vld [vmem:[%s9709_s14 + $0x1c0] sm:$0xff]   ;;  %s8978_s30 = sadd.s32 %s7769_s17, %s8394_s26 }
  0x44   : > { %7224 = vmatpush3.bf16.msra.mxu0 %v7866_v40  ;;  %7220 = vmatmul.mubr.msk.bf16.vlgmr.msra.gmra.mxu1 %vm1264_vm1, %v1516_v41  ;;  %v7900_v41 = vld [vmem:[%s9709_s14 + $0x178] sm:$0xff]   ;;  %v7927_v30 = vld [vmem:[%s9709_s14 + $0x1e0] sm:$0xff]   ;;  %s6224_s17 = sshll.u32 %s8978_s30, 2  ;;  %s7770_s30 = smul.u32 3, %s9772_s28 }
  0x45   : > { %7236 = vmatpush3.bf16.msra.mxu1 %v7869_v42  ;;  %7225 = vmatprep.subr.bf16.mxu0 %v8199_v1  ;;  %v2064_v40 = vsel %vm1402_vm2, %v2059_v35, %v2063_v33  ;;  %v8661_v42 = vld [vmem:[%s8560_s19 + $0x8] ss:$0 sps:$4 sm:$0x11]   ;;  %v2156_v48 = vshrl.u32 %v6374_v39, 16  ;;  %v2783_v33 = vld [vmem:[%s8667_s0] sm:$0xf]  ;;  %s9029_s29 = scalar_lea.vmem %s9706_s11, %s6224_s17 }
  0x46   : > { %7237 = vmatprep.subr.bf16.mxu1 %v8199_v1  ;;  %7231 = vmatprep.mubr.msk.bf16.mxu0 %vm8200_vm0, %v8199_v1  ;;  %v2163_v50 = vshll.u32 %v8661_v42, 16  ;;  %v2337_v15 = vrot.slane %v8661_v42, 1  ;;  %v8806_v34 = vld [vmem:[%s8667_s0 + $0x4] sm:$0xf]  ;;  %v7932_v42 = vld [vmem:[%s9709_s14 + $0x210] sm:$0xff]  }
  0x47   : > { %7243 = vmatprep.mubr.msk.bf16.mxu1 %vm8200_vm0, %v8199_v1  ;;  %v7928_v35 = vld [vmem:[%s8657_s24] sm:$0xff]  }
  0x48   : > { %7226 = vmatpush3.bf16.msra.mxu0 %v7870_v43  ;;  %v7901_v43 = vld [vmem:[%s9709_s14 + $0x150] sm:$0xff]   ;;  %v2165_v55 = vrot.slane %v2163_v50, 1 }
  0x49   : > { %7238 = vmatpush3.bf16.msra.mxu1 %v7871_v44  ;;  %7227 = vmatprep.subr.bf16.mxu0 %v8199_v1  ;;  %v2158_v44 = vshll.u32 %v6374_v39, 16 }
  0x4a   : > { %7239 = vmatprep.subr.bf16.mxu1 %v8199_v1 }
  0x4c   : > { %7228 = vmatpush3.bf16.msra.mxu0 %v7872_v47  ;;  %v7903_v47 = vld [vmem:[%s9709_s14 + $0x148] sm:$0xff]  }
  0x4d   : > { %7240 = vmatpush3.bf16.msra.mxu1 %v7873_v49  ;;  %7229 = vmatprep.subr.bf16.mxu0 %v8199_v1  ;;  %v2160_v49 = vrot.slane %v2158_v44, 1 }
  0x4e   : > { %7241 = vmatprep.subr.bf16.mxu1 %v8199_v1 }
  0x50   : > { %7230 = vmatpush3.bf16.msra.mxu0 %v7874_v51  ;;  %v7904_v51 = vld [vmem:[%s9709_s14 + $0x168] sm:$0xff]  }
  0x51   : > { %7242 = vmatpush3.bf16.msra.mxu1 %v7875_v54  ;;  %7247 = vmatprep.subr.bf16.mxu0 %v8199_v1  ;;  %v2161_v54 = vor.u32 %v2160_v49, %v2156_v48  ;;  %v7935_v48 = vld [vmem:[%s9709_s14 + $0x228] sm:$0xff]  }
  0x52   : > { %7259 = vmatprep.subr.bf16.mxu1 %v8199_v1 }
  0x53   : > { %7232 = vmatmul.mubr.msk.bf16.vlgmr.msra.gmra.mxu0 %vm1264_vm1, %v1603_v58  ;;  %v2251_v58 = vrot.slane %v8607_v22, 1  ;;  %v7919_v22 = vld [vmem:[%s9709_s14 + $0x1d8] sm:$0xff]  }
  0x54   : > { %7248 = vmatpush3.bf16.msra.mxu0 %v7877_v59  ;;  %7244 = vmatmul.mubr.msk.bf16.vlgmr.msra.gmra.mxu1 %vm1264_vm1, %v1689_v60  ;;  %v2166_v59 = vsel %vm1402_vm2, %v2161_v54, %v2165_v55  ;;  %v7909_v60 = vld [vmem:[%s9709_s14 + $0x198] sm:$0xff]   ;;  %v7936_v55 = vld [vmem:[%s9709_s14 + $0x200] sm:$0xff]  }
  0x55   : > { %7260 = vmatpush3.bf16.msra.mxu1 %v7879_v61  ;;  %7249 = vmatprep.subr.bf16.mxu0 %v8199_v1  ;;  %v7920_v61 = vld [vmem:[%s8529_s23 + $0x8] ss:$0 sps:$4 sm:$0x33]   ;;  %s1187_s23 = sadd.s32 %s7770_s30, %s8394_s26  ;;  %s9741_s30 = sld [smem:[#allocation16_spill]] }
  0x56   : > { %7261 = vmatprep.subr.bf16.mxu1 %v8199_v1  ;;  %7255 = vmatprep.mubr.msk.bf16.mxu0 %vm8200_vm0, %v8199_v1  ;;  %v2431_v6 = vshrl.u32 %v7920_v61, 16  ;;  %v2434_v7 = vshll.u32 %v7920_v61, 16 }
  0x57   : > { %7267 = vmatprep.mubr.msk.bf16.mxu1 %vm8200_vm0, %v8199_v1 }
  0x58   : > { %7250 = vmatpush3.bf16.msra.mxu0 %v7880_v62  ;;  %v2252_v62 = vsel %vm1600_vm3, %v2250_v57, %v2251_v58  ;;  %v2433_v13 = vrot.slane %v2431_v6, 1  ;;  %v2436_v14 = vrot.slane %v2434_v7, 2  ;;  %v7937_v58 = vld [vmem:[%s9709_s14 + $0x220] sm:$0xff]   ;;  %v7946_v6 = vld [vmem:[%s9709_s14 + $0x248] sm:$0xff]  }
  0x59   : > { %7262 = vmatpush3.bf16.msra.mxu1 %v7881_v4  ;;  %7251 = vmatprep.subr.bf16.mxu0 %v8199_v1  ;;  %v7913_v4 = vld [vmem:[%s9709_s14 + $0x1b0] sm:$0xff]  }
  0x5a   : > { %7263 = vmatprep.subr.bf16.mxu1 %v8199_v1 }
  0x5c   : > { %7252 = vmatpush3.bf16.msra.mxu0 %v7882_v5  ;;  %v2323_v5 = vld [vmem:[%s8560_s19] sm:$0xe] }
  0x5d   : > { %7264 = vmatpush3.bf16.msra.mxu1 %v7883_v10  ;;  %7253 = vmatprep.subr.bf16.mxu0 %v8199_v1  ;;  %v6403_v10 = vcombine.low %v2323_v5, %v8641_v36  ;;  %v7929_v36 = vld [vmem:[%s9709_s14 + $0x218] sm:$0xff]   ;;  %v2971_v5 = vld [vmem:[%s8667_s0] sm:$0xe] }
  0x5e   : > { %7265 = vmatprep.subr.bf16.mxu1 %v8199_v1 }
  0x60   : > { %7254 = vmatpush3.bf16.msra.mxu0 %v7884_v11  ;;  %v2425_v11 = vrot.slane %v2423_v2, 1  ;;  %v7944_v2 = vld [vmem:[%s9709_s14 + $0x250] sm:$0xff]  }
  0x61   : > { %7266 = vmatpush3.bf16.msra.mxu1 %v7885_v12  ;;  %7271 = vmatprep.subr.bf16.mxu0 %v8199_v1  ;;  %v2428_v12 = vrot.slane %v2426_v3, 2  ;;  %v2885_v3 = vld [vmem:[%s8657_s24] sm:$0xe] }
  0x62   : > { %7283 = vmatprep.subr.bf16.mxu1 %v8199_v1 }
  0x63   : > { %7256 = vmatmul.mubr.msk.bf16.vlgmr.msra.gmra.mxu0 %vm1264_vm1, %v1790_v18  ;;  %v7917_v18 = vld [vmem:[%s9709_s14 + $0x1a0] sm:$0xff]  }
  0x64   : > { %7272 = vmatpush3.bf16.msra.mxu0 %v7887_v17  ;;  %7268 = vmatmul.mubr.msk.bf16.vlgmr.msra.gmra.mxu1 %vm1264_vm1, %v7888_v19  ;;  %v2336_v17 = vrot.slane %v6403_v10, 1  ;;  %v2429_v19 = vor.u32 %v2428_v12, %v2425_v11  ;;  %v7948_v12 = vld [vmem:[%s9709_s14 + $0x240] sm:$0xff]  }
  0x65   : > { %7284 = vmatpush3.bf16.msra.mxu1 %v7889_v20  ;;  %7273 = vmatprep.subr.bf16.mxu0 %v8199_v1  ;;  %v2437_v20 = vor.u32 %v2436_v14, %v2433_v13  ;;  %v7949_v14 = vld [vmem:[%s9709_s14 + $0x260] sm:$0xff]  }
  0x66   : > { %7285 = vmatprep.subr.bf16.mxu1 %v8199_v1  ;;  %7279 = vmatprep.mubr.msk.bf16.mxu0 %vm8200_vm0, %v8199_v1  ;;  %v2338_v21 = vsel %vm1600_vm3, %v2336_v17, %v2337_v15 }
  0x67   : > { %7291 = vmatprep.mubr.msk.bf16.mxu1 %vm8200_vm0, %v8199_v1 }
  0x68   : > { %7274 = vmatpush3.bf16.msra.mxu0 %v7890_v23  ;;  %v2438_v23 = vsel %vm1773_vm4, %v2429_v19, %v2437_v20  ;;  %v7953_v20 = vld [vmem:[%s9709_s14 + $0x2b8] sm:$0xff]  }
  0x69   : > { %7286 = vmatpush3.bf16.msra.mxu1 %v7891_v24  ;;  %7275 = vmatprep.subr.bf16.mxu0 %v8199_v1  ;;  %v7921_v24 = vld [vmem:[%s9709_s14 + $0x1f8] sm:$0xff]  }
  0x6a   : > { %7287 = vmatprep.subr.bf16.mxu1 %v8199_v1 }
  0x6c   : > { %7276 = vmatpush3.bf16.msra.mxu0 %v7892_v27  ;;  %v7924_v27 = vld [vmem:[%s9709_s14 + $0x1c8] sm:$0xff]  }
  0x6d   : > { %7288 = vmatpush3.bf16.msra.mxu1 %v7893_v28  ;;  %7277 = vmatprep.subr.bf16.mxu0 %v8199_v1  ;;  %v7925_v28 = vld [vmem:[%s9709_s14 + $0x1e8] sm:$0xff]  }
  0x6e   : > { %7289 = vmatprep.subr.bf16.mxu1 %v8199_v1 }
  0x70   : > { %7278 = vmatpush3.bf16.msra.mxu0 %v7894_v31  ;;  %v2681_v31 = vld [vmem:[%s8657_s24] sm:$0xf] }
  0x71   : > { %7290 = vmatpush3.bf16.msra.mxu1 %v7895_v32  ;;  %7295 = vmatprep.subr.bf16.mxu0 %v8199_v1  ;;  %v8801_v32 = vld [vmem:[%s8657_s24 + $0x4] sm:$0xf] }
  0x72   : > { %7307 = vmatprep.subr.bf16.mxu1 %v8199_v1  ;;  %v6459_v39 = vcombine.low %v2681_v31, %v8801_v32  ;;  %v6489_v7 = vcombine.low %v2885_v3, %v8801_v32  ;;  %v7957_v32 = vld [vmem:[%s9709_s14 + $0x2a8] sm:$0xff]   ;;  %v7975_v3 = vld [vmem:[%s9709_s14 + $0x310] sm:$0xff]  }
  0x73   : > { %7280 = vmatmul.mubr.msk.bf16.vlgmr.msra.gmra.mxu0 %vm1264_vm1, %v7896_v37  ;;  %v7930_v37 = vld [vmem:[%s8667_s0] sm:$0xff]  }
  0x74   : > { %7296 = vmatpush3.bf16.msra.mxu0 %v7897_v38  ;;  %7292 = vmatmul.mubr.msk.bf16.vlgmr.msra.gmra.mxu1 %vm1264_vm1, %v2064_v40  ;;  %v7931_v38 = vld [vmem:[%s9709_s14 + $0x238] sm:$0xff]   ;;  %v6474_v40 = vcombine.low %v2783_v33, %v8806_v34  ;;  %v2704_v44 = vshll.u32 %v6459_v39, 16  ;;  %v2702_v49 = vshrl.u32 %v6459_v39, 16  ;;  %v2898_v13 = vrot.slane %v6489_v7, 1  ;;  %v7958_v33 = vld [vmem:[%s9709_s14 + $0x280] sm:$0xff]  }
  0x75   : > { %7308 = vmatpush3.bf16.msra.mxu1 %v7900_v41  ;;  %7297 = vmatprep.subr.bf16.mxu0 %v8199_v1  ;;  %v8821_v41 = vld [vmem:[%s8657_s24 + $0x8] ss:$0 sps:$4 sm:$0x11]   ;;  %v7961_v39 = vld [vmem:[%s9709_s14 + $0x2d8] sm:$0xff]  }
  0x76   : > { %7309 = vmatprep.subr.bf16.mxu1 %v8199_v1  ;;  %7303 = vmatprep.mubr.msk.bf16.mxu0 %vm8200_vm0, %v8199_v1  ;;  %v2709_v50 = vshll.u32 %v8821_v41, 16  ;;  %v2804_v52 = vshrl.u32 %v6474_v40, 16  ;;  %v2899_v10 = vrot.slane %v8821_v41, 1  ;;  %v7962_v41 = vld [vmem:[%s8763_s27] sm:$0xff]  }
  0x77   : > { %7315 = vmatprep.mubr.msk.bf16.mxu1 %vm8200_vm0, %v8199_v1 }
  0x78   : > { %7298 = vmatpush3.bf16.msra.mxu0 %v7901_v43  ;;  %v8828_v43 = vld [vmem:[%s8667_s0 + $0x8] ss:$0 sps:$4 sm:$0x11]   ;;  %v2711_v57 = vrot.slane %v2709_v50, 1  ;;  %v2900_v17 = vsel %vm1600_vm3, %v2898_v13, %v2899_v10  ;;  %s9005_s0 = scalar_lea.vmem %s9705_s10, %s6224_s17 }
  0x79   : > { %7310 = vmatpush3.bf16.msra.mxu1 %v7902_v45  ;;  %7299 = vmatprep.subr.bf16.mxu0 %v8199_v1  ;;  %v2806_v45 = vshll.u32 %v6474_v40, 16  ;;  %v2811_v54 = vshll.u32 %v8828_v43, 16  ;;  %v2985_v11 = vrot.slane %v8828_v43, 1  ;;  %v8970_v43 = vld [vmem:[%s8763_s27 + $0x8] ss:$0 sps:$4 sm:$0x11]  }
  0x7a   : > { %7311 = vmatprep.subr.bf16.mxu1 %v8199_v1  ;;  %v7967_v50 = vld [vmem:[%s9709_s14 + $0x2e8] sm:$0xff]  }
  0x7b   : > { %v7978_v10 = vld [vmem:[%s9709_s14 + $0x328] sm:$0xff]  }
  0x7c   : > { %7300 = vmatpush3.bf16.msra.mxu0 %v7903_v47  ;;  %v7934_v47 = vld [vmem:[%s9709_s14 + $0x208] sm:$0xff]  }
  0x7d   : > { %7312 = vmatpush3.bf16.msra.mxu1 %v7904_v51  ;;  %7301 = vmatprep.subr.bf16.mxu0 %v8199_v1  ;;  %v2706_v51 = vrot.slane %v2704_v44, 1  ;;  %v7963_v44 = vld [vmem:[%s9709_s14 + $0x2f8] sm:$0xff]  }
  0x7e   : > { %7313 = vmatprep.subr.bf16.mxu1 %v8199_v1 }
  0x80   : > { %7302 = vmatpush3.bf16.msra.mxu0 %v7905_v53  ;;  %v2808_v53 = vrot.slane %v2806_v45, 1  ;;  %v7964_v45 = vld [vmem:[%s9709_s14 + $0x2d0] sm:$0xff]  }
  0x81   : > { %7314 = vmatpush3.bf16.msra.mxu1 %v7906_v56  ;;  %7319 = vmatprep.subr.bf16.mxu0 %v8199_v1  ;;  %v2707_v56 = vor.u32 %v2706_v51, %v2702_v49  ;;  %v7966_v49 = vld [vmem:[%s9709_s14 + $0x2c8] sm:$0xff]  }
  0x82   : > { %7331 = vmatprep.subr.bf16.mxu1 %v8199_v1 }
  0x83   : > { %7304 = vmatmul.mubr.msk.bf16.vlgmr.msra.gmra.mxu0 %vm1264_vm1, %v2166_v59  ;;  %v2809_v59 = vor.u32 %v2808_v53, %v2804_v52  ;;  %v2712_v61 = vsel %vm1402_vm2, %v2707_v56, %v2711_v57  ;;  %v7968_v53 = vld [vmem:[%s9709_s14 + $0x2c0] sm:$0xff]  }
  0x84   : > { %7320 = vmatpush3.bf16.msra.mxu0 %v7909_v60  ;;  %7316 = vmatmul.mubr.msk.bf16.vlgmr.msra.gmra.mxu1 %vm1264_vm1, %v2252_v62  ;;  %v2813_v60 = vrot.slane %v2811_v54, 1  ;;  %v7940_v62 = vld [vmem:[%s9709_s14 + $0x258] sm:$0xff]   ;;  %v3431_v56 = vld [vmem:[%s8790_s15] sm:$0xf]  ;;  %v9017_v57 = vld [vmem:[%s8790_s15 + $0x4] sm:$0xf] }
  0x85   : > { %7332 = vmatpush3.bf16.msra.mxu1 %v7911_v63  ;;  %7321 = vmatprep.subr.bf16.mxu0 %v8199_v1 }
  0x86   : > { %7333 = vmatprep.subr.bf16.mxu1 %v8199_v1  ;;  %7327 = vmatprep.mubr.msk.bf16.mxu0 %vm8200_vm0, %v8199_v1  ;;  %v2814_v63 = vsel %vm1402_vm2, %v2809_v59, %v2813_v60  ;;  %v7970_v59 = vld [vmem:[%s8790_s15] sm:$0xff]   ;;  %v6574_v60 = vcombine.low %v3431_v56, %v9017_v57  ;;  %v7995_v56 = vld [vmem:[%s9709_s14 + $0x3b8] sm:$0xff]  }
  0x87   : > { %7339 = vmatprep.mubr.msk.bf16.mxu1 %vm8200_vm0, %v8199_v1 }
  0x88   : > { %7322 = vmatpush3.bf16.msra.mxu0 %v7912_v0  ;;  %v7943_v0 = vld [vmem:[%s9709_s14 + $0x278] sm:$0xff]  }
  0x89   : > { %7334 = vmatpush3.bf16.msra.mxu1 %v7913_v4  ;;  %7323 = vmatprep.subr.bf16.mxu0 %v8199_v1  ;;  %v7945_v4 = vld [vmem:[%s9709_s14 + $0x270] sm:$0xff]  }
  0x8a   : > { %7335 = vmatprep.subr.bf16.mxu1 %v8199_v1 }
  0x8c   : > { %7324 = vmatpush3.bf16.msra.mxu0 %v7914_v8  ;;  %v7947_v8 = vld [vmem:[%s9709_s14 + $0x268] sm:$0xff]  }
  0x8d   : > { %7336 = vmatpush3.bf16.msra.mxu1 %v7915_v9  ;;  %7325 = vmatprep.subr.bf16.mxu0 %v8199_v1  ;;  %v6503_v9 = vcombine.low %v2971_v5, %v8806_v34  ;;  %v7959_v34 = vld [vmem:[%s9709_s14 + $0x2a0] sm:$0xff]  }
  0x8e   : > { %7337 = vmatprep.subr.bf16.mxu1 %v8199_v1  ;;  %v3533_v5 = vld [vmem:[%s8763_s27] sm:$0xe] }
  0x8f   : > { %v2984_v15 = vrot.slane %v6503_v9, 1 }
  0x90   : > { %7326 = vmatpush3.bf16.msra.mxu0 %v7916_v16  ;;  %v7960_v16 = vld [vmem:[%s8657_s24 + $0x8] ss:$0 sps:$4 sm:$0x33]   ;;  %s6926_s24 = sshll.u32 %s8185_s25, 5 }
  0x91   : > { %7338 = vmatpush3.bf16.msra.mxu1 %v7917_v18  ;;  %7343 = vmatprep.subr.bf16.mxu0 %v8199_v1  ;;  %v7951_v18 = vld [vmem:[%s9709_s14 + $0x298] sm:$0xff]   ;;  %v2986_v19 = vsel %vm1600_vm3, %v2984_v15, %v2985_v11  ;;  %v7980_v15 = vld [vmem:[%s9709_s14 + $0x320] sm:$0xff]   ;;  %s5775_s19 = sadd.s32 %s6926_s24, %s8374_s21 }
  0x92   : > { %7355 = vmatprep.subr.bf16.mxu1 %v8199_v1 }
  0x93   : > { %7328 = vmatmul.mubr.msk.bf16.vlgmr.msra.gmra.mxu0 %vm1264_vm1, %v2338_v21  ;;  %v3071_v21 = vshrl.u32 %v6489_v7, 16 }
  0x94   : > { %7344 = vmatpush3.bf16.msra.mxu0 %v7919_v22  ;;  %7340 = vmatmul.mubr.msk.bf16.vlgmr.msra.gmra.mxu1 %vm1264_vm1, %v2438_v23  ;;  %v3074_v22 = vshll.u32 %v6489_v7, 16  ;;  %v7954_v23 = vld [vmem:[%s9709_s14 + $0x290] sm:$0xff]   ;;  %v3452_v7 = vshrl.u32 %v6574_v60, 16 }
  0x95   : > { %7356 = vmatpush3.bf16.msra.mxu1 %v7921_v24  ;;  %7345 = vmatprep.subr.bf16.mxu0 %v8199_v1  ;;  %v3079_v24 = vshrl.u32 %v7960_v16, 16 }
  0x96   : > { %7357 = vmatprep.subr.bf16.mxu1 %v8199_v1  ;;  %7351 = vmatprep.mubr.msk.bf16.mxu0 %vm8200_vm0, %v8199_v1 }
  0x97   : > { %7363 = vmatprep.mubr.msk.bf16.mxu1 %vm8200_vm0, %v8199_v1 }
  0x98   : > { %7346 = vmatpush3.bf16.msra.mxu0 %v7922_v25  ;;  %v3082_v25 = vshll.u32 %v7960_v16, 16 }
  0x99   : > { %7358 = vmatpush3.bf16.msra.mxu1 %v7923_v26  ;;  %7347 = vmatprep.subr.bf16.mxu0 %v8199_v1  ;;  %v7955_v26 = vld [vmem:[%s9709_s14 + $0x2b0] sm:$0xff]  }
  0x9a   : > { %7359 = vmatprep.subr.bf16.mxu1 %v8199_v1  ;;  %v3084_v31 = vrot.slane %v3082_v25, 2  ;;  %v7987_v25 = vld [vmem:[%s9709_s14 + $0x370] sm:$0xff]  }
  0x9c   : > { %7348 = vmatpush3.bf16.msra.mxu0 %v7924_v27  ;;  %v7956_v27 = vld [vmem:[%s9709_s14 + $0x288] sm:$0xff]  }
  0x9d   : > { %7360 = vmatpush3.bf16.msra.mxu1 %v7925_v28  ;;  %7349 = vmatprep.subr.bf16.mxu0 %v8199_v1  ;;  %v3073_v28 = vrot.slane %v3071_v21, 1  ;;  %v7985_v21 = vld [vmem:[%s9709_s14 + $0x378] sm:$0xff]  }
  0x9e   : > { %7361 = vmatprep.subr.bf16.mxu1 %v8199_v1 }
  0xa0   : > { %7350 = vmatpush3.bf16.msra.mxu0 %v7926_v29  ;;  %v3076_v29 = vrot.slane %v3074_v22, 2  ;;  %v7994_v22 = vld [vmem:[%s8763_s27 + $0x8] ss:$0 sps:$4 sm:$0x33]  }
  0xa1   : > { %7362 = vmatpush3.bf16.msra.mxu1 %v7927_v30  ;;  %7367 = vmatprep.subr.bf16.mxu0 %v8199_v1  ;;  %v3081_v30 = vrot.slane %v3079_v24, 1 }
  0xa2   : > { %7379 = vmatprep.subr.bf16.mxu1 %v8199_v1 }
  0xa3   : > { %7352 = vmatmul.mubr.msk.bf16.vlgmr.msra.gmra.mxu0 %vm1264_vm1, %v7928_v35  ;;  %v3077_v35 = vor.u32 %v3076_v29, %v3073_v28  ;;  %v3619_v29 = vld [vmem:[%s8790_s15] sm:$0xe] }
  0xa4   : > { %7368 = vmatpush3.bf16.msra.mxu0 %v7929_v36  ;;  %7364 = vmatmul.mubr.msk.bf16.vlgmr.msra.gmra.mxu1 %vm1264_vm1, %v7930_v37  ;;  %v3085_v36 = vor.u32 %v3084_v31, %v3081_v30  ;;  %v3329_v37 = vld [vmem:[%s8763_s27] sm:$0xf] }
  0xa5   : > { %7380 = vmatpush3.bf16.msra.mxu1 %v7931_v38  ;;  %7369 = vmatprep.subr.bf16.mxu0 %v8199_v1  ;;  %v8960_v38 = vld [vmem:[%s8763_s27 + $0x4] sm:$0xf]  ;;  %s6228_s27 = sshll.u32 %s1187_s23, 2 }
  0xa6   : > { %7381 = vmatprep.subr.bf16.mxu1 %v8199_v1  ;;  %7375 = vmatprep.mubr.msk.bf16.mxu0 %vm8200_vm0, %v8199_v1  ;;  %v3086_v40 = vsel %vm1773_vm4, %v3077_v35, %v3085_v36  ;;  %v6589_v11 = vcombine.low %v3533_v5, %v8960_v38  ;;  %s9142_s17 = scalar_lea.vmem %s9707_s12, %s6228_s27  ;;  %s9150_s18 = scalar_lea.vmem %s9708_s13, %s6228_s27  ;;  %v7998_v5 = vld [vmem:[%s9709_s14 + $0x388] sm:$0xff]  }
  0xa7   : > { %7387 = vmatprep.mubr.msk.bf16.mxu1 %vm8200_vm0, %v8199_v1  ;;  %s6927_s27 = sshll.u32 %s5775_s19, 7 }
  0xa8   : > { %7370 = vmatpush3.bf16.msra.mxu0 %v7932_v42  ;;  %v6559_v42 = vcombine.low %v3329_v37, %v8960_v38  ;;  %v3546_v16 = vrot.slane %v6589_v11, 1  ;;  %v7988_v37 = vld [vmem:[%s9709_s14 + $0x348] sm:$0xff]  }
  0xa9   : > { %7382 = vmatpush3.bf16.msra.mxu1 %v7933_v46  ;;  %7371 = vmatprep.subr.bf16.mxu0 %v8199_v1  ;;  %v7989_v38 = vld [vmem:[%s9709_s14 + $0x368] sm:$0xff]  }
  0xaa   : > { %7383 = vmatprep.subr.bf16.mxu1 %v8199_v1  ;;  %v3352_v46 = vshll.u32 %v6559_v42, 16  ;;  %v3350_v51 = vshrl.u32 %v6559_v42, 16 }
  0xac   : > { %7372 = vmatpush3.bf16.msra.mxu0 %v7934_v47  ;;  %v7965_v47 = vld [vmem:[%s9709_s14 + $0x2f0] sm:$0xff]   ;;  %v3354_v52 = vrot.slane %v3352_v46, 1 }
  0xad   : > { %7384 = vmatpush3.bf16.msra.mxu1 %v7935_v48  ;;  %7373 = vmatprep.subr.bf16.mxu0 %v8199_v1  ;;  %v3357_v48 = vshll.u32 %v8970_v43, 16 }
  0xae   : > { %7385 = vmatprep.subr.bf16.mxu1 %v8199_v1 }
  0xaf   : > { %v3359_v54 = vrot.slane %v3357_v48, 1  ;;  %v7990_v48 = vld [vmem:[%s9709_s14 + $0x340] sm:$0xff]  }
  0xb0   : > { %7374 = vmatpush3.bf16.msra.mxu0 %v7936_v55  ;;  %v7969_v55 = vld [vmem:[%s9709_s14 + $0x2e0] sm:$0xff]  }
  0xb1   : > { %7386 = vmatpush3.bf16.msra.mxu1 %v7937_v58  ;;  %7391 = vmatprep.subr.bf16.mxu0 %v8199_v1  ;;  %v3355_v58 = vor.u32 %v3354_v52, %v3350_v51 }
  0xb2   : > { %7403 = vmatprep.subr.bf16.mxu1 %v8199_v1 }
  0xb3   : > { %7376 = vmatmul.mubr.msk.bf16.vlgmr.msra.gmra.mxu0 %vm1264_vm1, %v2712_v61  ;;  %v7971_v61 = vld [vmem:[%s9709_s14 + $0x318] sm:$0xff]  }
  0xb4   : > { %7392 = vmatpush3.bf16.msra.mxu0 %v7940_v62  ;;  %7388 = vmatmul.mubr.msk.bf16.vlgmr.msra.gmra.mxu1 %vm1264_vm1, %v2814_v63  ;;  %v3360_v62 = vsel %vm1402_vm2, %v3355_v58, %v3359_v54  ;;  %v7974_v63 = vld [vmem:[%s9709_s14 + $0x338] sm:$0xff]  }
  0xb5   : > { %7404 = vmatpush3.bf16.msra.mxu1 %v7943_v0  ;;  %7393 = vmatprep.subr.bf16.mxu0 %v8199_v1  ;;  %v9039_v0 = vld [vmem:[%s8790_s15 + $0x8] ss:$0 sps:$4 sm:$0x11]   ;;  %v7993_v54 = vld [vmem:[%s9709_s14 + $0x398] sm:$0xff]  }
  0xb6   : > { %7405 = vmatprep.subr.bf16.mxu1 %v8199_v1  ;;  %7399 = vmatprep.mubr.msk.bf16.mxu0 %vm8200_vm0, %v8199_v1  ;;  %v3459_v9 = vshll.u32 %v9039_v0, 16 }
  0xb7   : > { %7411 = vmatprep.mubr.msk.bf16.mxu1 %vm8200_vm0, %v8199_v1 }
  0xb8   : > { %7394 = vmatpush3.bf16.msra.mxu0 %v7944_v2  ;;  %v3454_v2 = vshll.u32 %v6574_v60, 16  ;;  %v7996_v60 = vld [vmem:[%s9709_s14 + $0x390] sm:$0xff]  }
  0xb9   : > { %7406 = vmatpush3.bf16.msra.mxu1 %v7945_v4  ;;  %7395 = vmatprep.subr.bf16.mxu0 %v8199_v1  ;;  %v7976_v4 = vld [vmem:[%s9709_s14 + $0x330] sm:$0xff]  }
  0xba   : > { %7407 = vmatprep.subr.bf16.mxu1 %v8199_v1 }
  0xbc   : > { %7396 = vmatpush3.bf16.msra.mxu0 %v7946_v6  ;;  %v7977_v6 = vld [vmem:[%s9709_s14 + $0x308] sm:$0xff]  }
  0xbd   : > { %7408 = vmatpush3.bf16.msra.mxu1 %v7947_v8  ;;  %7397 = vmatprep.subr.bf16.mxu0 %v8199_v1  ;;  %v3456_v8 = vrot.slane %v3454_v2, 1 }
  0xbe   : > { %7409 = vmatprep.subr.bf16.mxu1 %v8199_v1 }
  0xbf   : > { %v3457_v13 = vor.u32 %v3456_v8, %v3452_v7  ;;  %v7999_v7 = vld [vmem:[%s9709_s14 + $0x3a8] sm:$0xff]  }
  0xc0   : > { %7398 = vmatpush3.bf16.msra.mxu0 %v7948_v12  ;;  %v7979_v12 = vld [vmem:[%s9709_s14 + $0x300] sm:$0xff]  }
  0xc1   : > { %7410 = vmatpush3.bf16.msra.mxu1 %v7949_v14  ;;  %7415 = vmatprep.subr.bf16.mxu0 %v8199_v1  ;;  %v3461_v14 = vrot.slane %v3459_v9, 1 }
  0xc2   : > { %7427 = vmatprep.subr.bf16.mxu1 %v8199_v1 }
  0xc3   : > { %7400 = vmatmul.mubr.msk.bf16.vlgmr.msra.gmra.mxu0 %vm1264_vm1, %v2900_v17  ;;  %v3547_v17 = vrot.slane %v8970_v43, 1 }
  0xc4   : > { %7416 = vmatpush3.bf16.msra.mxu0 %v7951_v18  ;;  %7412 = vmatmul.mubr.msk.bf16.vlgmr.msra.gmra.mxu1 %vm1264_vm1, %v2986_v19  ;;  %v7983_v18 = vld [vmem:[%s9709_s14 + $0x358] sm:$0xff]   ;;  %v3462_v19 = vsel %vm1402_vm2, %v3457_v13, %v3461_v14  ;;  %v8001_v13 = vld [vmem:[%s9709_s14 + $0x3a0] sm:$0xff]  }
  0xc5   : > { %7428 = vmatpush3.bf16.msra.mxu1 %v7953_v20  ;;  %7417 = vmatprep.subr.bf16.mxu0 %v8199_v1  ;;  %v3548_v20 = vsel %vm1600_vm3, %v3546_v16, %v3547_v17  ;;  %v4079_v14 = vld [vmem:[%s8905_s20] sm:$0xf]  ;;  %v8003_v17 = vld [vmem:[%s9709_s14 + $0x3d8] sm:$0xff]  }
  0xc6   : > { %7429 = vmatprep.subr.bf16.mxu1 %v8199_v1  ;;  %7423 = vmatprep.mubr.msk.bf16.mxu0 %vm8200_vm0, %v8199_v1  ;;  %v8002_v16 = vld [vmem:[%s8894_s16] sm:$0xff]  }
  0xc7   : > { %7435 = vmatprep.mubr.msk.bf16.mxu1 %vm8200_vm0, %v8199_v1 }
  0xc8   : > { %7418 = vmatpush3.bf16.msra.mxu0 %v7954_v23  ;;  %v7986_v23 = vld [vmem:[%s9709_s14 + $0x350] sm:$0xff]  }
  0xc9   : > { %7430 = vmatpush3.bf16.msra.mxu1 %v7955_v26  ;;  %7419 = vmatprep.subr.bf16.mxu0 %v8199_v1  ;;  %v3719_v26 = vshrl.u32 %v6589_v11, 16 }
  0xca   : > { %7431 = vmatprep.subr.bf16.mxu1 %v8199_v1 }
  0xcc   : > { %7420 = vmatpush3.bf16.msra.mxu0 %v7956_v27  ;;  %v3722_v27 = vshll.u32 %v6589_v11, 16  ;;  %v3977_v11 = vld [vmem:[%s8894_s16] sm:$0xf] }
  0xcd   : > { %7432 = vmatpush3.bf16.msra.mxu1 %v7957_v32  ;;  %7421 = vmatprep.subr.bf16.mxu0 %v8199_v1  ;;  %v3727_v32 = vshrl.u32 %v7994_v22, 16 }
  0xce   : > { %7433 = vmatprep.subr.bf16.mxu1 %v8199_v1 }
  0xd0   : > { %7422 = vmatpush3.bf16.msra.mxu0 %v7958_v33  ;;  %v3730_v33 = vshll.u32 %v7994_v22, 16 }
  0xd1   : > { %7434 = vmatpush3.bf16.msra.mxu1 %v7959_v34  ;;  %7439 = vmatprep.subr.bf16.mxu0 %v8199_v1 }
  0xd2   : > { %7451 = vmatprep.subr.bf16.mxu1 %v8199_v1 }
  0xd3   : > { %7424 = vmatmul.mubr.msk.bf16.vlgmr.msra.gmra.mxu0 %vm1264_vm1, %v3086_v40  ;;  %v3721_v40 = vrot.slane %v3719_v26, 1 }
  0xd4   : > { %7440 = vmatpush3.bf16.msra.mxu0 %v7961_v39  ;;  %7436 = vmatmul.mubr.msk.bf16.vlgmr.msra.gmra.mxu1 %vm1264_vm1, %v7962_v41  ;;  %v6603_v39 = vcombine.low %v3619_v29, %v9017_v57  ;;  %v3724_v41 = vrot.slane %v3722_v27, 2  ;;  %v9201_v27 = vld [vmem:[%s8905_s20 + $0x8] ss:$0 sps:$4 sm:$0x11]  }
  0xd5   : > { %7452 = vmatpush3.bf16.msra.mxu1 %v7963_v44  ;;  %7441 = vmatprep.subr.bf16.mxu0 %v8199_v1  ;;  %v3729_v44 = vrot.slane %v3727_v32, 1 }
  0xd6   : > { %7453 = vmatprep.subr.bf16.mxu1 %v8199_v1  ;;  %7447 = vmatprep.mubr.msk.bf16.mxu0 %vm8200_vm0, %v8199_v1  ;;  %v3725_v51 = vor.u32 %v3724_v41, %v3721_v40 }
  0xd7   : > { %7459 = vmatprep.mubr.msk.bf16.mxu1 %vm8200_vm0, %v8199_v1 }
  0xd8   : > { %7442 = vmatpush3.bf16.msra.mxu0 %v7964_v45  ;;  %v3732_v45 = vrot.slane %v3730_v33, 2 }
  0xd9   : > { %7454 = vmatpush3.bf16.msra.mxu1 %v7965_v47  ;;  %7443 = vmatprep.subr.bf16.mxu0 %v8199_v1  ;;  %v3633_v47 = vrot.slane %v9039_v0, 1 }
  0xda   : > { %7455 = vmatprep.subr.bf16.mxu1 %v8199_v1  ;;  %v3733_v52 = vor.u32 %v3732_v45, %v3729_v44  ;;  %v4107_v45 = vshll.u32 %v9201_v27, 16 }
  0xdc   : > { %7444 = vmatpush3.bf16.msra.mxu0 %v7966_v49  ;;  %v3632_v49 = vrot.slane %v6603_v39, 1 }
  0xdd   : > { %7456 = vmatpush3.bf16.msra.mxu1 %v7967_v50  ;;  %7445 = vmatprep.subr.bf16.mxu0 %v8199_v1  ;;  %v7991_v50 = vld [vmem:[%s9709_s14 + $0x360] sm:$0xff]  }
  0xde   : > { %7457 = vmatprep.subr.bf16.mxu1 %v8199_v1 }
  0xe0   : > { %7446 = vmatpush3.bf16.msra.mxu0 %v7968_v53  ;;  %v3634_v53 = vsel %vm1600_vm3, %v3632_v49, %v3633_v47 }
  0xe1   : > { %7458 = vmatpush3.bf16.msra.mxu1 %v7969_v55  ;;  %7463 = vmatprep.subr.bf16.mxu0 %v8199_v1  ;;  %v3734_v55 = vsel %vm1773_vm4, %v3725_v51, %v3733_v52  ;;  %v8011_v51 = vld [vmem:[%s9709_s14 + $0x3e0] sm:$0xff]  }
  0xe2   : > { %7475 = vmatprep.subr.bf16.mxu1 %v8199_v1 }
  0xe3   : > { %7448 = vmatmul.mubr.msk.bf16.vlgmr.msra.gmra.mxu0 %vm1264_vm1, %v7970_v59 }
  0xe4   : > { %7464 = vmatpush3.bf16.msra.mxu0 %v7971_v61  ;;  %7460 = vmatmul.mubr.msk.bf16.vlgmr.msra.gmra.mxu1 %vm1264_vm1, %v3360_v62  ;;  %v7997_v62 = vld [vmem:[%s9709_s14 + $0x3b0] sm:$0xff]  }
  0xe5   : > { %7476 = vmatpush3.bf16.msra.mxu1 %v7974_v63  ;;  %7465 = vmatprep.subr.bf16.mxu0 %v8199_v1 }
  0xe6   : > { %7477 = vmatprep.subr.bf16.mxu1 %v8199_v1  ;;  %7471 = vmatprep.mubr.msk.bf16.mxu0 %vm8200_vm0, %v8199_v1 }
  0xe7   : > { %7483 = vmatprep.mubr.msk.bf16.mxu1 %vm8200_vm0, %v8199_v1 }
  0xe8   : > { %7466 = vmatpush3.bf16.msra.mxu0 %v7975_v3 }
  0xe9   : > { %7478 = vmatpush3.bf16.msra.mxu1 %v7976_v4  ;;  %7467 = vmatprep.subr.bf16.mxu0 %v8199_v1 }
  0xea   : > { %7479 = vmatprep.subr.bf16.mxu1 %v8199_v1 }
  0xec   : > { %7468 = vmatpush3.bf16.msra.mxu0 %v7977_v6 }
  0xed   : > { %7480 = vmatpush3.bf16.msra.mxu1 %v7978_v10  ;;  %7469 = vmatprep.subr.bf16.mxu0 %v8199_v1  ;;  %v8000_v10 = vld [vmem:[%s9709_s14 + $0x380] sm:$0xff]  }
  0xee   : > { %7481 = vmatprep.subr.bf16.mxu1 %v8199_v1 }
  0xf0   : > { %7470 = vmatpush3.bf16.msra.mxu0 %v7979_v12  ;;  %v9167_v12 = vld [vmem:[%s8894_s16 + $0x4] sm:$0xf] }
  0xf1   : > { %7482 = vmatpush3.bf16.msra.mxu1 %v7980_v15  ;;  %7487 = vmatprep.subr.bf16.mxu0 %v8199_v1  ;;  %v9175_v15 = vld [vmem:[%s8905_s20 + $0x4] sm:$0xf] }
  0xf2   : > { %7499 = vmatprep.subr.bf16.mxu1 %v8199_v1  ;;  %v6674_v22 = vcombine.low %v4079_v14, %v9175_v15 }
  0xf3   : > { %v1302_v24 = vpop.f32.mrf.mxu0  ;;  %7472 = vmatmul.mubr.msk.bf16.vlgmr.msra.gmra.mxu0 %vm1264_vm1, %v3462_v19  ;;  %v8004_v19 = vld [vmem:[%s8905_s20] sm:$0xff]  }
  0xf4   : > { %v1375_v28 = vpop.f32.mrf.mxu1  ;;  %7488 = vmatpush3.bf16.msra.mxu0 %v7983_v18  ;;  %7484 = vmatmul.mubr.msk.bf16.vlgmr.msra.gmra.mxu1 %vm1264_vm1, %v3548_v20  ;;  %v6659_v18 = vcombine.low %v3977_v11, %v9167_v12  ;;  %v8005_v20 = vld [vmem:[%s9709_s14 + $0x3f8] sm:$0xff]   ;;  %v4102_v32 = vshll.u32 %v6674_v22, 16  ;;  %v8021_v11 = vld [vmem:[%s9709_s14 + $0x428] sm:$0xff]  }
  0xf5   : > { %v1376_v30 = vadd.f32 %v1375_v28, %v1302_v24  ;;  %v7185_v31 = vpop.f32.mrf.mxu0  ;;  %7500 = vmatpush3.bf16.msra.mxu1 %v7985_v21  ;;  %7489 = vmatprep.subr.bf16.mxu0 %v8199_v1  ;;  %v9189_v21 = vld [vmem:[%s8894_s16 + $0x8] ss:$0 sps:$4 sm:$0x11]  }
  0xf6   : > { %v7197_v34 = vpop.f32.mrf.mxu1  ;;  %7501 = vmatprep.subr.bf16.mxu1 %v8199_v1  ;;  %7495 = vmatprep.mubr.msk.bf16.mxu0 %vm8200_vm0, %v8199_v1  ;;  %v4000_v26 = vshll.u32 %v6659_v18, 16  ;;  %v3998_v31 = vshrl.u32 %v6659_v18, 16  ;;  %v4104_v44 = vrot.slane %v4102_v32, 1  ;;  %v4195_v18 = vrot.slane %v9189_v21, 1 }
  0xf7   : > { %v1305_v35 = vpop.f32.mrf.mxu0  ;;  %7507 = vmatprep.mubr.msk.bf16.mxu1 %vm8200_vm0, %v8199_v1 }
  0xf8   : > { %v1378_v36 = vpop.f32.mrf.mxu1  ;;  %7490 = vmatpush3.bf16.msra.mxu0 %v7986_v23  ;;  %v8006_v23 = vld [vmem:[%s9709_s14 + $0x3d0] sm:$0xff]  }
  0xf9   : > { %v1379_v42 = vadd.f32 %v1378_v36, %v1305_v35  ;;  %v7186_v43 = vpop.f32.mrf.mxu0  ;;  %7502 = vmatpush3.bf16.msra.mxu1 %v7987_v25  ;;  %7491 = vmatprep.subr.bf16.mxu0 %v8199_v1  ;;  %v8007_v25 = vld [vmem:[%s9709_s14 + $0x3f0] sm:$0xff]   ;;  %v8008_v35 = vld [vmem:[%s9709_s14 + $0x3c8] sm:$0xff]  }
  0xfa   : > { %7503 = vmatprep.subr.bf16.mxu1 %v8199_v1  ;;  %v7198_v46 = vpop.f32.mrf.mxu1  ;;  %v4100_v43 = vshrl.u32 %v6674_v22, 16 }
  0xfc   : > { %7492 = vmatpush3.bf16.msra.mxu0 %v7988_v37  ;;  %v4002_v37 = vrot.slane %v4000_v26, 1  ;;  %v4105_v52 = vor.u32 %v4104_v44, %v4100_v43 }
  0xfd   : > { %7504 = vmatpush3.bf16.msra.mxu1 %v7989_v38  ;;  %7493 = vmatprep.subr.bf16.mxu0 %v8199_v1  ;;  %v4005_v38 = vshll.u32 %v9189_v21, 16  ;;  %v8034_v21 = vld [vmem:[%s8894_s16 + $0x8] ss:$0 sps:$4 sm:$0x33]  }
  0xfe   : > { %7505 = vmatprep.subr.bf16.mxu1 %v8199_v1  ;;  %v4003_v49 = vor.u32 %v4002_v37, %v3998_v31  ;;  %v4375_v32 = vshrl.u32 %v8034_v21, 16 }
 0x100   : > { %7494 = vmatpush3.bf16.msra.mxu0 %v7990_v48  ;;  %v8010_v48 = vld [vmem:[%s9709_s14 + $0x3c0] sm:$0xff]   ;;  %v4377_v44 = vrot.slane %v4375_v32, 1 }
 0x101   : > { %7506 = vmatpush3.bf16.msra.mxu1 %v7991_v50  ;;  %7511 = vmatprep.subr.bf16.mxu0 %v8199_v1  ;;  %v4007_v50 = vrot.slane %v4005_v38, 1 }
 0x102   : > { %7523 = vmatprep.subr.bf16.mxu1 %v8199_v1 }
 0x103   : > { %v1476_v57 = vpop.f32.mrf.mxu0  ;;  %7496 = vmatmul.mubr.msk.bf16.vlgmr.msra.gmra.mxu0 %vm1264_vm1, %v3634_v53  ;;  %v4109_v53 = vrot.slane %v4107_v45, 1 }
 0x104   : > { %v1483_v58 = vadd.f32 %v1476_v57, %v1376_v30  ;;  %7512 = vmatpush3.bf16.msra.mxu0 %v7993_v54  ;;  %v1578_v59 = vpop.f32.mrf.mxu1  ;;  %7508 = vmatmul.mubr.msk.bf16.vlgmr.msra.gmra.mxu1 %vm1264_vm1, %v3734_v55  ;;  %v4008_v54 = vsel %vm1402_vm2, %v4003_v49, %v4007_v50  ;;  %v8014_v55 = vld [vmem:[%s9709_s14 + $0x418] sm:$0xff]   ;;  %v8032_v50 = vld [vmem:[%s9709_s14 + $0x440] sm:$0xff]  }
 0x105   : > { %v7209_v61 = vpop.f32.mrf.mxu0  ;;  %7524 = vmatpush3.bf16.msra.mxu1 %v7995_v56  ;;  %7513 = vmatprep.subr.bf16.mxu0 %v8199_v1  ;;  %v4110_v56 = vsel %vm1402_vm2, %v4105_v52, %v4109_v53  ;;  %v8017_v57 = vld [vmem:[%s9709_s14 + $0x438] sm:$0xff]   ;;  %v8033_v53 = vld [vmem:[%s9709_s14 + $0x460] sm:$0xff]  }
 0x106   : > { %v1585_v63 = vadd.f32 %v1578_v59, %v1483_v58  ;;  %v7221_v0 = vpop.f32.mrf.mxu1  ;;  %7525 = vmatprep.subr.bf16.mxu1 %v8199_v1  ;;  %7519 = vmatprep.mubr.msk.bf16.mxu0 %vm8200_vm0, %v8199_v1  ;;  %v8018_v61 = vld [vmem:[%s9709_s14 + $0x410] sm:$0xff]  }
 0x107   : > { %v1479_v2 = vpop.f32.mrf.mxu0  ;;  %7531 = vmatprep.mubr.msk.bf16.mxu1 %vm8200_vm0, %v8199_v1  ;;  %v4181_v0 = vld [vmem:[%s8894_s16] sm:$0xe] }
 0x108   : > { %v1484_v3 = vadd.f32 %v1479_v2, %v1379_v42  ;;  %7514 = vmatpush3.bf16.msra.mxu0 %v7996_v60  ;;  %v1581_v4 = vpop.f32.mrf.mxu1  ;;  %v8009_v42 = vld [vmem:[%s9709_s14 + $0x3e8] sm:$0xff]  }
 0x109   : > { %v7210_v6 = vpop.f32.mrf.mxu0  ;;  %7526 = vmatpush3.bf16.msra.mxu1 %v7997_v62  ;;  %7515 = vmatprep.subr.bf16.mxu0 %v8199_v1 }
 0x10a   : > { %v1586_v8 = vadd.f32 %v1581_v4, %v1484_v3  ;;  %7527 = vmatprep.subr.bf16.mxu1 %v8199_v1  ;;  %v7222_v9 = vpop.f32.mrf.mxu1  ;;  %v4267_v4 = vld [vmem:[%s8905_s20] sm:$0xe]  ;;  %s1024_s20 = sand.u32 1, %s8173_s22  }
 0x10b   : > { %v6689_v9 = vcombine.low %v4181_v0, %v9167_v12  ;;  %v8022_v12 = vld [vmem:[%s9709_s14 + $0x400] sm:$0xff]   ;;  %v8038_v0 = vld [vmem:[%s9709_s14 + $0x490] sm:$0xff]   ;;  %s6202_s23 = sshll.u32 %s1024_s20, 4  ;;  %s9644_s21 = scalar_lea.sflag [#allocation3], %s1024_s20 }
 0x10c   : > { %7516 = vmatpush3.bf16.msra.mxu0 %v7998_v5  ;;  %s1026_s16 = scalar_lea.vmem [#allocation2], %s6202_s23 }
 0x10d   : > { %7528 = vmatpush3.bf16.msra.mxu1 %v7999_v7  ;;  %7517 = vmatprep.subr.bf16.mxu0 %v8199_v1  ;;  %v4370_v31 = vshll.u32 %v6689_v9, 16 }
 0x10e   : > { %7529 = vmatprep.subr.bf16.mxu1 %v8199_v1 }
 0x10f   : > { %v4372_v43 = vrot.slane %v4370_v31, 2 }
 0x110   : > { %7518 = vmatpush3.bf16.msra.mxu0 %v8000_v10 }
 0x111   : > { %7530 = vmatpush3.bf16.msra.mxu1 %v8001_v13  ;;  %7535 = vmatprep.subr.bf16.mxu0 %v8199_v1  ;;  %v6703_v13 = vcombine.low %v4267_v4, %v9175_v15  ;;  %v8023_v15 = vld [vmem:[%s9709_s14 + $0x420] sm:$0xff]   ;;  %v9340_v4 = vld [vmem:[%s9005_s0 + $0x8] ss:$0 sps:$4 sm:$0x11]  }
 0x112   : > { %7547 = vmatprep.subr.bf16.mxu1 %v8199_v1 }
 0x113   : > { %v1665_v24 = vpop.f32.mrf.mxu0  ;;  %7520 = vmatmul.mubr.msk.bf16.vlgmr.msra.gmra.mxu0 %vm1264_vm1, %v8002_v16 }
 0x114   : > { %v1672_v28 = vadd.f32 %v1665_v24, %v1585_v63  ;;  %7536 = vmatpush3.bf16.msra.mxu0 %v8003_v17  ;;  %v1751_v29 = vpop.f32.mrf.mxu1  ;;  %7532 = vmatmul.mubr.msk.bf16.vlgmr.msra.gmra.mxu1 %vm1264_vm1, %v8004_v19  ;;  %v8019_v63 = vld [vmem:[%s9709_s14 + $0x430] sm:$0xff]   ;;  %v4194_v17 = vrot.slane %v6689_v9, 1  ;;  %v4280_v19 = vrot.slane %v6703_v13, 1 }
 0x115   : > { %v7233_v30 = vpop.f32.mrf.mxu0  ;;  %7548 = vmatpush3.bf16.msra.mxu1 %v8005_v20  ;;  %7537 = vmatprep.subr.bf16.mxu0 %v8199_v1  ;;  %v4281_v20 = vrot.slane %v9201_v27, 1  ;;  %v4367_v27 = vshrl.u32 %v6689_v9, 16 }
 0x116   : > { %v1758_v33 = vadd.f32 %v1751_v29, %v1672_v28  ;;  %v7245_v34 = vpop.f32.mrf.mxu1  ;;  %7549 = vmatprep.subr.bf16.mxu1 %v8199_v1  ;;  %7543 = vmatprep.mubr.msk.bf16.mxu0 %vm8200_vm0, %v8199_v1  ;;  %v4196_v22 = vsel %vm1600_vm3, %v4194_v17, %v4195_v18  ;;  %v8028_v30 = vld [vmem:[%s9709_s14 + $0x450] sm:$0xff]   ;;  %v4653_v17 = vshll.u32 %v9340_v4, 16 }
 0x117   : > { %v1668_v36 = vpop.f32.mrf.mxu0  ;;  %7555 = vmatprep.mubr.msk.bf16.mxu1 %vm8200_vm0, %v8199_v1  ;;  %v4282_v24 = vsel %vm1600_vm3, %v4280_v19, %v4281_v20  ;;  %v8042_v19 = vld [vmem:[%s9709_s14 + $0x480] sm:$0xff]  }
 0x118   : > { %v1673_v39 = vadd.f32 %v1668_v36, %v1586_v8  ;;  %7538 = vmatpush3.bf16.msra.mxu0 %v8006_v23  ;;  %v1754_v40 = vpop.f32.mrf.mxu1  ;;  %v8020_v8 = vld [vmem:[%s9709_s14 + $0x408] sm:$0xff]   ;;  %v8025_v23 = vld [vmem:[%s9709_s14 + $0x458] sm:$0xff]   ;;  %v8043_v20 = vld [vmem:[%s9709_s14 + $0x4a0] sm:$0xff]  }
 0x119   : > { %v7234_v41 = vpop.f32.mrf.mxu0  ;;  %7550 = vmatpush3.bf16.msra.mxu1 %v8007_v25  ;;  %7539 = vmatprep.subr.bf16.mxu0 %v8199_v1  ;;  %v8027_v25 = vld [vmem:[%s9709_s14 + $0x478] sm:$0xff]  }
 0x11a   : > { %v1759_v46 = vadd.f32 %v1754_v40, %v1673_v39  ;;  %7551 = vmatprep.subr.bf16.mxu1 %v8199_v1  ;;  %v7246_v47 = vpop.f32.mrf.mxu1  ;;  %v4369_v39 = vrot.slane %v4367_v27, 1 }
 0x11b   : > { %v8031_v47 = vld [vmem:[%s9709_s14 + $0x468] sm:$0xff]  }
 0x11c   : > { %7540 = vmatpush3.bf16.msra.mxu0 %v8008_v35  ;;  %v8029_v35 = vld [vmem:[%s9709_s14 + $0x470] sm:$0xff]  }
 0x11d   : > { %7552 = vmatpush3.bf16.msra.mxu1 %v8009_v42  ;;  %7541 = vmatprep.subr.bf16.mxu0 %v8199_v1  ;;  %v8030_v42 = vld [vmem:[%s9709_s14 + $0x448] sm:$0xff]  }
 0x11e   : > { %7553 = vmatprep.subr.bf16.mxu1 %v8199_v1 }
 0x120   : > { %7542 = vmatpush3.bf16.msra.mxu0 %v8010_v48 }
 0x121   : > { %7554 = vmatpush3.bf16.msra.mxu1 %v8011_v51  ;;  %7559 = vmatprep.subr.bf16.mxu0 %v8199_v1  ;;  %v4373_v51 = vor.u32 %v4372_v43, %v4369_v39 }
 0x122   : > { %7571 = vmatprep.subr.bf16.mxu1 %v8199_v1 }
 0x123   : > { %v1852_v58 = vpop.f32.mrf.mxu0  ;;  %7544 = vmatmul.mubr.msk.bf16.vlgmr.msra.gmra.mxu0 %vm1264_vm1, %v4008_v54  ;;  %v4625_v54 = vld [vmem:[%s9005_s0] sm:$0xf] }
 0x124   : > { %v1859_v59 = vadd.f32 %v1852_v58, %v1758_v33  ;;  %7560 = vmatpush3.bf16.msra.mxu0 %v8014_v55  ;;  %v1938_v60 = vpop.f32.mrf.mxu1  ;;  %7556 = vmatmul.mubr.msk.bf16.vlgmr.msra.gmra.mxu1 %vm1264_vm1, %v4110_v56  ;;  %v4378_v33 = vshll.u32 %v8034_v21, 16  ;;  %v9317_v55 = vld [vmem:[%s9005_s0 + $0x4] sm:$0xf]  ;;  %v4727_v21 = vld [vmem:[%s9029_s29] sm:$0xf] }
 0x125   : > { %v7257_v62 = vpop.f32.mrf.mxu0  ;;  %7572 = vmatpush3.bf16.msra.mxu1 %v8017_v57  ;;  %7561 = vmatprep.subr.bf16.mxu0 %v8199_v1  ;;  %v8035_v57 = vld [vmem:[%s9709_s14 + $0x498] sm:$0xff]   ;;  %v8036_v58 = vld [vmem:[%s9005_s0] sm:$0xff]  }
 0x126   : > { %v1945_v2 = vadd.f32 %v1938_v60, %v1859_v59  ;;  %v7269_v3 = vpop.f32.mrf.mxu1  ;;  %7573 = vmatprep.subr.bf16.mxu1 %v8199_v1  ;;  %7567 = vmatprep.mubr.msk.bf16.mxu0 %vm8200_vm0, %v8199_v1  ;;  %v4380_v45 = vrot.slane %v4378_v33, 2  ;;  %v8037_v59 = vld [vmem:[%s9709_s14 + $0x4b8] sm:$0xff]   ;;  %v6759_v60 = vcombine.low %v4625_v54, %v9317_v55  ;;  %v8049_v33 = vld [vmem:[%s9709_s14 + $0x4d0] sm:$0xff]  }
 0x127   : > { %v1855_v5 = vpop.f32.mrf.mxu0  ;;  %7579 = vmatprep.mubr.msk.bf16.mxu1 %vm8200_vm0, %v8199_v1  ;;  %v8039_v3 = vld [vmem:[%s9709_s14 + $0x4b0] sm:$0xff]  }
 0x128   : > { %v1860_v6 = vadd.f32 %v1855_v5, %v1759_v46  ;;  %7562 = vmatpush3.bf16.msra.mxu0 %v8018_v61  ;;  %v1941_v7 = vpop.f32.mrf.mxu1  ;;  %v4381_v52 = vor.u32 %v4380_v45, %v4377_v44  ;;  %v4648_v5 = vshll.u32 %v6759_v60, 16  ;;  %v8051_v44 = vld [vmem:[%s9709_s14 + $0x4c8] sm:$0xff]  }
 0x129   : > { %v7258_v10 = vpop.f32.mrf.mxu0  ;;  %7574 = vmatpush3.bf16.msra.mxu1 %v8019_v63  ;;  %7563 = vmatprep.subr.bf16.mxu0 %v8199_v1 }
 0x12a   : > { %v1946_v14 = vadd.f32 %v1941_v7, %v1860_v6  ;;  %7575 = vmatprep.subr.bf16.mxu1 %v8199_v1  ;;  %v7270_v16 = vpop.f32.mrf.mxu1  ;;  %v4382_v56 = vsel %vm1773_vm4, %v4373_v51, %v4381_v52 }
 0x12b   : > { %v4646_v16 = vshrl.u32 %v6759_v60, 16  ;;  %v8057_v60 = vld [vmem:[%s9709_s14 + $0x518] sm:$0xff]  }
 0x12c   : > { %7564 = vmatpush3.bf16.msra.mxu0 %v8020_v8 }
 0x12d   : > { %7576 = vmatpush3.bf16.msra.mxu1 %v8021_v11  ;;  %7565 = vmatprep.subr.bf16.mxu0 %v8199_v1  ;;  %v8040_v11 = vld [vmem:[%s9709_s14 + $0x488] sm:$0xff]  }
 0x12e   : > { %7577 = vmatprep.subr.bf16.mxu1 %v8199_v1 }
 0x130   : > { %7566 = vmatpush3.bf16.msra.mxu0 %v8022_v12  ;;  %v4650_v12 = vrot.slane %v4648_v5, 1  ;;  %v8061_v5 = vld [vmem:[%s9709_s14 + $0x530] sm:$0xff]  }
 0x131   : > { %7578 = vmatpush3.bf16.msra.mxu1 %v8023_v15  ;;  %7583 = vmatprep.subr.bf16.mxu0 %v8199_v1 }
 0x132   : > { %7595 = vmatprep.subr.bf16.mxu1 %v8199_v1 }
 0x133   : > { %v2024_v26 = vpop.f32.mrf.mxu0  ;;  %7568 = vmatmul.mubr.msk.bf16.vlgmr.msra.gmra.mxu0 %vm1264_vm1, %v4196_v22  ;;  %v4651_v22 = vor.u32 %v4650_v12, %v4646_v16 }
 0x134   : > { %v2031_v28 = vadd.f32 %v2024_v26, %v1945_v2  ;;  %7584 = vmatpush3.bf16.msra.mxu0 %v8025_v23  ;;  %v2126_v29 = vpop.f32.mrf.mxu1  ;;  %7580 = vmatmul.mubr.msk.bf16.vlgmr.msra.gmra.mxu1 %vm1264_vm1, %v4282_v24  ;;  %v4655_v23 = vrot.slane %v4653_v17, 1  ;;  %v9365_v24 = vld [vmem:[%s9029_s29 + $0x4] sm:$0xf]  ;;  %v8045_v26 = vld [vmem:[%s9709_s14 + $0x4d8] sm:$0xff]  }
 0x135   : > { %v7281_v34 = vpop.f32.mrf.mxu0  ;;  %7596 = vmatpush3.bf16.msra.mxu1 %v8027_v25  ;;  %7585 = vmatprep.subr.bf16.mxu0 %v8199_v1  ;;  %v8044_v25 = vld [vmem:[%s9029_s29] sm:$0xff]   ;;  %v6774_v27 = vcombine.low %v4727_v21, %v9365_v24 }
 0x136   : > { %v2133_v36 = vadd.f32 %v2126_v29, %v2031_v28  ;;  %v7293_v37 = vpop.f32.mrf.mxu1  ;;  %7597 = vmatprep.subr.bf16.mxu1 %v8199_v1  ;;  %7591 = vmatprep.mubr.msk.bf16.mxu0 %vm8200_vm0, %v8199_v1  ;;  %v4656_v28 = vsel %vm1402_vm2, %v4651_v22, %v4655_v23  ;;  %v8048_v29 = vld [vmem:[%s9709_s14 + $0x4f8] sm:$0xff]   ;;  %v9385_v34 = vld [vmem:[%s9029_s29 + $0x8] ss:$0 sps:$4 sm:$0x11]  }
 0x137   : > { %v2027_v38 = vpop.f32.mrf.mxu0  ;;  %7603 = vmatprep.mubr.msk.bf16.mxu1 %vm8200_vm0, %v8199_v1  ;;  %v8050_v37 = vld [vmem:[%s9709_s14 + $0x4f0] sm:$0xff]   ;;  %v4748_v45 = vshrl.u32 %v6774_v27, 16 }
 0x138   : > { %v2032_v40 = vadd.f32 %v2027_v38, %v1946_v14  ;;  %7586 = vmatpush3.bf16.msra.mxu0 %v8028_v30  ;;  %v2129_v41 = vpop.f32.mrf.mxu1  ;;  %v8041_v14 = vld [vmem:[%s9709_s14 + $0x4a8] sm:$0xff]  }
 0x139   : > { %v7282_v46 = vpop.f32.mrf.mxu0  ;;  %7598 = vmatpush3.bf16.msra.mxu1 %v8029_v35  ;;  %7587 = vmatprep.subr.bf16.mxu0 %v8199_v1  ;;  %v4750_v35 = vshll.u32 %v6774_v27, 16 }
 0x13a   : > { %v2134_v48 = vadd.f32 %v2129_v41, %v2032_v40  ;;  %7599 = vmatprep.subr.bf16.mxu1 %v8199_v1  ;;  %v7294_v49 = vpop.f32.mrf.mxu1  ;;  %v4829_v40 = vld [vmem:[%s9005_s0] sm:$0xe] }
 0x13b   : > { %v4752_v46 = vrot.slane %v4750_v35, 1  ;;  %v8052_v49 = vld [vmem:[%s9709_s14 + $0x4e8] sm:$0xff]   ;;  %v8067_v35 = vld [vmem:[%s9709_s14 + $0x558] sm:$0xff]  }
 0x13c   : > { %7588 = vmatpush3.bf16.msra.mxu0 %v8030_v42 }
 0x13d   : > { %7600 = vmatpush3.bf16.msra.mxu1 %v8031_v47  ;;  %7589 = vmatprep.subr.bf16.mxu0 %v8199_v1  ;;  %v4755_v47 = vshll.u32 %v9385_v34, 16  ;;  %v4753_v54 = vor.u32 %v4752_v46, %v4748_v45 }
 0x13e   : > { %7601 = vmatprep.subr.bf16.mxu1 %v8199_v1 }
 0x140   : > { %7590 = vmatpush3.bf16.msra.mxu0 %v8032_v50  ;;  %v6789_v50 = vcombine.low %v4829_v40, %v9317_v55  ;;  %v8070_v40 = vld [vmem:[%s9709_s14 + $0x550] sm:$0xff]  }
 0x141   : > { %7602 = vmatpush3.bf16.msra.mxu1 %v8033_v53  ;;  %7607 = vmatprep.subr.bf16.mxu0 %v8199_v1  ;;  %v8053_v53 = vld [vmem:[%s9709_s14 + $0x4c0] sm:$0xff]  }
 0x142   : > { %7619 = vmatprep.subr.bf16.mxu1 %v8199_v1  ;;  %v4842_v55 = vrot.slane %v6789_v50, 1 }
 0x143   : > { %v2228_v61 = vpop.f32.mrf.mxu0  ;;  %7592 = vmatmul.mubr.msk.bf16.vlgmr.msra.gmra.mxu0 %vm1264_vm1, %v4382_v56  ;;  %v4757_v56 = vrot.slane %v4755_v47, 1 }
 0x144   : > { %v2235_v62 = vadd.f32 %v2228_v61, %v2133_v36  ;;  %7608 = vmatpush3.bf16.msra.mxu0 %v8035_v57  ;;  %v2314_v63 = vpop.f32.mrf.mxu1  ;;  %7604 = vmatmul.mubr.msk.bf16.vlgmr.msra.gmra.mxu1 %vm1264_vm1, %v8036_v58  ;;  %v8054_v57 = vld [vmem:[%s9709_s14 + $0x4e0] sm:$0xff]   ;;  %v4843_v58 = vrot.slane %v9340_v4, 1  ;;  %v8060_v4 = vld [vmem:[%s9709_s14 + $0x510] sm:$0xff]  }
 0x145   : > { %v7305_v2 = vpop.f32.mrf.mxu0  ;;  %7620 = vmatpush3.bf16.msra.mxu1 %v8037_v59  ;;  %7609 = vmatprep.subr.bf16.mxu0 %v8199_v1  ;;  %v4758_v59 = vsel %vm1402_vm2, %v4753_v54, %v4757_v56  ;;  %v8075_v54 = vld [vmem:[%s9709_s14 + $0x560] sm:$0xff]  }
 0x146   : > { %v2321_v6 = vadd.f32 %v2314_v63, %v2235_v62  ;;  %v7317_v7 = vpop.f32.mrf.mxu1  ;;  %7621 = vmatprep.subr.bf16.mxu1 %v8199_v1  ;;  %7615 = vmatprep.mubr.msk.bf16.mxu0 %vm8200_vm0, %v8199_v1  ;;  %v4844_v61 = vsel %vm1600_vm3, %v4842_v55, %v4843_v58  ;;  %v8059_v62 = vld [vmem:[%s9709_s14 + $0x538] sm:$0xff]   ;;  %v8068_v63 = vld [vmem:[%s9005_s0 + $0x8] ss:$0 sps:$4 sm:$0x33]   ;;  %v5273_v56 = vld [vmem:[%s9142_s17] sm:$0xf] }
 0x147   : > { %v2231_v8 = vpop.f32.mrf.mxu0  ;;  %7627 = vmatprep.mubr.msk.bf16.mxu1 %vm8200_vm0, %v8199_v1  ;;  %v4915_v7 = vld [vmem:[%s9029_s29] sm:$0xe]  ;;  %v9506_v58 = vld [vmem:[%s9150_s18 + $0x4] sm:$0xf]  ;;  %s9743_s0 = sld [smem:[#allocation17_spill]] }
 0x148   : > { %v2236_v9 = vadd.f32 %v2231_v8, %v2134_v48  ;;  %7610 = vmatpush3.bf16.msra.mxu0 %v8038_v0  ;;  %v2317_v10 = vpop.f32.mrf.mxu1  ;;  %v5015_v8 = vshrl.u32 %v6789_v50, 16  ;;  %v5375_v55 = vld [vmem:[%s9150_s18] sm:$0xf] }
 0x149   : > { %v7306_v13 = vpop.f32.mrf.mxu0  ;;  %7622 = vmatpush3.bf16.msra.mxu1 %v8039_v3  ;;  %7611 = vmatprep.subr.bf16.mxu0 %v8199_v1 }
 0x14a   : > { %v2322_v18 = vadd.f32 %v2317_v10, %v2236_v9  ;;  %7623 = vmatprep.subr.bf16.mxu1 %v8199_v1  ;;  %v7318_v15 = vpop.f32.mrf.mxu1  ;;  %v5018_v9 = vshll.u32 %v6789_v50, 16  ;;  %v5023_v10 = vshrl.u32 %v8068_v63, 16  ;;  %v5017_v22 = vrot.slane %v5015_v8, 1  ;;  %v8073_v50 = vld [vmem:[%s9709_s14 + $0x568] sm:$0xff]  }
 0x14b   : > { %v6803_v15 = vcombine.low %v4915_v7, %v9365_v24  ;;  %v8064_v24 = vld [vmem:[%s9709_s14 + $0x500] sm:$0xff]  }
 0x14c   : > { %7612 = vmatpush3.bf16.msra.mxu0 %v8040_v11  ;;  %v5026_v11 = vshll.u32 %v8068_v63, 16  ;;  %v5020_v23 = vrot.slane %v5018_v9, 2  ;;  %v5025_v21 = vrot.slane %v5023_v10, 1  ;;  %v8079_v63 = vld [vmem:[%s9709_s14 + $0x5b8] sm:$0xff]   ;;  %v8081_v9 = vld [vmem:[%s9709_s14 + $0x5b0] sm:$0xff]  }
 0x14d   : > { %7624 = vmatpush3.bf16.msra.mxu1 %v8041_v14  ;;  %7613 = vmatprep.subr.bf16.mxu0 %v8199_v1  ;;  %v9533_v10 = vld [vmem:[%s9150_s18 + $0x8] ss:$0 sps:$4 sm:$0x11]   ;;  %s9639_s29 = scalar_lea.hbm %s9743_s0, %s6927_s27 }
 0x14e   : > { %7625 = vmatprep.subr.bf16.mxu1 %v8199_v1 }
 0x150   : > { %7614 = vmatpush3.bf16.msra.mxu0 %v8042_v19 }
 0x151   : > { %7626 = vmatpush3.bf16.msra.mxu1 %v8043_v20  ;;  %7631 = vmatprep.subr.bf16.mxu0 %v8199_v1  ;;  %v8063_v20 = vld [vmem:[%s9709_s14 + $0x528] sm:$0xff]  }
 0x152   : > { %7643 = vmatprep.subr.bf16.mxu1 %v8199_v1 }
 0x153   : > { %v2400_v30 = vpop.f32.mrf.mxu0  ;;  %7616 = vmatmul.mubr.msk.bf16.vlgmr.msra.gmra.mxu0 %vm1264_vm1, %v8044_v25  ;;  %v5028_v25 = vrot.slane %v5026_v11, 2 }
 0x154   : > { %v2407_v31 = vadd.f32 %v2400_v30, %v2321_v6  ;;  %7632 = vmatpush3.bf16.msra.mxu0 %v8045_v26  ;;  %v2500_v32 = vpop.f32.mrf.mxu1  ;;  %7628 = vmatmul.mubr.msk.bf16.vlgmr.msra.gmra.mxu1 %vm1264_vm1, %v4656_v28  ;;  %v4928_v28 = vrot.slane %v6803_v15, 1  ;;  %v8065_v30 = vld [vmem:[%s9709_s14 + $0x520] sm:$0xff]  }
 0x155   : > { %v7329_v36 = vpop.f32.mrf.mxu0  ;;  %7644 = vmatpush3.bf16.msra.mxu1 %v8048_v29  ;;  %7633 = vmatprep.subr.bf16.mxu0 %v8199_v1  ;;  %v4929_v29 = vrot.slane %v9385_v34, 1 }
 0x156   : > { %v2507_v38 = vadd.f32 %v2500_v32, %v2407_v31  ;;  %v7341_v39 = vpop.f32.mrf.mxu1  ;;  %7645 = vmatprep.subr.bf16.mxu1 %v8199_v1  ;;  %7639 = vmatprep.mubr.msk.bf16.mxu0 %vm8200_vm0, %v8199_v1  ;;  %v5021_v31 = vor.u32 %v5020_v23, %v5017_v22  ;;  %v5029_v32 = vor.u32 %v5028_v25, %v5025_v21  ;;  %v8069_v36 = vld [vmem:[%s9709_s14 + $0x578] sm:$0xff]   ;;  %v8083_v23 = vld [vmem:[%s9709_s14 + $0x5a8] sm:$0xff]  }
 0x157   : > { %v2403_v41 = vpop.f32.mrf.mxu0  ;;  %7651 = vmatprep.mubr.msk.bf16.mxu1 %vm8200_vm0, %v8199_v1 }
 0x158   : > { %v2408_v42 = vadd.f32 %v2403_v41, %v2322_v18  ;;  %7634 = vmatpush3.bf16.msra.mxu0 %v8049_v33  ;;  %v2503_v43 = vpop.f32.mrf.mxu1  ;;  %v8062_v18 = vld [vmem:[%s9709_s14 + $0x508] sm:$0xff]   ;;  %v4930_v33 = vsel %vm1600_vm3, %v4928_v28, %v4929_v29  ;;  %v5030_v34 = vsel %vm1773_vm4, %v5021_v31, %v5029_v32  ;;  %v8084_v28 = vld [vmem:[%s9709_s14 + $0x580] sm:$0xff]  }
 0x159   : > { %v7330_v48 = vpop.f32.mrf.mxu0  ;;  %7646 = vmatpush3.bf16.msra.mxu1 %v8050_v37  ;;  %7635 = vmatprep.subr.bf16.mxu0 %v8199_v1  ;;  %v8085_v31 = vld [vmem:[%s9709_s14 + $0x5a0] sm:$0xff]  }
 0x15a   : > { %v2508_v51 = vadd.f32 %v2503_v43, %v2408_v42  ;;  %7647 = vmatprep.subr.bf16.mxu1 %v8199_v1  ;;  %v7342_v52 = vpop.f32.mrf.mxu1  ;;  %v8071_v42 = vld [vmem:[%s9709_s14 + $0x570] sm:$0xff]   ;;  %v8072_v48 = vld [vmem:[%s9709_s14 + $0x548] sm:$0xff]  }
 0x15c   : > { %7636 = vmatpush3.bf16.msra.mxu0 %v8051_v44 }
 0x15d   : > { %7648 = vmatpush3.bf16.msra.mxu1 %v8052_v49  ;;  %7637 = vmatprep.subr.bf16.mxu0 %v8199_v1 }
 0x15e   : > { %7649 = vmatprep.subr.bf16.mxu1 %v8199_v1 }
 0x160   : > { %7638 = vmatpush3.bf16.msra.mxu0 %v8053_v53  ;;  %v8074_v53 = vld [vmem:[%s9709_s14 + $0x540] sm:$0xff]  }
 0x161   : > { %7650 = vmatpush3.bf16.msra.mxu1 %v8054_v57  ;;  %7655 = vmatprep.subr.bf16.mxu0 %v8199_v1  ;;  %v9501_v57 = vld [vmem:[%s9142_s17 + $0x4] sm:$0xf] }
 0x162   : > { %7667 = vmatprep.subr.bf16.mxu1 %v8199_v1 }
 0x163   : > { %v2586_v0 = vpop.f32.mrf.mxu0  ;;  %7640 = vmatmul.mubr.msk.bf16.vlgmr.msra.gmra.mxu0 %vm1264_vm1, %v4758_v59  ;;  %v8076_v59 = vld [vmem:[%s9142_s17] sm:$0xff]  }
 0x164   : > { %v2593_v2 = vadd.f32 %v2586_v0, %v2507_v38  ;;  %7656 = vmatpush3.bf16.msra.mxu0 %v8057_v60  ;;  %v2672_v3 = vpop.f32.mrf.mxu1  ;;  %7652 = vmatmul.mubr.msk.bf16.vlgmr.msra.gmra.mxu1 %vm1264_vm1, %v4844_v61  ;;  %v8077_v60 = vld [vmem:[%s9709_s14 + $0x598] sm:$0xff]   ;;  %v8078_v61 = vld [vmem:[%s9150_s18] sm:$0xff]   ;;  %v6874_v0 = vcombine.low %v5375_v55, %v9506_v58 }
 0x165   : > { %v7353_v6 = vpop.f32.mrf.mxu0  ;;  %7668 = vmatpush3.bf16.msra.mxu1 %v8059_v62  ;;  %7657 = vmatprep.subr.bf16.mxu0 %v8199_v1  ;;  %v6859_v62 = vcombine.low %v5273_v56, %v9501_v57 }
 0x166   : > { %v2679_v13 = vadd.f32 %v2672_v3, %v2593_v2  ;;  %v7365_v14 = vpop.f32.mrf.mxu1  ;;  %7669 = vmatprep.subr.bf16.mxu1 %v8199_v1  ;;  %7663 = vmatprep.mubr.msk.bf16.mxu0 %vm8200_vm0, %v8199_v1  ;;  %v9526_v6 = vld [vmem:[%s9142_s17 + $0x8] ss:$0 sps:$4 sm:$0x11]   ;;  %v5398_v11 = vshll.u32 %v6874_v0, 16  ;;  %v5396_v21 = vshrl.u32 %v6874_v0, 16 }
 0x167   : > { %v2589_v16 = vpop.f32.mrf.mxu0  ;;  %7675 = vmatprep.mubr.msk.bf16.mxu1 %vm8200_vm0, %v8199_v1  ;;  %v5296_v7 = vshll.u32 %v6859_v62, 16  ;;  %v5294_v15 = vshrl.u32 %v6859_v62, 16 }
 0x168   : > { %v2594_v12 = vadd.f32 %v2589_v16, %v2508_v51  ;;  %7658 = vmatpush3.bf16.msra.mxu0 %v8060_v4  ;;  %v2675_v17 = vpop.f32.mrf.mxu1  ;;  %v5400_v25 = vrot.slane %v5398_v11, 1 }
 0x169   : > { %v7354_v19 = vpop.f32.mrf.mxu0  ;;  %7670 = vmatpush3.bf16.msra.mxu1 %v8061_v5  ;;  %7659 = vmatprep.subr.bf16.mxu0 %v8199_v1  ;;  %v8080_v5 = vld [vmem:[%s9709_s14 + $0x590] sm:$0xff]  }
 0x16a   : > { %v2680_v26 = vadd.f32 %v2675_v17, %v2594_v12  ;;  %7671 = vmatprep.subr.bf16.mxu1 %v8199_v1  ;;  %v7366_v27 = vpop.f32.mrf.mxu1  ;;  %v5298_v19 = vrot.slane %v5296_v7, 1  ;;  %v5401_v32 = vor.u32 %v5400_v25, %v5396_v21 }
 0x16c   : > { %7660 = vmatpush3.bf16.msra.mxu0 %v8062_v18  ;;  %v8082_v18 = vld [vmem:[%s9709_s14 + $0x588] sm:$0xff]   ;;  %v5299_v29 = vor.u32 %v5298_v19, %v5294_v15 }
 0x16d   : > { %7672 = vmatpush3.bf16.msra.mxu1 %v8063_v20  ;;  %7661 = vmatprep.subr.bf16.mxu0 %v8199_v1  ;;  %v5301_v20 = vshll.u32 %v9526_v6, 16 }
 0x16e   : > { %7673 = vmatprep.subr.bf16.mxu1 %v8199_v1 }
 0x170   : > { %7662 = vmatpush3.bf16.msra.mxu0 %v8064_v24 }
 0x171   : > { %7674 = vmatpush3.bf16.msra.mxu1 %v8065_v30  ;;  %7679 = vmatprep.subr.bf16.mxu0 %v8199_v1  ;;  %v5303_v30 = vrot.slane %v5301_v20, 1  ;;  %v8102_v20 = vld [vmem:[%s9709_s14 + $0x608] sm:$0xff]  }
 0x172   : > { %7691 = vmatprep.subr.bf16.mxu1 %v8199_v1 }
 0x173   : > { %v2774_v37 = vpop.f32.mrf.mxu0  ;;  %7664 = vmatmul.mubr.msk.bf16.vlgmr.msra.gmra.mxu0 %vm1264_vm1, %v4930_v33 }
 0x174   : > { %v2781_v38 = vadd.f32 %v2774_v37, %v2679_v13  ;;  %7680 = vmatpush3.bf16.msra.mxu0 %v8067_v35  ;;  %v2876_v39 = vpop.f32.mrf.mxu1  ;;  %7676 = vmatmul.mubr.msk.bf16.vlgmr.msra.gmra.mxu1 %vm1264_vm1, %v5030_v34  ;;  %v5304_v35 = vsel %vm1402_vm2, %v5299_v29, %v5303_v30  ;;  %v8088_v34 = vld [vmem:[%s9709_s14 + $0x5d8] sm:$0xff]  }
 0x175   : > { %v7377_v41 = vpop.f32.mrf.mxu0  ;;  %7692 = vmatpush3.bf16.msra.mxu1 %v8069_v36  ;;  %7681 = vmatprep.subr.bf16.mxu0 %v8199_v1  ;;  %v8091_v37 = vld [vmem:[%s9709_s14 + $0x5f8] sm:$0xff]  }
 0x176   : > { %v2883_v43 = vadd.f32 %v2876_v39, %v2781_v38  ;;  %v7389_v44 = vpop.f32.mrf.mxu1  ;;  %7693 = vmatprep.subr.bf16.mxu1 %v8199_v1  ;;  %7687 = vmatprep.mubr.msk.bf16.mxu0 %vm8200_vm0, %v8199_v1  ;;  %v8092_v41 = vld [vmem:[%s9709_s14 + $0x5d0] sm:$0xff]  }
 0x177   : > { %v2777_v45 = vpop.f32.mrf.mxu0  ;;  %7699 = vmatprep.mubr.msk.bf16.mxu1 %vm8200_vm0, %v8199_v1  ;;  %v5477_v44 = vld [vmem:[%s9142_s17] sm:$0xe] }
 0x178   : > { %v2782_v46 = vadd.f32 %v2777_v45, %v2680_v26  ;;  %7682 = vmatpush3.bf16.msra.mxu0 %v8070_v40  ;;  %v2879_v47 = vpop.f32.mrf.mxu1  ;;  %v5403_v26 = vshll.u32 %v9533_v10, 16 }
 0x179   : > { %v7378_v49 = vpop.f32.mrf.mxu0  ;;  %7694 = vmatpush3.bf16.msra.mxu1 %v8071_v42  ;;  %7683 = vmatprep.subr.bf16.mxu0 %v8199_v1 }
 0x17a   : > { %v2884_v51 = vadd.f32 %v2879_v47, %v2782_v46  ;;  %7695 = vmatprep.subr.bf16.mxu1 %v8199_v1  ;;  %v7390_v52 = vpop.f32.mrf.mxu1  ;;  %v5405_v33 = vrot.slane %v5403_v26, 1  ;;  %v5563_v47 = vld [vmem:[%s9150_s18] sm:$0xe]  ;;  %s8201_s18 = smov [#allocation2]  }
 0x17b   : > { %v6889_v52 = vcombine.low %v5477_v44, %v9501_v57  ;;  %v6903_v56 = vcombine.low %v5563_v47, %v9506_v58  ;;  %v8096_v57 = vld [vmem:[%s9709_s14 + $0x5c0] sm:$0xff]   ;;  %s8109_s26 = sshll.u32 %s8201_s18, 4  ;;  %s8110_s26 = int_to_ptr.vmem [resolvable:$false] %s8109_s26 }
 0x17c   : > { %7684 = vmatpush3.bf16.msra.mxu0 %v8072_v48  ;;  %v5406_v36 = vsel %vm1402_vm2, %v5401_v32, %v5405_v33  ;;  %v8097_v58 = vld [vmem:[%s9709_s14 + $0x5e0] sm:$0xff]  }
 0x17d   : > { %7696 = vmatpush3.bf16.msra.mxu1 %v8073_v50  ;;  %7685 = vmatprep.subr.bf16.mxu0 %v8199_v1  ;;  %v5576_v62 = vrot.slane %v6903_v56, 1 }
 0x17e   : > { %7697 = vmatprep.subr.bf16.mxu1 %v8199_v1 }
 0x180   : > { %7686 = vmatpush3.bf16.msra.mxu0 %v8074_v53 }
 0x181   : > { %7698 = vmatpush3.bf16.msra.mxu1 %v8075_v54  ;;  %7703 = vmatprep.subr.bf16.mxu0 %v8199_v1  ;;  %v8095_v54 = vld [vmem:[%s9709_s14 + $0x5e8] sm:$0xff]  }
 0x182   : > { %7715 = vmatprep.subr.bf16.mxu1 %v8199_v1 }
 0x183   : > { %v2962_v2 = vpop.f32.mrf.mxu0  ;;  %7688 = vmatmul.mubr.msk.bf16.vlgmr.msra.gmra.mxu0 %vm1264_vm1, %v8076_v59 }
 0x184   : > { %v2969_v3 = vadd.f32 %v2962_v2, %v2883_v43  ;;  %7704 = vmatpush3.bf16.msra.mxu0 %v8077_v60  ;;  %v3048_v4 = vpop.f32.mrf.mxu1  ;;  %7700 = vmatmul.mubr.msk.bf16.vlgmr.msra.gmra.mxu1 %vm1264_vm1, %v8078_v61  ;;  %v8093_v43 = vld [vmem:[%s9709_s14 + $0x5f0] sm:$0xff]   ;;  %v5490_v60 = vrot.slane %v6889_v52, 1  ;;  %v5491_v61 = vrot.slane %v9526_v6, 1  ;;  %v8099_v2 = vld [vmem:[%s9709_s14 + $0x618] sm:$0xff]   ;;  %v5663_v6 = vshrl.u32 %v6889_v52, 16 }
 0x185   : > { %v7401_v8 = vpop.f32.mrf.mxu0  ;;  %7716 = vmatpush3.bf16.msra.mxu1 %v8079_v63  ;;  %7705 = vmatprep.subr.bf16.mxu0 %v8199_v1  ;;  %v5577_v63 = vrot.slane %v9533_v10, 1  ;;  %v5666_v10 = vshll.u32 %v6889_v52, 16 }
 0x186   : > { %v3055_v13 = vadd.f32 %v3048_v4, %v2969_v3  ;;  %v7413_v14 = vpop.f32.mrf.mxu1  ;;  %7717 = vmatprep.subr.bf16.mxu1 %v8199_v1  ;;  %7711 = vmatprep.mubr.msk.bf16.mxu0 %vm8200_vm0, %v8199_v1  ;;  %v5492_v0 = vsel %vm1600_vm3, %v5490_v60, %v5491_v61  ;;  %v8104_v3 = vld [vmem:[%s9142_s17 + $0x8] ss:$0 sps:$4 sm:$0x33]   ;;  %s5778_s17 = sshll.u32 %s1026_s16, 4  ;;  %s9641_s17 = int_to_ptr.vmem [resolvable:$true] %s5778_s17 }
 0x187   : > { %v2965_v16 = vpop.f32.mrf.mxu0  ;;  %7723 = vmatprep.mubr.msk.bf16.mxu1 %vm8200_vm0, %v8199_v1  ;;  %v5578_v4 = vsel %vm1600_vm3, %v5576_v62, %v5577_v63  ;;  %v5671_v11 = vshrl.u32 %v8104_v3, 16  ;;  %s8105_s24 = scalar_lea.vmem %s9641_s17, 256  ;;  %p8112_p11 = scmp.lt.s32.totalorder %s9641_s17, %s8110_s26 }
 0x188   : > { %v2970_v12 = vadd.f32 %v2965_v16, %v2884_v51  ;;  %7706 = vmatpush3.bf16.msra.mxu0 %v8080_v5  ;;  %v3051_v17 = vpop.f32.mrf.mxu1  ;;  %v8094_v51 = vld [vmem:[%s9709_s14 + $0x5c8] sm:$0xff]   ;;  %p8106_p7 = scmp.ne.s32.totalorder %s9641_s17, %s8105_s24 }
 0x189   : > { %v7402_v22 = vpop.f32.mrf.mxu0  ;;  %7718 = vmatpush3.bf16.msra.mxu1 %v8081_v9  ;;  %7707 = vmatprep.subr.bf16.mxu0 %v8199_v1  ;;  %v8101_v9 = vld [vmem:[%s9709_s14 + $0x610] sm:$0xff]  }
 0x18a   : > { %v3056_v27 = vadd.f32 %v3051_v17, %v2970_v12  ;;  %7719 = vmatprep.subr.bf16.mxu1 %v8199_v1  ;;  %v7414_v24 = vpop.f32.mrf.mxu1  ;;  %v5668_v22 = vrot.slane %v5666_v10, 2  ;;  %p8107_p9 = pnand %p8106_p7, %p8340_p3 }
 0x18b   : > { %v8103_v24 = vld [vmem:[%s9709_s14 + $0x600] sm:$0xff]  }
 0x18c   : > { %7708 = vmatpush3.bf16.msra.mxu0 %v8082_v18  ;;  %v5665_v18 = vrot.slane %v5663_v6, 1  ;;  %p8108_p10 = pneg %p8107_p9 }
 0x18d   : > { %7720 = vmatpush3.bf16.msra.mxu1 %v8083_v23  ;;  %7709 = vmatprep.subr.bf16.mxu0 %v8199_v1  ;;  %v5673_v23 = vrot.slane %v5671_v11, 1 }
 0x18e   : > { %7721 = vmatprep.subr.bf16.mxu1 %v8199_v1 }
 0x190   : > { %7710 = vmatpush3.bf16.msra.mxu0 %v8084_v28  ;;  %v5669_v28 = vor.u32 %v5668_v22, %v5665_v18 }
 0x191   : > { %7722 = vmatpush3.bf16.msra.mxu1 %v8085_v31  ;;  %7727 = vmatprep.subr.bf16.mxu0 %v8199_v1 }
 0x192   : > { %7739 = vmatprep.subr.bf16.mxu1 %v8199_v1 }
 0x193   : > { %v3148_v38 = vpop.f32.mrf.mxu0  ;;  %7712 = vmatmul.mubr.msk.bf16.vlgmr.msra.gmra.mxu0 %vm1264_vm1, %v5304_v35 }
 0x194   : > { %v3155_v39 = vadd.f32 %v3148_v38, %v3055_v13  ;;  %7728 = vmatpush3.bf16.msra.mxu0 %v8088_v34  ;;  %v3234_v40 = vpop.f32.mrf.mxu1  ;;  %7724 = vmatmul.mubr.msk.bf16.vlgmr.msra.gmra.mxu1 %vm1264_vm1, %v5406_v36  ;;  %v5674_v13 = vshll.u32 %v8104_v3, 16 }
 0x195   : > { %v7425_v42 = vpop.f32.mrf.mxu0  ;;  %7740 = vmatpush3.bf16.msra.mxu1 %v8091_v37  ;;  %7729 = vmatprep.subr.bf16.mxu0 %v8199_v1 }
 0x196   : > { %v3241_v45 = vadd.f32 %v3234_v40, %v3155_v39  ;;  %v7437_v46 = vpop.f32.mrf.mxu1  ;;  %7741 = vmatprep.subr.bf16.mxu1 %v8199_v1  ;;  %7735 = vmatprep.mubr.msk.bf16.mxu0 %vm8200_vm0, %v8199_v1  ;;  %v5676_v21 = vrot.slane %v5674_v13, 2 }
 0x197   : > { %v3151_v48 = vpop.f32.mrf.mxu0  ;;  %7747 = vmatprep.mubr.msk.bf16.mxu1 %vm8200_vm0, %v8199_v1 }
 0x198   : > { %v3156_v49 = vadd.f32 %v3151_v48, %v3056_v27  ;;  %7730 = vmatpush3.bf16.msra.mxu0 %v8092_v41  ;;  %v3237_v50 = vpop.f32.mrf.mxu1  ;;  %v5677_v29 = vor.u32 %v5676_v21, %v5673_v23 }
 0x199   : > { %v7426_v53 = vpop.f32.mrf.mxu0  ;;  %7742 = vmatpush3.bf16.msra.mxu1 %v8093_v43  ;;  %7731 = vmatprep.subr.bf16.mxu0 %v8199_v1 }
 0x19a   : > { %v3242_v55 = vadd.f32 %v3237_v50, %v3156_v49  ;;  %7743 = vmatprep.subr.bf16.mxu1 %v8199_v1  ;;  %v7438_v59 = vpop.f32.mrf.mxu1  ;;  %v5678_v30 = vsel %vm1773_vm4, %v5669_v28, %v5677_v29 }
 0x19c   : > { %7732 = vmatpush3.bf16.msra.mxu0 %v8094_v51 }
 0x19d   : > { %7744 = vmatpush3.bf16.msra.mxu1 %v8095_v54  ;;  %7733 = vmatprep.subr.bf16.mxu0 %v8199_v1 }
 0x19e   : > { %7745 = vmatprep.subr.bf16.mxu1 %v8199_v1 }
 0x1a0   : > { %7734 = vmatpush3.bf16.msra.mxu0 %v8096_v57 }
 0x1a1   : > { %7746 = vmatpush3.bf16.msra.mxu1 %v8097_v58  ;;  %7751 = vmatprep.subr.bf16.mxu0 %v8199_v1 }
 0x1a3   : > { %v3320_v5 = vpop.f32.mrf.mxu0  ;;  %7736 = vmatmul.mubr.msk.bf16.vlgmr.msra.gmra.mxu0 %vm1264_vm1, %v5492_v0 }
 0x1a4   : > { %v3327_v7 = vadd.f32 %v3320_v5, %v3241_v45  ;;  %7752 = vmatpush3.bf16.msra.mxu0 %v8099_v2  ;;  %v3422_v8 = vpop.f32.mrf.mxu1  ;;  %7748 = vmatmul.mubr.msk.bf16.vlgmr.msra.gmra.mxu1 %vm1264_vm1, %v5578_v4 }
 0x1a5   : > { %v7449_v14 = vpop.f32.mrf.mxu0  ;;  %7753 = vmatprep.subr.bf16.mxu0 %v8199_v1  ;;  %7759 = vmatprep.mubr.msk.bf16.mxu0 %vm8200_vm0, %v8199_v1 }
 0x1a6   : > { %v3429_v16 = vadd.f32 %v3422_v8, %v3327_v7  ;;  %v7461_v12 = vpop.f32.mrf.mxu1 }
 0x1a7   : > { %v3323_v17 = vpop.f32.mrf.mxu0 }
 0x1a8   : > { %v3328_v15 = vadd.f32 %v3323_v17, %v3242_v55  ;;  %7754 = vmatpush3.bf16.msra.mxu0 %v8101_v9  ;;  %v3425_v19 = vpop.f32.mrf.mxu1 }
 0x1a9   : > { %v7450_v25 = vpop.f32.mrf.mxu0  ;;  %7755 = vmatprep.subr.bf16.mxu0 %v8199_v1 }
 0x1aa   : > { %v3430_v26 = vadd.f32 %v3425_v19, %v3328_v15  ;;  %v7462_v27 = vpop.f32.mrf.mxu1 }
 0x1ac   : > { %7756 = vmatpush3.bf16.msra.mxu0 %v8102_v20 }
 0x1ad   : > { %7757 = vmatprep.subr.bf16.mxu0 %v8199_v1 }
 0x1b0   : > { %7758 = vmatpush3.bf16.msra.mxu0 %v8103_v24 }
 0x1b3   : > { %v3524_v31 = vpop.f32.mrf.mxu0  ;;  %7760 = vmatmul.mubr.msk.bf16.vlgmr.msra.gmra.mxu0 %vm1264_vm1, %v5678_v30 }
 0x1b4   : > { %v3531_v32 = vadd.f32 %v3524_v31, %v3429_v16  ;;  %v3610_v33 = vpop.f32.mrf.mxu1 }
 0x1b5   : > { %v7473_v35 = vpop.f32.mrf.mxu0 }
 0x1b6   : > { %v3617_v34 = vadd.f32 %v3610_v33, %v3531_v32  ;;  %v7485_v36 = vpop.f32.mrf.mxu1 }
 0x1b7   : > { %v3527_v37 = vpop.f32.mrf.mxu0 }
 0x1b8   : > { %v3532_v38 = vadd.f32 %v3527_v37, %v3430_v26  ;;  %v3613_v39 = vpop.f32.mrf.mxu1 }
 0x1b9   : > { %v7474_v40 = vpop.f32.mrf.mxu0 }
 0x1ba   : > { %v3618_v41 = vadd.f32 %v3613_v39, %v3532_v38  ;;  %v7486_v42 = vpop.f32.mrf.mxu1 }
 0x1c3   : > { %v3696_v43 = vpop.f32.mrf.mxu0 }
 0x1c4   : > { %v3703_v44 = vadd.f32 %v3696_v43, %v3617_v34  ;;  %v3796_v1 = vpop.f32.mrf.mxu1 }
 0x1c5   : > { %v7497_v45 = vpop.f32.mrf.mxu0 }
 0x1c6   : > { %v3803_v46 = vadd.f32 %v3796_v1, %v3703_v44  ;;  %v7509_v47 = vpop.f32.mrf.mxu1 }
 0x1c7   : > { %v3699_v48 = vpop.f32.mrf.mxu0 }
 0x1c8   : > { %v3704_v49 = vadd.f32 %v3699_v48, %v3618_v41  ;;  %v3799_v50 = vpop.f32.mrf.mxu1 }
 0x1c9   : > { %v7498_v51 = vpop.f32.mrf.mxu0 }
 0x1ca   : > { %v3804_v52 = vadd.f32 %v3799_v50, %v3704_v49  ;;  %v7510_v53 = vpop.f32.mrf.mxu1 }
 0x1d3   : > { %v3882_v54 = vpop.f32.mrf.mxu0 }
 0x1d4   : > { %v3889_v56 = vadd.f32 %v3882_v54, %v3803_v46  ;;  %v3968_v55 = vpop.f32.mrf.mxu1 }
 0x1d5   : > { %v7521_v59 = vpop.f32.mrf.mxu0 }
 0x1d6   : > { %v3975_v57 = vadd.f32 %v3968_v55, %v3889_v56  ;;  %v7533_v60 = vpop.f32.mrf.mxu1 }
 0x1d7   : > { %v3885_v61 = vpop.f32.mrf.mxu0 }
 0x1d8   : > { %v3890_v58 = vadd.f32 %v3885_v61, %v3804_v52  ;;  %v3971_v62 = vpop.f32.mrf.mxu1 }
 0x1d9   : > { %v7522_v63 = vpop.f32.mrf.mxu0 }
 0x1da   : > { %v3976_v0 = vadd.f32 %v3971_v62, %v3890_v58  ;;  %v7534_v2 = vpop.f32.mrf.mxu1 }
 0x1e3   : > { %v4070_v3 = vpop.f32.mrf.mxu0 }
 0x1e4   : > { %v4077_v4 = vadd.f32 %v4070_v3, %v3975_v57  ;;  %v4172_v5 = vpop.f32.mrf.mxu1 }
 0x1e5   : > { %v7545_v6 = vpop.f32.mrf.mxu0 }
 0x1e6   : > { %v4179_v7 = vadd.f32 %v4172_v5, %v4077_v4  ;;  %v7557_v8 = vpop.f32.mrf.mxu1 }
 0x1e7   : > { %v4073_v9 = vpop.f32.mrf.mxu0 }
 0x1e8   : > { %v4078_v10 = vadd.f32 %v4073_v9, %v3976_v0  ;;  %v4175_v11 = vpop.f32.mrf.mxu1 }
 0x1e9   : > { %v7546_v13 = vpop.f32.mrf.mxu0 }
 0x1ea   : > { %v4180_v14 = vadd.f32 %v4175_v11, %v4078_v10  ;;  %v7558_v16 = vpop.f32.mrf.mxu1 }
 0x1f3   : > { %v4258_v12 = vpop.f32.mrf.mxu0 }
 0x1f4   : > { %v4265_v17 = vadd.f32 %v4258_v12, %v4179_v7  ;;  %v4344_v18 = vpop.f32.mrf.mxu1 }
 0x1f5   : > { %v7569_v15 = vpop.f32.mrf.mxu0 }
 0x1f6   : > { %v4351_v19 = vadd.f32 %v4344_v18, %v4265_v17  ;;  %v7581_v20 = vpop.f32.mrf.mxu1 }
 0x1f7   : > { %v4261_v22 = vpop.f32.mrf.mxu0 }
 0x1f8   : > { %v4266_v23 = vadd.f32 %v4261_v22, %v4180_v14  ;;  %v4347_v21 = vpop.f32.mrf.mxu1 }
 0x1f9   : > { %v7570_v25 = vpop.f32.mrf.mxu0 }
 0x1fa   : > { %v4352_v26 = vadd.f32 %v4347_v21, %v4266_v23  ;;  %v7582_v27 = vpop.f32.mrf.mxu1 }
 0x203   : > { %v4444_v24 = vpop.f32.mrf.mxu0 }
 0x204   : > { %v4451_v28 = vadd.f32 %v4444_v24, %v4351_v19  ;;  %v4530_v29 = vpop.f32.mrf.mxu1 }
 0x205   : > { %v7593_v30 = vpop.f32.mrf.mxu0 }
 0x206   : > { %v4537_v31 = vadd.f32 %v4530_v29, %v4451_v28  ;;  %v7605_v32 = vpop.f32.mrf.mxu1 }
 0x207   : > { %v4447_v33 = vpop.f32.mrf.mxu0 }
 0x208   : > { %v4452_v35 = vadd.f32 %v4447_v33, %v4352_v26  ;;  %v4533_v34 = vpop.f32.mrf.mxu1 }
 0x209   : > { %v7594_v36 = vpop.f32.mrf.mxu0 }
 0x20a   : > { %v4538_v37 = vadd.f32 %v4533_v34, %v4452_v35  ;;  %v7606_v38 = vpop.f32.mrf.mxu1 }
 0x213   : > { %v4616_v39 = vpop.f32.mrf.mxu0 }
 0x214   : > { %v4623_v40 = vadd.f32 %v4616_v39, %v4537_v31  ;;  %v4718_v41 = vpop.f32.mrf.mxu1 }
 0x215   : > { %v7617_v42 = vpop.f32.mrf.mxu0 }
 0x216   : > { %v4725_v43 = vadd.f32 %v4718_v41, %v4623_v40  ;;  %v7629_v44 = vpop.f32.mrf.mxu1 }
 0x217   : > { %v4619_v1 = vpop.f32.mrf.mxu0 }
 0x218   : > { %v4624_v45 = vadd.f32 %v4619_v1, %v4538_v37  ;;  %v4721_v46 = vpop.f32.mrf.mxu1 }
 0x219   : > { %v7618_v47 = vpop.f32.mrf.mxu0 }
 0x21a   : > { %v4726_v48 = vadd.f32 %v4721_v46, %v4624_v45  ;;  %v7630_v49 = vpop.f32.mrf.mxu1  ;;  %v6923_v45 = vld [vmem:[%s9741_s30] ss:$0 sm:$0xff]  ;;  %s8111_s30 = scalar_lea.vmem %s8110_s26, 512 }
 0x21b   : > { %p8113_p12 = scmp.lt.s32.totalorder %s8111_s30, %s8105_s24 }
 0x21d   : > { %p8114_p13 = por %p8113_p12, %p8112_p11 }
 0x21f   : > { %p8115_p0 = pnand %p8114_p13, %p8108_p10 }
 0x223   : > { %v4820_v50 = vpop.f32.mrf.mxu0 }
 0x224   : > { %v4906_v51 = vpop.f32.mrf.mxu1  ;;  %v4827_v16 = vadd.f32 %v4820_v50, %v4725_v43 }
 0x225   : > { %v7641_v52 = vpop.f32.mrf.mxu0 }
 0x226   : > { %v7653_v53 = vpop.f32.mrf.mxu1  ;;  %v4913_v19 = vadd.f32 %v4906_v51, %v4827_v16 }
 0x227   : > { %v4823_v54 = vpop.f32.mrf.mxu0 }
 0x228   : > { %v4909_v56 = vpop.f32.mrf.mxu1  ;;  %v4828_v20 = vadd.f32 %v4823_v54, %v4726_v48 }
 0x229   : > { %v7642_v55 = vpop.f32.mrf.mxu0 }
 0x22a   : > { %v7654_v59 = vpop.f32.mrf.mxu1  ;;  %v4914_v21 = vadd.f32 %v4909_v56, %v4828_v20 }
 0x233   : > { %v4992_v57 = vpop.f32.mrf.mxu0 }
 0x234   : > { %v5092_v60 = vpop.f32.mrf.mxu1  ;;  %v4999_v23 = vadd.f32 %v4992_v57, %v4913_v19 }
 0x235   : > { %v7665_v61 = vpop.f32.mrf.mxu0 }
 0x236   : > { %v7677_v58 = vpop.f32.mrf.mxu1  ;;  %v5099_v25 = vadd.f32 %v5092_v60, %v4999_v23 }
 0x237   : > { %v4995_v62 = vpop.f32.mrf.mxu0 }
 0x238   : > { %v5095_v63 = vpop.f32.mrf.mxu1  ;;  %v5000_v26 = vadd.f32 %v4995_v62, %v4914_v21 }
 0x239   : > { %v7666_v0 = vpop.f32.mrf.mxu0 }
 0x23a   : > { %v7678_v2 = vpop.f32.mrf.mxu1  ;;  %v5100_v28 = vadd.f32 %v5095_v63, %v5000_v26 }
 0x243   : > { %v5178_v3 = vpop.f32.mrf.mxu0 }
 0x244   : > { %v5264_v4 = vpop.f32.mrf.mxu1  ;;  %v5185_v27 = vadd.f32 %v5178_v3, %v5099_v25 }
 0x245   : > { %v7689_v5 = vpop.f32.mrf.mxu0 }
 0x246   : > { %v7701_v6 = vpop.f32.mrf.mxu1  ;;  %v5271_v31 = vadd.f32 %v5264_v4, %v5185_v27 }
 0x247   : > { %v5181_v7 = vpop.f32.mrf.mxu0 }
 0x248   : > { %v5267_v8 = vpop.f32.mrf.mxu1  ;;  %v5186_v32 = vadd.f32 %v5181_v7, %v5100_v28 }
 0x249   : > { %v7690_v9 = vpop.f32.mrf.mxu0 }
 0x24a   : > { %v7702_v10 = vpop.f32.mrf.mxu1  ;;  %v5272_v38 = vadd.f32 %v5267_v8, %v5186_v32 }
 0x253   : > { %v5366_v11 = vpop.f32.mrf.mxu0 }
 0x254   : > { %v5468_v13 = vpop.f32.mrf.mxu1  ;;  %v5373_v34 = vadd.f32 %v5366_v11, %v5271_v31 }
 0x255   : > { %v7713_v14 = vpop.f32.mrf.mxu0 }
 0x256   : > { %v7725_v12 = vpop.f32.mrf.mxu1  ;;  %v5475_v40 = vadd.f32 %v5468_v13, %v5373_v34 }
 0x257   : > { %v5369_v17 = vpop.f32.mrf.mxu0 }
 0x258   : > { %v5471_v18 = vpop.f32.mrf.mxu1  ;;  %v5374_v41 = vadd.f32 %v5369_v17, %v5272_v38 }
 0x259   : > { %v7714_v15 = vpop.f32.mrf.mxu0 }
 0x25a   : > { %v7726_v22 = vpop.f32.mrf.mxu1  ;;  %v5476_v43 = vadd.f32 %v5471_v18, %v5374_v41 }
 0x263   : > { %v5554_v24 = vpop.f32.mrf.mxu0 }
 0x264   : > { %v5640_v29 = vpop.f32.mrf.mxu1  ;;  %v5561_v42 = vadd.f32 %v5554_v24, %v5475_v40 }
 0x265   : > { %v7737_v30 = vpop.f32.mrf.mxu0 }
 0x266   : > { %v7749_v33 = vpop.f32.mrf.mxu1  ;;  %v5647_v44 = vadd.f32 %v5640_v29, %v5561_v42 }
 0x267   : > { %v5557_v35 = vpop.f32.mrf.mxu0 }
 0x268   : > { %v5643_v36 = vpop.f32.mrf.mxu1  ;;  %v5562_v1 = vadd.f32 %v5557_v35, %v5476_v43 }
 0x269   : > { %v7738_v37 = vpop.f32.mrf.mxu0 }
 0x26a   : > { %v7750_v39 = vpop.f32.mrf.mxu1  ;;  %v5648_v49 = vadd.f32 %v5643_v36, %v5562_v1 }
 0x273   : > { %v5740_v46 = vpop.f32.mrf.mxu0 }
 0x274   : > { %v5747_v47 = vadd.f32 %v5740_v46, %v5647_v44 }
 0x275   : > { %v7761_v48 = vpop.f32.mrf.mxu0 }
 0x276   : > { %v5755_v50 = vadd.f32 %v6923_v45, %v5747_v47 }
 0x277   : > { %v5743_v51 = vpop.f32.mrf.mxu0 }
 0x278   : > { %v5757_v52 = vmax.f32 %v5755_v50, 0.0  ;;  %v5748_v53 = vadd.f32 %v5743_v51, %v5648_v49 }
 0x279   : > { %v7762_v54 = vpop.f32.mrf.mxu0 }
 0x27a   : > { %5759 = vst.msk [vmem:[%s1026_s16] sm:$0xff] %vm1264_vm1, %v5757_v52  ;;  %v5756_v56 = vadd.f32 %v6923_v45, %v5748_v53 }
 0x27c   : > { %v5758_v55 = vmax.f32 %v5756_v56, 0.0 }
 0x27e   : > { %5760 = vst.msk [vmem:[%s1026_s16 + $0x8] sm:$0xff] %vm1264_vm1, %v5758_v55 }
 0x27f   : > { %8118 = shalt.err (!%p8115_p0)
}
 0x280   : > { %s8119_s20 = scalar_lea.hbm %s9639_s29, 256  ;;  %s8123_s27 = scalar_lea.hbm %s9743_s0, 8192 }
 0x281   : > { %p8120_p1 = scmp.ne.s32.totalorder %s9639_s29, %s8119_s20  ;;  %p8124_p5 = scmp.lt.s32.totalorder %s9639_s29, %s9743_s0 }
 0x282   : > { %p8125_p6 = scmp.lt.s32.totalorder %s8123_s27, %s8119_s20 }
 0x283   : > { %p8121_p2 = pnand %p8120_p1, %p8340_p3 }
 0x284   : > { %p8126_p7 = por %p8125_p6, %p8124_p5 }
 0x285   : > { %p8122_p4 = pneg %p8121_p2 }
 0x287   : > { %p8127_p9 = pnand %p8126_p7, %p8122_p4 }
 0x289   : > { %8130 = shalt.err (!%p8127_p9)
}
 0x28a   : > { %s8202_s15 = smov 128   ;;  %s8203_s24 = smov 8  }
 0x28b   : > { %7771 = dma.vmem_to_hbm [thread:$0]  (%p8340_p3), %s9641_s17, 256, %s9639_s29, %s9644_s21, %s8202_s15, %s8202_s15, %s8203_s24  }
 0x28c PF: > { %s9744_s18 = sld [smem:[#allocation9_spill]] }
 0x28d   : > { %s9745_s26 = sld [smem:[#allocation5_spill]] }
 0x292   : > { %p7777_p10 = scmp.ge.s32.totalorder %s9744_s18, 2 }
 0x293   : > { %s5793_s23 = sand.u32 1, %s9745_s26  }
 0x294   : > { %p7774_p11 = pnand %p7777_p10, %p8349_p8  ;;  %s5794_s20 = scalar_lea.sflag [#allocation3], %s5793_s23 }
 0x296   : > { %p7775_p12 = pneg %p7774_p11 }
 0x298   : > { %8164 = dma.done.wait (%p7775_p12), %s5794_s20, 256  }
 0x299   : > { %8166 = vsyncadd (%p7775_p12), %s5794_s20, 4294967040  ;;  %s29_s28 = sadd.s32 1, %s9744_s18   ;;  %s9747_s19 = sld [smem:[#allocation6_spill]] }
 0x29a   : > { %p26_p13 = scmp.ge.s32.totalorder %s29_s28, 34   ;;  %s9748_s23 = sld [smem:[#allocation14_spill]] }
 0x29b   : > { %s9749_s24 = sld [smem:[#allocation7_spill]]  ;;  %s9753_s21 = smov %s8173_s22 }
 0x29c   : > { %s9750_s25 = sld [smem:[#allocation8_spill]]  ;;  %28 = sbr.rel (!%p26_p13) target bundleno = 9 (0x9), region = 212 }
 0x29d   : > { %s9751_s26 = sld [smem:[#allocation10_spill]] }
 0x29e   : > { %s9752_s27 = sld [smem:[#allocation12_spill]] }
 0x29f   : > { %s9754_s22 = smov %s9747_s19 }
 0x2a1   :  { %5799 = vsyncpa [#allocation3], 1 }
 0x2a2   :  { %5801 = vsyncpa [#allocation3 + $0x1], 1 }

</bundles_post_ra>
